<compile_context>
chip_gen: v6e
topology: v6e:2x2x1
jax: 0.10.0
libtpu: 0.0.40
codegen_flags: <defaults>
</compile_context>

<pallas_src>
import functools

import jax
import jax.numpy as jnp
import numpy as np
from jax.experimental import pallas as pl
from jax.experimental.pallas import tpu as pltpu

EPS = 1e-5  # PyTorch BatchNorm default


# --------------------------- in-kernel building blocks ----------------------

def _fill_hpadded(xpad_ref, val):
    """Write `val` ([n, h, w*c]) into an H-padded [n, h+2, w*c] bf16 scratch.

    Only the two halo rows are zeroed; the W-direction zero padding is encoded
    in the block-Toeplitz conv weights, so no full-buffer memset is needed.
    """
    n, hp2, lanes = xpad_ref.shape
    zrow = jnp.zeros((n, 1, lanes), xpad_ref.dtype)
    xpad_ref[:, 0:1, :] = zrow
    xpad_ref[:, hp2 - 1:hp2, :] = zrow
    xpad_ref[:, 1:hp2 - 1, :] = val.astype(xpad_ref.dtype)


def _conv_bn_pool_block(xpad_ref, wc_ref, bnp_ref, p_ref, eo_ref,
                        *, n, h, w, cin, cout):
    """conv3x3(pad=1)+bias -> BatchNorm2d(batch stats) -> maxpool2x2 -> ReLU.

    Activations are lane-dense: rows = (n, y), lanes = (x, c).

      xpad_ref: [n, h+2, w*cin]  bf16, halo rows zeroed.
      wc_ref:   [3, w*cin, w*cout] bf16 block-Toeplitz weight (one slab per
                kernel row kh; encodes the 3 kw taps + W-boundary zero pad).
      bnp_ref:  [3, w*cout] f32: x-tiled conv bias / BN gamma / BN beta.
      p_ref:    [w*cout, w*cout] f32 0/1 matrix (S @ S.T): sums each channel
                over all x groups and broadcasts it back to every x position.
      eo_ref:   [2, w*cout, (w//2)*cout] f32 0/1 matrices selecting even / odd
                x columns (the W half of the 2x2 max-pool as two matmuls).

    Returns the pooled activation, [n*(h//2), (w//2)*cout] f32.
    """
    rows, k_in = n * h, w * cin
    n_out = w * cout

    # conv: 3 accumulated lane-dense MXU matmuls (K = w*cin, N = w*cout).
    acc = jnp.dot(xpad_ref[:, 0:h, :].reshape(rows, k_in), wc_ref[0, :, :],
                  preferred_element_type=jnp.float32)
    for dh in (1, 2):
        slab = xpad_ref[:, dh:dh + h, :].reshape(rows, k_in)
        acc = acc + jnp.dot(slab, wc_ref[dh, :, :],
                            preferred_element_type=jnp.float32)
    acc = acc + bnp_ref[0:1, :]                                   # conv bias

    # BatchNorm2d, training-mode batch statistics (per channel over n, h, w).
    pmat = p_ref[...]
    inv_cnt = 1.0 / float(n * h * w)
    rsum = jnp.sum(acc, axis=0, keepdims=True)                    # [1, w*cout]
    rsumsq = jnp.sum(acc * acc, axis=0, keepdims=True)
    mean_l = jnp.dot(rsum, pmat, preferred_element_type=jnp.float32) * inv_cnt
    ex2_l = jnp.dot(rsumsq, pmat, preferred_element_type=jnp.float32) * inv_cnt
    var_l = jnp.maximum(ex2_l - mean_l * mean_l, 0.0)
    y = (bnp_ref[1:2, :] * (acc - mean_l) * jax.lax.rsqrt(var_l + EPS)
         + bnp_ref[2:3, :])

    # 2x2 max-pool + ReLU (H: row-pair max; W: even/odd selection matmuls).
    ho = h // 2
    y3 = y.reshape(n * ho, 2, n_out)
    zh = jnp.maximum(y3[:, 0, :], y3[:, 1, :])                    # pool over H
    ze = jnp.dot(zh, eo_ref[0, :, :], preferred_element_type=jnp.float32)
    zo = jnp.dot(zh, eo_ref[1, :, :], preferred_element_type=jnp.float32)
    return jnp.maximum(jnp.maximum(ze, zo), 0.0)                  # [n*ho, wo*cout]


# ------------------------------ fused kernel --------------------------------

def cnn5_kernel(x_ref,
                wc1_ref, bnp1_ref, p1_ref, eo1_ref,
                wc2_ref, bnp2_ref, p2_ref, eo2_ref,
                wc3_ref, bnp3_ref, p3_ref, eo3_ref,
                wf1_ref, fcb_ref, wf2_ref, bf2_ref,
                out_ref,
                xpad1, xpad2, xpad3,
                *, n, nc):
    # ---- block 1: 32x32x3 -> 16x16 x nc ----
    _fill_hpadded(xpad1, x_ref[...])
    a1 = _conv_bn_pool_block(xpad1, wc1_ref, bnp1_ref, p1_ref, eo1_ref,
                             n=n, h=32, w=32, cin=3, cout=nc)
    # ---- block 2: 16x16 x nc -> 8x8 x 2nc ----
    _fill_hpadded(xpad2, a1.reshape(n, 16, 16 * nc))
    a2 = _conv_bn_pool_block(xpad2, wc2_ref, bnp2_ref, p2_ref, eo2_ref,
                             n=n, h=16, w=16, cin=nc, cout=2 * nc)
    # ---- block 3: 8x8 x 2nc -> 4x4 x 4nc ----
    _fill_hpadded(xpad3, a2.reshape(n, 8, 16 * nc))
    a3 = _conv_bn_pool_block(xpad3, wc3_ref, bnp3_ref, p3_ref, eo3_ref,
                             n=n, h=8, w=8, cin=2 * nc, cout=4 * nc)

    # ---- fc1: 4 accumulated matmuls with K = 4*4nc (one per pooled row) ----
    f = 4 * nc
    a3r = a3.reshape(n, 4, 4 * f)                 # rows=(n, y), lanes=(x, c)
    accf = jnp.dot(a3r[:, 0, :].astype(jnp.bfloat16), wf1_ref[0, :, :],
                   preferred_element_type=jnp.float32)
    for hh in (1, 2, 3):
        accf = accf + jnp.dot(a3r[:, hh, :].astype(jnp.bfloat16),
                              wf1_ref[hh, :, :],
                              preferred_element_type=jnp.float32)
    accf = accf + fcb_ref[0:1, :]

    # fcbn1 (BatchNorm1d, batch statistics) + ReLU, all in f32.
    mean = jnp.mean(accf, axis=0, keepdims=True)
    var = jnp.maximum(
        jnp.mean(accf * accf, axis=0, keepdims=True) - mean * mean, 0.0)
    hfc = (fcb_ref[1:2, :] * (accf - mean) * jax.lax.rsqrt(var + EPS)
           + fcb_ref[2:3, :])
    hfc = jnp.maximum(hfc, 0.0)

    # ---- fc2 ----
    out_ref[...] = (jnp.dot(hfc.astype(jnp.bfloat16), wf2_ref[...],
                            preferred_element_type=jnp.float32) + bf2_ref[...])


# ------------------------ host-side weight preparation ----------------------

def _toeplitz_conv_weight(wt, w):
    """PyTorch [cout, cin, 3, 3] -> block-Toeplitz [3, w*cin, w*cout].

    Wd[kh, xi*cin + k, xo*cout + c] = wt[c, k, kh, xi - xo + 1] when the kw tap
    xi - xo + 1 is in {0,1,2} and xi is in-bounds; zero otherwise (this encodes
    the W-direction padding=1).
    """
    cout, cin = wt.shape[0], wt.shape[1]
    wd = np.zeros((3, w * cin, w * cout), np.float32)
    for dh in range(3):
        for xo in range(w):
            for dw in range(3):
                xi = xo + dw - 1
                if 0 <= xi < w:
                    wd[dh, xi * cin:(xi + 1) * cin,
                       xo * cout:(xo + 1) * cout] = wt[:, :, dh, dw].T
    return wd


def _pool_select_matrices(w, cout):
    """0/1 matrices selecting the even / odd x columns: [2, w*cout, (w//2)*cout]."""
    wo = w // 2
    eo = np.zeros((2, w * cout, wo * cout), np.float32)
    eye = np.eye(cout, dtype=np.float32)
    for xo in range(wo):
        eo[0, (2 * xo) * cout:(2 * xo + 1) * cout, xo * cout:(xo + 1) * cout] = eye
        eo[1, (2 * xo + 1) * cout:(2 * xo + 2) * cout, xo * cout:(xo + 1) * cout] = eye
    return eo


def prepare_params(tp, num_channels=8, num_classes=10):
    """Convert PyTorch-layout parameters to the kernel's packed layouts."""
    nc = num_channels
    kp = {}
    specs = [("1", 32, 3, nc), ("2", 16, nc, 2 * nc), ("3", 8, 2 * nc, 4 * nc)]
    for tag, w, cin, cout in specs:
        wt = np.asarray(tp["conv" + tag + "_w"], np.float32)
        kp["wc" + tag] = jnp.asarray(_toeplitz_conv_weight(wt, w), jnp.bfloat16)
        b = np.asarray(tp["conv" + tag + "_b"], np.float32)
        g = np.asarray(tp["bn" + tag + "_g"], np.float32)
        be = np.asarray(tp["bn" + tag + "_b"], np.float32)
        kp["bnp" + tag] = jnp.asarray(
            np.stack([np.tile(b, w), np.tile(g, w), np.tile(be, w)]), jnp.float32)
        kp["p" + tag] = jnp.asarray(
            np.tile(np.eye(cout, dtype=np.float32), (w, w)), jnp.float32)
        kp["eo" + tag] = jnp.asarray(_pool_select_matrices(w, cout), jnp.float32)

    f = 4 * nc
    # fc1: PyTorch [out, in] with in flattened as (c, h, w) -> [4(h), 4*4nc(x,c), out]
    wf1 = np.asarray(tp["fc1_w"], np.float32)
    kp["wf1"] = jnp.asarray(
        wf1.reshape(f, f, 4, 4).transpose(2, 3, 1, 0).reshape(4, 4 * f, f),
        jnp.bfloat16)
    kp["fcb"] = jnp.asarray(
        np.stack([np.asarray(tp["fc1_b"], np.float32),
                  np.asarray(tp["fcbn1_g"], np.float32),
                  np.asarray(tp["fcbn1_b"], np.float32)]), jnp.float32)
    kp["wf2"] = jnp.asarray(np.asarray(tp["fc2_w"], np.float32).T, jnp.bfloat16)
    kp["bf2"] = jnp.asarray(
        np.asarray(tp["fc2_b"], np.float32).reshape(1, num_classes), jnp.float32)
    return kp


# ------------------------------ host wrapper --------------------------------

@functools.partial(jax.jit, static_argnames=("num_channels", "num_classes"))
def cnn5_forward(x_nchw, kp, *, num_channels=8, num_classes=10):
    nc = num_channels
    n = x_nchw.shape[0]
    # Lane-dense input: NCHW -> [n, H, W*C] bf16 (lane index = x*3 + channel).
    x = (jnp.transpose(x_nchw, (0, 2, 3, 1))
         .reshape(n, 32, 32 * 3).astype(jnp.bfloat16))

    args = (x,
            kp["wc1"], kp["bnp1"], kp["p1"], kp["eo1"],
            kp["wc2"], kp["bnp2"], kp["p2"], kp["eo2"],
            kp["wc3"], kp["bnp3"], kp["p3"], kp["eo3"],
            kp["wf1"], kp["fcb"], kp["wf2"], kp["bf2"])

    # VMEM budget from batch size: ~a few MiB of weights / selection matrices
    # plus ~0.25 MiB of activations & scratch per sample; cap below v7x's 64 MiB.
    vmem_limit = max(32 * 1024 * 1024,
                     min(8 * 1024 * 1024 + n * 512 * 1024, 60 * 1024 * 1024))

    kern = functools.partial(cnn5_kernel, n=n, nc=nc)
    return pl.pallas_call(
        kern,
        out_shape=jax.ShapeDtypeStruct((n, num_classes), jnp.float32),
        in_specs=[pl.BlockSpec(memory_space=pltpu.MemorySpace.VMEM)] * len(args),
        out_specs=pl.BlockSpec(memory_space=pltpu.MemorySpace.VMEM),
        scratch_shapes=[
            pltpu.VMEM((n, 34, 32 * 3), jnp.bfloat16),    # H-padded input, block 1
            pltpu.VMEM((n, 18, 16 * nc), jnp.bfloat16),   # H-padded input, block 2
            pltpu.VMEM((n, 10, 16 * nc), jnp.bfloat16),   # H-padded input, block 3
        ],
        compiler_params=pltpu.CompilerParams(vmem_limit_bytes=vmem_limit),
    )(*args)


def init_torch_params(key, num_channels=8, num_classes=10):
    """Random parameters in PyTorch layouts (conv [cout,cin,3,3], fc [out,in])."""
    nc = num_channels
    f = 4 * nc
    ks = jax.random.split(key, 16)

    def rnd(k, shape, scale=0.05, shift=0.0):
        return shift + scale * jax.random.normal(k, shape, jnp.float32)

    return {
        "conv1_w": rnd(ks[0], (nc, 3, 3, 3)),       "conv1_b": rnd(ks[1], (nc,)),
        "bn1_g": rnd(ks[2], (nc,), 0.1, 1.0),       "bn1_b": rnd(ks[3], (nc,), 0.1),
        "conv2_w": rnd(ks[4], (2 * nc, nc, 3, 3)),  "conv2_b": rnd(ks[5], (2 * nc,)),
        "bn2_g": rnd(ks[6], (2 * nc,), 0.1, 1.0),   "bn2_b": rnd(ks[7], (2 * nc,), 0.1),
        "conv3_w": rnd(ks[8], (4 * nc, 2 * nc, 3, 3)), "conv3_b": rnd(ks[9], (4 * nc,)),
        "bn3_g": rnd(ks[10], (4 * nc,), 0.1, 1.0),  "bn3_b": rnd(ks[11], (4 * nc,), 0.1),
        "fc1_w": rnd(ks[12], (f, 16 * f)),          "fc1_b": rnd(ks[13], (f,)),
        "fcbn1_g": jnp.ones((f,), jnp.float32),     "fcbn1_b": jnp.zeros((f,), jnp.float32),
        "fc2_w": rnd(ks[14], (num_classes, f)),     "fc2_b": rnd(ks[15], (num_classes,)),
    }


if __name__ == "__main__":
    num_channels = 8      # small instantiation of CNN5(num_channels=8)
    num_classes = 10
    key = jax.random.PRNGKey(0)
    k_x, k_p = jax.random.split(key)

    # CNN5 requires 32x32 spatial input (3 pools of 2 -> 4x4 before the flatten).
    x = jax.random.normal(k_x, (2, 3, 32, 32), jnp.float32)   # NCHW like PyTorch
    tp = init_torch_params(k_p, num_channels=num_channels, num_classes=num_classes)
    kp = prepare_params(tp, num_channels=num_channels, num_classes=num_classes)

    out = cnn5_forward(x, kp, num_channels=num_channels, num_classes=num_classes)
    out = jax.block_until_ready(out)
    assert out.shape == (2, num_classes), out.shape
    print("KERNEL_OK")
</pallas_src>

<mosaic_0001>
module attributes {stable_mosaic.version = 11 : i64} {
  func.func @cnn5_kernel(%arg0: memref<2x32x96xbf16, #tpu.memory_space<vmem>>, %arg1: memref<3x96x256xbf16, #tpu.memory_space<vmem>>, %arg2: memref<3x256xf32, #tpu.memory_space<vmem>>, %arg3: memref<256x256xf32, #tpu.memory_space<vmem>>, %arg4: memref<2x256x128xf32, #tpu.memory_space<vmem>>, %arg5: memref<3x128x256xbf16, #tpu.memory_space<vmem>>, %arg6: memref<3x256xf32, #tpu.memory_space<vmem>>, %arg7: memref<256x256xf32, #tpu.memory_space<vmem>>, %arg8: memref<2x256x128xf32, #tpu.memory_space<vmem>>, %arg9: memref<3x128x256xbf16, #tpu.memory_space<vmem>>, %arg10: memref<3x256xf32, #tpu.memory_space<vmem>>, %arg11: memref<256x256xf32, #tpu.memory_space<vmem>>, %arg12: memref<2x256x128xf32, #tpu.memory_space<vmem>>, %arg13: memref<4x128x32xbf16, #tpu.memory_space<vmem>>, %arg14: memref<3x32xf32, #tpu.memory_space<vmem>>, %arg15: memref<32x10xbf16, #tpu.memory_space<vmem>>, %arg16: memref<1x10xf32, #tpu.memory_space<vmem>>, %arg17: memref<2x10xf32, #tpu.memory_space<vmem>>, %arg18: memref<2x34x96xbf16, #tpu.memory_space<vmem>>, %arg19: memref<2x18x128xbf16, #tpu.memory_space<vmem>>, %arg20: memref<2x10x128xbf16, #tpu.memory_space<vmem>>) attributes {dimension_semantics = [], scalar_prefetch = 0 : i64, scratch_operands = 3 : i64, tpu.core_type = #tpu.core_type<tc>} {
    %c0 = arith.constant 0 : index
    %c0_0 = arith.constant 0 : index
    %c0_1 = arith.constant 0 : index
    %0 = vector.load %arg0[%c0, %c0_0, %c0_1] : memref<2x32x96xbf16, #tpu.memory_space<vmem>>, vector<2x32x96xbf16>
    %cst = arith.constant 0.000000e+00 : bf16
    %1 = vector.broadcast %cst : bf16 to vector<2x1x96xbf16>
    %c0_2 = arith.constant 0 : index
    %c0_3 = arith.constant 0 : index
    %c0_4 = arith.constant 0 : index
    %2 = vector.load %arg18[%c0_2, %c0_3, %c0_4] : memref<2x34x96xbf16, #tpu.memory_space<vmem>>, vector<2x1x96xbf16>
    tpu.vector_store %arg18[%c0_2, %c0_3, %c0_4], %1 {strides = array<i32>} : memref<2x34x96xbf16, #tpu.memory_space<vmem>>, vector<2x1x96xbf16>,
    %c0_5 = arith.constant 0 : index
    %c33 = arith.constant 33 : index
    %c0_6 = arith.constant 0 : index
    %3 = vector.load %arg18[%c0_5, %c33, %c0_6] : memref<2x34x96xbf16, #tpu.memory_space<vmem>>, vector<2x1x96xbf16>
    tpu.vector_store %arg18[%c0_5, %c33, %c0_6], %1 {strides = array<i32>} : memref<2x34x96xbf16, #tpu.memory_space<vmem>>, vector<2x1x96xbf16>,
    %c0_7 = arith.constant 0 : index
    %c1 = arith.constant 1 : index
    %c0_8 = arith.constant 0 : index
    %4 = vector.load %arg18[%c0_7, %c1, %c0_8] : memref<2x34x96xbf16, #tpu.memory_space<vmem>>, vector<2x32x96xbf16>
    tpu.vector_store %arg18[%c0_7, %c1, %c0_8], %0 {strides = array<i32>} : memref<2x34x96xbf16, #tpu.memory_space<vmem>>, vector<2x32x96xbf16>,
    %c0_9 = arith.constant 0 : index
    %c0_10 = arith.constant 0 : index
    %c0_11 = arith.constant 0 : index
    %5 = vector.load %arg18[%c0_9, %c0_10, %c0_11] : memref<2x34x96xbf16, #tpu.memory_space<vmem>>, vector<2x32x96xbf16>
    %6 = vector.shape_cast %5 : vector<2x32x96xbf16> to vector<64x96xbf16>
    %c0_12 = arith.constant 0 : index
    %c0_13 = arith.constant 0 : index
    %c0_14 = arith.constant 0 : index
    %7 = vector.load %arg1[%c0_12, %c0_13, %c0_14] : memref<3x96x256xbf16, #tpu.memory_space<vmem>>, vector<1x96x256xbf16>
    %8 = vector.shape_cast %7 : vector<1x96x256xbf16> to vector<96x256xbf16>
    %cst_15 = arith.constant dense<0.000000e+00> : vector<64x256xf32>
    %9 = tpu.matmul %6, %8, %cst_15 {dimension_numbers = #tpu.dot_dimension_numbers<[1], [0], [0], [1], [0, 0, 1, 1], [], []>} : vector<64x96xbf16>, vector<96x256xbf16>, vector<64x256xf32> -> vector<64x256xf32>
    %c0_16 = arith.constant 0 : index
    %c1_17 = arith.constant 1 : index
    %c0_18 = arith.constant 0 : index
    %10 = vector.load %arg18[%c0_16, %c1_17, %c0_18] : memref<2x34x96xbf16, #tpu.memory_space<vmem>>, vector<2x32x96xbf16>
    %11 = vector.shape_cast %10 : vector<2x32x96xbf16> to vector<64x96xbf16>
    %c1_19 = arith.constant 1 : index
    %c0_20 = arith.constant 0 : index
    %c0_21 = arith.constant 0 : index
    %12 = vector.load %arg1[%c1_19, %c0_20, %c0_21] : memref<3x96x256xbf16, #tpu.memory_space<vmem>>, vector<1x96x256xbf16>
    %13 = vector.shape_cast %12 : vector<1x96x256xbf16> to vector<96x256xbf16>
    %cst_22 = arith.constant dense<0.000000e+00> : vector<64x256xf32>
    %14 = tpu.matmul %11, %13, %cst_22 {dimension_numbers = #tpu.dot_dimension_numbers<[1], [0], [0], [1], [0, 0, 1, 1], [], []>} : vector<64x96xbf16>, vector<96x256xbf16>, vector<64x256xf32> -> vector<64x256xf32>
    %15 = arith.addf %9, %14 : vector<64x256xf32>
    %c0_23 = arith.constant 0 : index
    %c2 = arith.constant 2 : index
    %c0_24 = arith.constant 0 : index
    %16 = vector.load %arg18[%c0_23, %c2, %c0_24] : memref<2x34x96xbf16, #tpu.memory_space<vmem>>, vector<2x32x96xbf16>
    %17 = vector.shape_cast %16 : vector<2x32x96xbf16> to vector<64x96xbf16>
    %c2_25 = arith.constant 2 : index
    %c0_26 = arith.constant 0 : index
    %c0_27 = arith.constant 0 : index
    %18 = vector.load %arg1[%c2_25, %c0_26, %c0_27] : memref<3x96x256xbf16, #tpu.memory_space<vmem>>, vector<1x96x256xbf16>
    %19 = vector.shape_cast %18 : vector<1x96x256xbf16> to vector<96x256xbf16>
    %cst_28 = arith.constant dense<0.000000e+00> : vector<64x256xf32>
    %20 = tpu.matmul %17, %19, %cst_28 {dimension_numbers = #tpu.dot_dimension_numbers<[1], [0], [0], [1], [0, 0, 1, 1], [], []>} : vector<64x96xbf16>, vector<96x256xbf16>, vector<64x256xf32> -> vector<64x256xf32>
    %21 = arith.addf %15, %20 : vector<64x256xf32>
    %c0_29 = arith.constant 0 : index
    %c0_30 = arith.constant 0 : index
    %22 = vector.load %arg2[%c0_29, %c0_30] : memref<3x256xf32, #tpu.memory_space<vmem>>, vector<1x256xf32>
    %23 = vector.broadcast %22 : vector<1x256xf32> to vector<64x256xf32>
    %24 = arith.addf %21, %23 : vector<64x256xf32>
    %c0_31 = arith.constant 0 : index
    %c0_32 = arith.constant 0 : index
    %25 = vector.load %arg3[%c0_31, %c0_32] : memref<256x256xf32, #tpu.memory_space<vmem>>, vector<256x256xf32>
    %cst_33 = arith.constant dense<0.000000e+00> : vector<256xf32>
    %26 = vector.multi_reduction <add>, %24, %cst_33 [0] : vector<64x256xf32> to vector<256xf32>
    %27 = vector.shape_cast %26 : vector<256xf32> to vector<1x256xf32>
    %28 = arith.mulf %24, %24 : vector<64x256xf32>
    %cst_34 = arith.constant dense<0.000000e+00> : vector<256xf32>
    %29 = vector.multi_reduction <add>, %28, %cst_34 [0] : vector<64x256xf32> to vector<256xf32>
    %30 = vector.shape_cast %29 : vector<256xf32> to vector<1x256xf32>
    %cst_35 = arith.constant dense<0.000000e+00> : vector<1x256xf32>
    %31 = tpu.matmul %27, %25, %cst_35 {dimension_numbers = #tpu.dot_dimension_numbers<[1], [0], [0], [1], [0, 0, 1, 1], [], []>} : vector<1x256xf32>, vector<256x256xf32>, vector<1x256xf32> -> vector<1x256xf32>
    %cst_36 = arith.constant 4.8828125E-4 : f32
    %32 = vector.broadcast %cst_36 : f32 to vector<1x256xf32>
    %33 = arith.mulf %31, %32 : vector<1x256xf32>
    %cst_37 = arith.constant dense<0.000000e+00> : vector<1x256xf32>
    %34 = tpu.matmul %30, %25, %cst_37 {dimension_numbers = #tpu.dot_dimension_numbers<[1], [0], [0], [1], [0, 0, 1, 1], [], []>} : vector<1x256xf32>, vector<256x256xf32>, vector<1x256xf32> -> vector<1x256xf32>
    %cst_38 = arith.constant 4.8828125E-4 : f32
    %35 = vector.broadcast %cst_38 : f32 to vector<1x256xf32>
    %36 = arith.mulf %34, %35 : vector<1x256xf32>
    %37 = arith.mulf %33, %33 : vector<1x256xf32>
    %38 = arith.subf %36, %37 : vector<1x256xf32>
    %cst_39 = arith.constant 0.000000e+00 : f32
    %39 = vector.broadcast %cst_39 : f32 to vector<1x256xf32>
    %40 = arith.maximumf %38, %39 : vector<1x256xf32>
    %c1_40 = arith.constant 1 : index
    %c0_41 = arith.constant 0 : index
    %41 = vector.load %arg2[%c1_40, %c0_41] : memref<3x256xf32, #tpu.memory_space<vmem>>, vector<1x256xf32>
    %42 = vector.broadcast %33 : vector<1x256xf32> to vector<64x256xf32>
    %43 = arith.subf %24, %42 : vector<64x256xf32>
    %44 = vector.broadcast %41 : vector<1x256xf32> to vector<64x256xf32>
    %45 = arith.mulf %44, %43 : vector<64x256xf32>
    %cst_42 = arith.constant 9.99999974E-6 : f32
    %46 = vector.broadcast %cst_42 : f32 to vector<1x256xf32>
    %47 = arith.addf %40, %46 : vector<1x256xf32>
    %48 = math.rsqrt %47 : vector<1x256xf32>
    %49 = vector.broadcast %48 : vector<1x256xf32> to vector<64x256xf32>
    %50 = arith.mulf %45, %49 : vector<64x256xf32>
    %c2_43 = arith.constant 2 : index
    %c0_44 = arith.constant 0 : index
    %51 = vector.load %arg2[%c2_43, %c0_44] : memref<3x256xf32, #tpu.memory_space<vmem>>, vector<1x256xf32>
    %52 = vector.broadcast %51 : vector<1x256xf32> to vector<64x256xf32>
    %53 = arith.addf %50, %52 : vector<64x256xf32>
    %54 = vector.shape_cast %53 : vector<64x256xf32> to vector<32x2x256xf32>
    %55 = vector.extract_strided_slice %54 {offsets = [0, 0, 0], sizes = [32, 1, 256], strides = [1, 1, 1]} : vector<32x2x256xf32> to vector<32x1x256xf32>
    %56 = vector.shape_cast %55 : vector<32x1x256xf32> to vector<32x256xf32>
    %57 = vector.extract_strided_slice %54 {offsets = [0, 1, 0], sizes = [32, 1, 256], strides = [1, 1, 1]} : vector<32x2x256xf32> to vector<32x1x256xf32>
    %58 = vector.shape_cast %57 : vector<32x1x256xf32> to vector<32x256xf32>
    %59 = arith.maximumf %56, %58 : vector<32x256xf32>
    %c0_45 = arith.constant 0 : index
    %c0_46 = arith.constant 0 : index
    %c0_47 = arith.constant 0 : index
    %60 = vector.load %arg4[%c0_45, %c0_46, %c0_47] : memref<2x256x128xf32, #tpu.memory_space<vmem>>, vector<1x256x128xf32>
    %61 = vector.shape_cast %60 : vector<1x256x128xf32> to vector<256x128xf32>
    %cst_48 = arith.constant dense<0.000000e+00> : vector<32x128xf32>
    %62 = tpu.matmul %59, %61, %cst_48 {dimension_numbers = #tpu.dot_dimension_numbers<[1], [0], [0], [1], [0, 0, 1, 1], [], []>} : vector<32x256xf32>, vector<256x128xf32>, vector<32x128xf32> -> vector<32x128xf32>
    %c1_49 = arith.constant 1 : index
    %c0_50 = arith.constant 0 : index
    %c0_51 = arith.constant 0 : index
    %63 = vector.load %arg4[%c1_49, %c0_50, %c0_51] : memref<2x256x128xf32, #tpu.memory_space<vmem>>, vector<1x256x128xf32>
    %64 = vector.shape_cast %63 : vector<1x256x128xf32> to vector<256x128xf32>
    %cst_52 = arith.constant dense<0.000000e+00> : vector<32x128xf32>
    %65 = tpu.matmul %59, %64, %cst_52 {dimension_numbers = #tpu.dot_dimension_numbers<[1], [0], [0], [1], [0, 0, 1, 1], [], []>} : vector<32x256xf32>, vector<256x128xf32>, vector<32x128xf32> -> vector<32x128xf32>
    %66 = arith.maximumf %62, %65 : vector<32x128xf32>
    %cst_53 = arith.constant 0.000000e+00 : f32
    %67 = vector.broadcast %cst_53 : f32 to vector<32x128xf32>
    %68 = arith.maximumf %66, %67 : vector<32x128xf32>
    %69 = vector.shape_cast %68 : vector<32x128xf32> to vector<2x16x128xf32>
    %cst_54 = arith.constant 0.000000e+00 : bf16
    %70 = vector.broadcast %cst_54 : bf16 to vector<2x1x128xbf16>
    %c0_55 = arith.constant 0 : index
    %c0_56 = arith.constant 0 : index
    %c0_57 = arith.constant 0 : index
    %71 = vector.load %arg19[%c0_55, %c0_56, %c0_57] : memref<2x18x128xbf16, #tpu.memory_space<vmem>>, vector<2x1x128xbf16>
    tpu.vector_store %arg19[%c0_55, %c0_56, %c0_57], %70 {strides = array<i32>} : memref<2x18x128xbf16, #tpu.memory_space<vmem>>, vector<2x1x128xbf16>,
    %c0_58 = arith.constant 0 : index
    %c17 = arith.constant 17 : index
    %c0_59 = arith.constant 0 : index
    %72 = vector.load %arg19[%c0_58, %c17, %c0_59] : memref<2x18x128xbf16, #tpu.memory_space<vmem>>, vector<2x1x128xbf16>
    tpu.vector_store %arg19[%c0_58, %c17, %c0_59], %70 {strides = array<i32>} : memref<2x18x128xbf16, #tpu.memory_space<vmem>>, vector<2x1x128xbf16>,
    %73 = arith.truncf %69 : vector<2x16x128xf32> to vector<2x16x128xbf16>
    %c0_60 = arith.constant 0 : index
    %c1_61 = arith.constant 1 : index
    %c0_62 = arith.constant 0 : index
    %74 = vector.load %arg19[%c0_60, %c1_61, %c0_62] : memref<2x18x128xbf16, #tpu.memory_space<vmem>>, vector<2x16x128xbf16>
    tpu.vector_store %arg19[%c0_60, %c1_61, %c0_62], %73 {strides = array<i32>} : memref<2x18x128xbf16, #tpu.memory_space<vmem>>, vector<2x16x128xbf16>,
    %c0_63 = arith.constant 0 : index
    %c0_64 = arith.constant 0 : index
    %c0_65 = arith.constant 0 : index
    %75 = vector.load %arg19[%c0_63, %c0_64, %c0_65] : memref<2x18x128xbf16, #tpu.memory_space<vmem>>, vector<2x16x128xbf16>
    %76 = vector.shape_cast %75 : vector<2x16x128xbf16> to vector<32x128xbf16>
    %c0_66 = arith.constant 0 : index
    %c0_67 = arith.constant 0 : index
    %c0_68 = arith.constant 0 : index
    %77 = vector.load %arg5[%c0_66, %c0_67, %c0_68] : memref<3x128x256xbf16, #tpu.memory_space<vmem>>, vector<1x128x256xbf16>
    %78 = vector.shape_cast %77 : vector<1x128x256xbf16> to vector<128x256xbf16>
    %cst_69 = arith.constant dense<0.000000e+00> : vector<32x256xf32>
    %79 = tpu.matmul %76, %78, %cst_69 {dimension_numbers = #tpu.dot_dimension_numbers<[1], [0], [0], [1], [0, 0, 1, 1], [], []>} : vector<32x128xbf16>, vector<128x256xbf16>, vector<32x256xf32> -> vector<32x256xf32>
    %c0_70 = arith.constant 0 : index
    %c1_71 = arith.constant 1 : index
    %c0_72 = arith.constant 0 : index
    %80 = vector.load %arg19[%c0_70, %c1_71, %c0_72] : memref<2x18x128xbf16, #tpu.memory_space<vmem>>, vector<2x16x128xbf16>
    %81 = vector.shape_cast %80 : vector<2x16x128xbf16> to vector<32x128xbf16>
    %c1_73 = arith.constant 1 : index
    %c0_74 = arith.constant 0 : index
    %c0_75 = arith.constant 0 : index
    %82 = vector.load %arg5[%c1_73, %c0_74, %c0_75] : memref<3x128x256xbf16, #tpu.memory_space<vmem>>, vector<1x128x256xbf16>
    %83 = vector.shape_cast %82 : vector<1x128x256xbf16> to vector<128x256xbf16>
    %cst_76 = arith.constant dense<0.000000e+00> : vector<32x256xf32>
    %84 = tpu.matmul %81, %83, %cst_76 {dimension_numbers = #tpu.dot_dimension_numbers<[1], [0], [0], [1], [0, 0, 1, 1], [], []>} : vector<32x128xbf16>, vector<128x256xbf16>, vector<32x256xf32> -> vector<32x256xf32>
    %85 = arith.addf %79, %84 : vector<32x256xf32>
    %c0_77 = arith.constant 0 : index
    %c2_78 = arith.constant 2 : index
    %c0_79 = arith.constant 0 : index
    %86 = vector.load %arg19[%c0_77, %c2_78, %c0_79] : memref<2x18x128xbf16, #tpu.memory_space<vmem>>, vector<2x16x128xbf16>
    %87 = vector.shape_cast %86 : vector<2x16x128xbf16> to vector<32x128xbf16>
    %c2_80 = arith.constant 2 : index
    %c0_81 = arith.constant 0 : index
    %c0_82 = arith.constant 0 : index
    %88 = vector.load %arg5[%c2_80, %c0_81, %c0_82] : memref<3x128x256xbf16, #tpu.memory_space<vmem>>, vector<1x128x256xbf16>
    %89 = vector.shape_cast %88 : vector<1x128x256xbf16> to vector<128x256xbf16>
    %cst_83 = arith.constant dense<0.000000e+00> : vector<32x256xf32>
    %90 = tpu.matmul %87, %89, %cst_83 {dimension_numbers = #tpu.dot_dimension_numbers<[1], [0], [0], [1], [0, 0, 1, 1], [], []>} : vector<32x128xbf16>, vector<128x256xbf16>, vector<32x256xf32> -> vector<32x256xf32>
    %91 = arith.addf %85, %90 : vector<32x256xf32>
    %c0_84 = arith.constant 0 : index
    %c0_85 = arith.constant 0 : index
    %92 = vector.load %arg6[%c0_84, %c0_85] : memref<3x256xf32, #tpu.memory_space<vmem>>, vector<1x256xf32>
    %93 = vector.broadcast %92 : vector<1x256xf32> to vector<32x256xf32>
    %94 = arith.addf %91, %93 : vector<32x256xf32>
    %c0_86 = arith.constant 0 : index
    %c0_87 = arith.constant 0 : index
    %95 = vector.load %arg7[%c0_86, %c0_87] : memref<256x256xf32, #tpu.memory_space<vmem>>, vector<256x256xf32>
    %cst_88 = arith.constant dense<0.000000e+00> : vector<256xf32>
    %96 = vector.multi_reduction <add>, %94, %cst_88 [0] : vector<32x256xf32> to vector<256xf32>
    %97 = vector.shape_cast %96 : vector<256xf32> to vector<1x256xf32>
    %98 = arith.mulf %94, %94 : vector<32x256xf32>
    %cst_89 = arith.constant dense<0.000000e+00> : vector<256xf32>
    %99 = vector.multi_reduction <add>, %98, %cst_89 [0] : vector<32x256xf32> to vector<256xf32>
    %100 = vector.shape_cast %99 : vector<256xf32> to vector<1x256xf32>
    %cst_90 = arith.constant dense<0.000000e+00> : vector<1x256xf32>
    %101 = tpu.matmul %97, %95, %cst_90 {dimension_numbers = #tpu.dot_dimension_numbers<[1], [0], [0], [1], [0, 0, 1, 1], [], []>} : vector<1x256xf32>, vector<256x256xf32>, vector<1x256xf32> -> vector<1x256xf32>
    %cst_91 = arith.constant 0.001953125 : f32
    %102 = vector.broadcast %cst_91 : f32 to vector<1x256xf32>
    %103 = arith.mulf %101, %102 : vector<1x256xf32>
    %cst_92 = arith.constant dense<0.000000e+00> : vector<1x256xf32>
    %104 = tpu.matmul %100, %95, %cst_92 {dimension_numbers = #tpu.dot_dimension_numbers<[1], [0], [0], [1], [0, 0, 1, 1], [], []>} : vector<1x256xf32>, vector<256x256xf32>, vector<1x256xf32> -> vector<1x256xf32>
    %cst_93 = arith.constant 0.001953125 : f32
    %105 = vector.broadcast %cst_93 : f32 to vector<1x256xf32>
    %106 = arith.mulf %104, %105 : vector<1x256xf32>
    %107 = arith.mulf %103, %103 : vector<1x256xf32>
    %108 = arith.subf %106, %107 : vector<1x256xf32>
    %cst_94 = arith.constant 0.000000e+00 : f32
    %109 = vector.broadcast %cst_94 : f32 to vector<1x256xf32>
    %110 = arith.maximumf %108, %109 : vector<1x256xf32>
    %c1_95 = arith.constant 1 : index
    %c0_96 = arith.constant 0 : index
    %111 = vector.load %arg6[%c1_95, %c0_96] : memref<3x256xf32, #tpu.memory_space<vmem>>, vector<1x256xf32>
    %112 = vector.broadcast %103 : vector<1x256xf32> to vector<32x256xf32>
    %113 = arith.subf %94, %112 : vector<32x256xf32>
    %114 = vector.broadcast %111 : vector<1x256xf32> to vector<32x256xf32>
    %115 = arith.mulf %114, %113 : vector<32x256xf32>
    %cst_97 = arith.constant 9.99999974E-6 : f32
    %116 = vector.broadcast %cst_97 : f32 to vector<1x256xf32>
    %117 = arith.addf %110, %116 : vector<1x256xf32>
    %118 = math.rsqrt %117 : vector<1x256xf32>
    %119 = vector.broadcast %118 : vector<1x256xf32> to vector<32x256xf32>
    %120 = arith.mulf %115, %119 : vector<32x256xf32>
    %c2_98 = arith.constant 2 : index
    %c0_99 = arith.constant 0 : index
    %121 = vector.load %arg6[%c2_98, %c0_99] : memref<3x256xf32, #tpu.memory_space<vmem>>, vector<1x256xf32>
    %122 = vector.broadcast %121 : vector<1x256xf32> to vector<32x256xf32>
    %123 = arith.addf %120, %122 : vector<32x256xf32>
    %124 = vector.shape_cast %123 : vector<32x256xf32> to vector<16x2x256xf32>
    %125 = vector.extract_strided_slice %124 {offsets = [0, 0, 0], sizes = [16, 1, 256], strides = [1, 1, 1]} : vector<16x2x256xf32> to vector<16x1x256xf32>
    %126 = vector.shape_cast %125 : vector<16x1x256xf32> to vector<16x256xf32>
    %127 = vector.extract_strided_slice %124 {offsets = [0, 1, 0], sizes = [16, 1, 256], strides = [1, 1, 1]} : vector<16x2x256xf32> to vector<16x1x256xf32>
    %128 = vector.shape_cast %127 : vector<16x1x256xf32> to vector<16x256xf32>
    %129 = arith.maximumf %126, %128 : vector<16x256xf32>
    %c0_100 = arith.constant 0 : index
    %c0_101 = arith.constant 0 : index
    %c0_102 = arith.constant 0 : index
    %130 = vector.load %arg8[%c0_100, %c0_101, %c0_102] : memref<2x256x128xf32, #tpu.memory_space<vmem>>, vector<1x256x128xf32>
    %131 = vector.shape_cast %130 : vector<1x256x128xf32> to vector<256x128xf32>
    %cst_103 = arith.constant dense<0.000000e+00> : vector<16x128xf32>
    %132 = tpu.matmul %129, %131, %cst_103 {dimension_numbers = #tpu.dot_dimension_numbers<[1], [0], [0], [1], [0, 0, 1, 1], [], []>} : vector<16x256xf32>, vector<256x128xf32>, vector<16x128xf32> -> vector<16x128xf32>
    %c1_104 = arith.constant 1 : index
    %c0_105 = arith.constant 0 : index
    %c0_106 = arith.constant 0 : index
    %133 = vector.load %arg8[%c1_104, %c0_105, %c0_106] : memref<2x256x128xf32, #tpu.memory_space<vmem>>, vector<1x256x128xf32>
    %134 = vector.shape_cast %133 : vector<1x256x128xf32> to vector<256x128xf32>
    %cst_107 = arith.constant dense<0.000000e+00> : vector<16x128xf32>
    %135 = tpu.matmul %129, %134, %cst_107 {dimension_numbers = #tpu.dot_dimension_numbers<[1], [0], [0], [1], [0, 0, 1, 1], [], []>} : vector<16x256xf32>, vector<256x128xf32>, vector<16x128xf32> -> vector<16x128xf32>
    %136 = arith.maximumf %132, %135 : vector<16x128xf32>
    %cst_108 = arith.constant 0.000000e+00 : f32
    %137 = vector.broadcast %cst_108 : f32 to vector<16x128xf32>
    %138 = arith.maximumf %136, %137 : vector<16x128xf32>
    %139 = vector.shape_cast %138 : vector<16x128xf32> to vector<2x8x128xf32>
    %cst_109 = arith.constant 0.000000e+00 : bf16
    %140 = vector.broadcast %cst_109 : bf16 to vector<2x1x128xbf16>
    %c0_110 = arith.constant 0 : index
    %c0_111 = arith.constant 0 : index
    %c0_112 = arith.constant 0 : index
    %141 = vector.load %arg20[%c0_110, %c0_111, %c0_112] : memref<2x10x128xbf16, #tpu.memory_space<vmem>>, vector<2x1x128xbf16>
    tpu.vector_store %arg20[%c0_110, %c0_111, %c0_112], %140 {strides = array<i32>} : memref<2x10x128xbf16, #tpu.memory_space<vmem>>, vector<2x1x128xbf16>,
    %c0_113 = arith.constant 0 : index
    %c9 = arith.constant 9 : index
    %c0_114 = arith.constant 0 : index
    %142 = vector.load %arg20[%c0_113, %c9, %c0_114] : memref<2x10x128xbf16, #tpu.memory_space<vmem>>, vector<2x1x128xbf16>
    tpu.vector_store %arg20[%c0_113, %c9, %c0_114], %140 {strides = array<i32>} : memref<2x10x128xbf16, #tpu.memory_space<vmem>>, vector<2x1x128xbf16>,
    %143 = arith.truncf %139 : vector<2x8x128xf32> to vector<2x8x128xbf16>
    %c0_115 = arith.constant 0 : index
    %c1_116 = arith.constant 1 : index
    %c0_117 = arith.constant 0 : index
    %144 = vector.load %arg20[%c0_115, %c1_116, %c0_117] : memref<2x10x128xbf16, #tpu.memory_space<vmem>>, vector<2x8x128xbf16>
    tpu.vector_store %arg20[%c0_115, %c1_116, %c0_117], %143 {strides = array<i32>} : memref<2x10x128xbf16, #tpu.memory_space<vmem>>, vector<2x8x128xbf16>,
    %c0_118 = arith.constant 0 : index
    %c0_119 = arith.constant 0 : index
    %c0_120 = arith.constant 0 : index
    %145 = vector.load %arg20[%c0_118, %c0_119, %c0_120] : memref<2x10x128xbf16, #tpu.memory_space<vmem>>, vector<2x8x128xbf16>
    %146 = vector.shape_cast %145 : vector<2x8x128xbf16> to vector<16x128xbf16>
    %c0_121 = arith.constant 0 : index
    %c0_122 = arith.constant 0 : index
    %c0_123 = arith.constant 0 : index
    %147 = vector.load %arg9[%c0_121, %c0_122, %c0_123] : memref<3x128x256xbf16, #tpu.memory_space<vmem>>, vector<1x128x256xbf16>
    %148 = vector.shape_cast %147 : vector<1x128x256xbf16> to vector<128x256xbf16>
    %cst_124 = arith.constant dense<0.000000e+00> : vector<16x256xf32>
    %149 = tpu.matmul %146, %148, %cst_124 {dimension_numbers = #tpu.dot_dimension_numbers<[1], [0], [0], [1], [0, 0, 1, 1], [], []>} : vector<16x128xbf16>, vector<128x256xbf16>, vector<16x256xf32> -> vector<16x256xf32>
    %c0_125 = arith.constant 0 : index
    %c1_126 = arith.constant 1 : index
    %c0_127 = arith.constant 0 : index
    %150 = vector.load %arg20[%c0_125, %c1_126, %c0_127] : memref<2x10x128xbf16, #tpu.memory_space<vmem>>, vector<2x8x128xbf16>
    %151 = vector.shape_cast %150 : vector<2x8x128xbf16> to vector<16x128xbf16>
    %c1_128 = arith.constant 1 : index
    %c0_129 = arith.constant 0 : index
    %c0_130 = arith.constant 0 : index
    %152 = vector.load %arg9[%c1_128, %c0_129, %c0_130] : memref<3x128x256xbf16, #tpu.memory_space<vmem>>, vector<1x128x256xbf16>
    %153 = vector.shape_cast %152 : vector<1x128x256xbf16> to vector<128x256xbf16>
    %cst_131 = arith.constant dense<0.000000e+00> : vector<16x256xf32>
    %154 = tpu.matmul %151, %153, %cst_131 {dimension_numbers = #tpu.dot_dimension_numbers<[1], [0], [0], [1], [0, 0, 1, 1], [], []>} : vector<16x128xbf16>, vector<128x256xbf16>, vector<16x256xf32> -> vector<16x256xf32>
    %155 = arith.addf %149, %154 : vector<16x256xf32>
    %c0_132 = arith.constant 0 : index
    %c2_133 = arith.constant 2 : index
    %c0_134 = arith.constant 0 : index
    %156 = vector.load %arg20[%c0_132, %c2_133, %c0_134] : memref<2x10x128xbf16, #tpu.memory_space<vmem>>, vector<2x8x128xbf16>
    %157 = vector.shape_cast %156 : vector<2x8x128xbf16> to vector<16x128xbf16>
    %c2_135 = arith.constant 2 : index
    %c0_136 = arith.constant 0 : index
    %c0_137 = arith.constant 0 : index
    %158 = vector.load %arg9[%c2_135, %c0_136, %c0_137] : memref<3x128x256xbf16, #tpu.memory_space<vmem>>, vector<1x128x256xbf16>
    %159 = vector.shape_cast %158 : vector<1x128x256xbf16> to vector<128x256xbf16>
    %cst_138 = arith.constant dense<0.000000e+00> : vector<16x256xf32>
    %160 = tpu.matmul %157, %159, %cst_138 {dimension_numbers = #tpu.dot_dimension_numbers<[1], [0], [0], [1], [0, 0, 1, 1], [], []>} : vector<16x128xbf16>, vector<128x256xbf16>, vector<16x256xf32> -> vector<16x256xf32>
    %161 = arith.addf %155, %160 : vector<16x256xf32>
    %c0_139 = arith.constant 0 : index
    %c0_140 = arith.constant 0 : index
    %162 = vector.load %arg10[%c0_139, %c0_140] : memref<3x256xf32, #tpu.memory_space<vmem>>, vector<1x256xf32>
    %163 = vector.broadcast %162 : vector<1x256xf32> to vector<16x256xf32>
    %164 = arith.addf %161, %163 : vector<16x256xf32>
    %c0_141 = arith.constant 0 : index
    %c0_142 = arith.constant 0 : index
    %165 = vector.load %arg11[%c0_141, %c0_142] : memref<256x256xf32, #tpu.memory_space<vmem>>, vector<256x256xf32>
    %cst_143 = arith.constant dense<0.000000e+00> : vector<256xf32>
    %166 = vector.multi_reduction <add>, %164, %cst_143 [0] : vector<16x256xf32> to vector<256xf32>
    %167 = vector.shape_cast %166 : vector<256xf32> to vector<1x256xf32>
    %168 = arith.mulf %164, %164 : vector<16x256xf32>
    %cst_144 = arith.constant dense<0.000000e+00> : vector<256xf32>
    %169 = vector.multi_reduction <add>, %168, %cst_144 [0] : vector<16x256xf32> to vector<256xf32>
    %170 = vector.shape_cast %169 : vector<256xf32> to vector<1x256xf32>
    %cst_145 = arith.constant dense<0.000000e+00> : vector<1x256xf32>
    %171 = tpu.matmul %167, %165, %cst_145 {dimension_numbers = #tpu.dot_dimension_numbers<[1], [0], [0], [1], [0, 0, 1, 1], [], []>} : vector<1x256xf32>, vector<256x256xf32>, vector<1x256xf32> -> vector<1x256xf32>
    %cst_146 = arith.constant 7.812500e-03 : f32
    %172 = vector.broadcast %cst_146 : f32 to vector<1x256xf32>
    %173 = arith.mulf %171, %172 : vector<1x256xf32>
    %cst_147 = arith.constant dense<0.000000e+00> : vector<1x256xf32>
    %174 = tpu.matmul %170, %165, %cst_147 {dimension_numbers = #tpu.dot_dimension_numbers<[1], [0], [0], [1], [0, 0, 1, 1], [], []>} : vector<1x256xf32>, vector<256x256xf32>, vector<1x256xf32> -> vector<1x256xf32>
    %cst_148 = arith.constant 7.812500e-03 : f32
    %175 = vector.broadcast %cst_148 : f32 to vector<1x256xf32>
    %176 = arith.mulf %174, %175 : vector<1x256xf32>
    %177 = arith.mulf %173, %173 : vector<1x256xf32>
    %178 = arith.subf %176, %177 : vector<1x256xf32>
    %cst_149 = arith.constant 0.000000e+00 : f32
    %179 = vector.broadcast %cst_149 : f32 to vector<1x256xf32>
    %180 = arith.maximumf %178, %179 : vector<1x256xf32>
    %c1_150 = arith.constant 1 : index
    %c0_151 = arith.constant 0 : index
    %181 = vector.load %arg10[%c1_150, %c0_151] : memref<3x256xf32, #tpu.memory_space<vmem>>, vector<1x256xf32>
    %182 = vector.broadcast %173 : vector<1x256xf32> to vector<16x256xf32>
    %183 = arith.subf %164, %182 : vector<16x256xf32>
    %184 = vector.broadcast %181 : vector<1x256xf32> to vector<16x256xf32>
    %185 = arith.mulf %184, %183 : vector<16x256xf32>
    %cst_152 = arith.constant 9.99999974E-6 : f32
    %186 = vector.broadcast %cst_152 : f32 to vector<1x256xf32>
    %187 = arith.addf %180, %186 : vector<1x256xf32>
    %188 = math.rsqrt %187 : vector<1x256xf32>
    %189 = vector.broadcast %188 : vector<1x256xf32> to vector<16x256xf32>
    %190 = arith.mulf %185, %189 : vector<16x256xf32>
    %c2_153 = arith.constant 2 : index
    %c0_154 = arith.constant 0 : index
    %191 = vector.load %arg10[%c2_153, %c0_154] : memref<3x256xf32, #tpu.memory_space<vmem>>, vector<1x256xf32>
    %192 = vector.broadcast %191 : vector<1x256xf32> to vector<16x256xf32>
    %193 = arith.addf %190, %192 : vector<16x256xf32>
    %194 = vector.shape_cast %193 : vector<16x256xf32> to vector<8x2x256xf32>
    %195 = vector.extract_strided_slice %194 {offsets = [0, 0, 0], sizes = [8, 1, 256], strides = [1, 1, 1]} : vector<8x2x256xf32> to vector<8x1x256xf32>
    %196 = vector.shape_cast %195 : vector<8x1x256xf32> to vector<8x256xf32>
    %197 = vector.extract_strided_slice %194 {offsets = [0, 1, 0], sizes = [8, 1, 256], strides = [1, 1, 1]} : vector<8x2x256xf32> to vector<8x1x256xf32>
    %198 = vector.shape_cast %197 : vector<8x1x256xf32> to vector<8x256xf32>
    %199 = arith.maximumf %196, %198 : vector<8x256xf32>
    %c0_155 = arith.constant 0 : index
    %c0_156 = arith.constant 0 : index
    %c0_157 = arith.constant 0 : index
    %200 = vector.load %arg12[%c0_155, %c0_156, %c0_157] : memref<2x256x128xf32, #tpu.memory_space<vmem>>, vector<1x256x128xf32>
    %201 = vector.shape_cast %200 : vector<1x256x128xf32> to vector<256x128xf32>
    %cst_158 = arith.constant dense<0.000000e+00> : vector<8x128xf32>
    %202 = tpu.matmul %199, %201, %cst_158 {dimension_numbers = #tpu.dot_dimension_numbers<[1], [0], [0], [1], [0, 0, 1, 1], [], []>} : vector<8x256xf32>, vector<256x128xf32>, vector<8x128xf32> -> vector<8x128xf32>
    %c1_159 = arith.constant 1 : index
    %c0_160 = arith.constant 0 : index
    %c0_161 = arith.constant 0 : index
    %203 = vector.load %arg12[%c1_159, %c0_160, %c0_161] : memref<2x256x128xf32, #tpu.memory_space<vmem>>, vector<1x256x128xf32>
    %204 = vector.shape_cast %203 : vector<1x256x128xf32> to vector<256x128xf32>
    %cst_162 = arith.constant dense<0.000000e+00> : vector<8x128xf32>
    %205 = tpu.matmul %199, %204, %cst_162 {dimension_numbers = #tpu.dot_dimension_numbers<[1], [0], [0], [1], [0, 0, 1, 1], [], []>} : vector<8x256xf32>, vector<256x128xf32>, vector<8x128xf32> -> vector<8x128xf32>
    %206 = arith.maximumf %202, %205 : vector<8x128xf32>
    %cst_163 = arith.constant 0.000000e+00 : f32
    %207 = vector.broadcast %cst_163 : f32 to vector<8x128xf32>
    %208 = arith.maximumf %206, %207 : vector<8x128xf32>
    %209 = vector.shape_cast %208 : vector<8x128xf32> to vector<2x4x128xf32>
    %210 = vector.extract_strided_slice %209 {offsets = [0, 0, 0], sizes = [2, 1, 128], strides = [1, 1, 1]} : vector<2x4x128xf32> to vector<2x1x128xf32>
    %211 = vector.shape_cast %210 : vector<2x1x128xf32> to vector<2x128xf32>
    %212 = arith.truncf %211 : vector<2x128xf32> to vector<2x128xbf16>
    %c0_164 = arith.constant 0 : index
    %c0_165 = arith.constant 0 : index
    %c0_166 = arith.constant 0 : index
    %213 = vector.load %arg13[%c0_164, %c0_165, %c0_166] : memref<4x128x32xbf16, #tpu.memory_space<vmem>>, vector<1x128x32xbf16>
    %214 = vector.shape_cast %213 : vector<1x128x32xbf16> to vector<128x32xbf16>
    %cst_167 = arith.constant dense<0.000000e+00> : vector<2x32xf32>
    %215 = tpu.matmul %212, %214, %cst_167 {dimension_numbers = #tpu.dot_dimension_numbers<[1], [0], [0], [1], [0, 0, 1, 1], [], []>} : vector<2x128xbf16>, vector<128x32xbf16>, vector<2x32xf32> -> vector<2x32xf32>
    %216 = vector.extract_strided_slice %209 {offsets = [0, 1, 0], sizes = [2, 1, 128], strides = [1, 1, 1]} : vector<2x4x128xf32> to vector<2x1x128xf32>
    %217 = vector.shape_cast %216 : vector<2x1x128xf32> to vector<2x128xf32>
    %218 = arith.truncf %217 : vector<2x128xf32> to vector<2x128xbf16>
    %c1_168 = arith.constant 1 : index
    %c0_169 = arith.constant 0 : index
    %c0_170 = arith.constant 0 : index
    %219 = vector.load %arg13[%c1_168, %c0_169, %c0_170] : memref<4x128x32xbf16, #tpu.memory_space<vmem>>, vector<1x128x32xbf16>
    %220 = vector.shape_cast %219 : vector<1x128x32xbf16> to vector<128x32xbf16>
    %cst_171 = arith.constant dense<0.000000e+00> : vector<2x32xf32>
    %221 = tpu.matmul %218, %220, %cst_171 {dimension_numbers = #tpu.dot_dimension_numbers<[1], [0], [0], [1], [0, 0, 1, 1], [], []>} : vector<2x128xbf16>, vector<128x32xbf16>, vector<2x32xf32> -> vector<2x32xf32>
    %222 = arith.addf %215, %221 : vector<2x32xf32>
    %223 = vector.extract_strided_slice %209 {offsets = [0, 2, 0], sizes = [2, 1, 128], strides = [1, 1, 1]} : vector<2x4x128xf32> to vector<2x1x128xf32>
    %224 = vector.shape_cast %223 : vector<2x1x128xf32> to vector<2x128xf32>
    %225 = arith.truncf %224 : vector<2x128xf32> to vector<2x128xbf16>
    %c2_172 = arith.constant 2 : index
    %c0_173 = arith.constant 0 : index
    %c0_174 = arith.constant 0 : index
    %226 = vector.load %arg13[%c2_172, %c0_173, %c0_174] : memref<4x128x32xbf16, #tpu.memory_space<vmem>>, vector<1x128x32xbf16>
    %227 = vector.shape_cast %226 : vector<1x128x32xbf16> to vector<128x32xbf16>
    %cst_175 = arith.constant dense<0.000000e+00> : vector<2x32xf32>
    %228 = tpu.matmul %225, %227, %cst_175 {dimension_numbers = #tpu.dot_dimension_numbers<[1], [0], [0], [1], [0, 0, 1, 1], [], []>} : vector<2x128xbf16>, vector<128x32xbf16>, vector<2x32xf32> -> vector<2x32xf32>
    %229 = arith.addf %222, %228 : vector<2x32xf32>
    %230 = vector.extract_strided_slice %209 {offsets = [0, 3, 0], sizes = [2, 1, 128], strides = [1, 1, 1]} : vector<2x4x128xf32> to vector<2x1x128xf32>
    %231 = vector.shape_cast %230 : vector<2x1x128xf32> to vector<2x128xf32>
    %232 = arith.truncf %231 : vector<2x128xf32> to vector<2x128xbf16>
    %c3 = arith.constant 3 : index
    %c0_176 = arith.constant 0 : index
    %c0_177 = arith.constant 0 : index
    %233 = vector.load %arg13[%c3, %c0_176, %c0_177] : memref<4x128x32xbf16, #tpu.memory_space<vmem>>, vector<1x128x32xbf16>
    %234 = vector.shape_cast %233 : vector<1x128x32xbf16> to vector<128x32xbf16>
    %cst_178 = arith.constant dense<0.000000e+00> : vector<2x32xf32>
    %235 = tpu.matmul %232, %234, %cst_178 {dimension_numbers = #tpu.dot_dimension_numbers<[1], [0], [0], [1], [0, 0, 1, 1], [], []>} : vector<2x128xbf16>, vector<128x32xbf16>, vector<2x32xf32> -> vector<2x32xf32>
    %236 = arith.addf %229, %235 : vector<2x32xf32>
    %c0_179 = arith.constant 0 : index
    %c0_180 = arith.constant 0 : index
    %237 = vector.load %arg14[%c0_179, %c0_180] : memref<3x32xf32, #tpu.memory_space<vmem>>, vector<1x32xf32>
    %238 = vector.broadcast %237 : vector<1x32xf32> to vector<2x32xf32>
    %239 = arith.addf %236, %238 : vector<2x32xf32>
    %cst_181 = arith.constant dense<0.000000e+00> : vector<32xf32>
    %240 = vector.multi_reduction <add>, %239, %cst_181 [0] : vector<2x32xf32> to vector<32xf32>
    %241 = vector.shape_cast %240 : vector<32xf32> to vector<1x32xf32>
    %cst_182 = arith.constant 2.000000e+00 : f32
    %242 = vector.broadcast %cst_182 : f32 to vector<1x32xf32>
    %243 = arith.divf %241, %242 : vector<1x32xf32>
    %244 = arith.mulf %239, %239 : vector<2x32xf32>
    %cst_183 = arith.constant dense<0.000000e+00> : vector<32xf32>
    %245 = vector.multi_reduction <add>, %244, %cst_183 [0] : vector<2x32xf32> to vector<32xf32>
    %246 = vector.shape_cast %245 : vector<32xf32> to vector<1x32xf32>
    %cst_184 = arith.constant 2.000000e+00 : f32
    %247 = vector.broadcast %cst_184 : f32 to vector<1x32xf32>
    %248 = arith.divf %246, %247 : vector<1x32xf32>
    %249 = arith.mulf %243, %243 : vector<1x32xf32>
    %250 = arith.subf %248, %249 : vector<1x32xf32>
    %cst_185 = arith.constant 0.000000e+00 : f32
    %251 = vector.broadcast %cst_185 : f32 to vector<1x32xf32>
    %252 = arith.maximumf %250, %251 : vector<1x32xf32>
    %c1_186 = arith.constant 1 : index
    %c0_187 = arith.constant 0 : index
    %253 = vector.load %arg14[%c1_186, %c0_187] : memref<3x32xf32, #tpu.memory_space<vmem>>, vector<1x32xf32>
    %254 = vector.broadcast %243 : vector<1x32xf32> to vector<2x32xf32>
    %255 = arith.subf %239, %254 : vector<2x32xf32>
    %256 = vector.broadcast %253 : vector<1x32xf32> to vector<2x32xf32>
    %257 = arith.mulf %256, %255 : vector<2x32xf32>
    %cst_188 = arith.constant 9.99999974E-6 : f32
    %258 = vector.broadcast %cst_188 : f32 to vector<1x32xf32>
    %259 = arith.addf %252, %258 : vector<1x32xf32>
    %260 = math.rsqrt %259 : vector<1x32xf32>
    %261 = vector.broadcast %260 : vector<1x32xf32> to vector<2x32xf32>
    %262 = arith.mulf %257, %261 : vector<2x32xf32>
    %c2_189 = arith.constant 2 : index
    %c0_190 = arith.constant 0 : index
    %263 = vector.load %arg14[%c2_189, %c0_190] : memref<3x32xf32, #tpu.memory_space<vmem>>, vector<1x32xf32>
    %264 = vector.broadcast %263 : vector<1x32xf32> to vector<2x32xf32>
    %265 = arith.addf %262, %264 : vector<2x32xf32>
    %cst_191 = arith.constant 0.000000e+00 : f32
    %266 = vector.broadcast %cst_191 : f32 to vector<2x32xf32>
    %267 = arith.maximumf %265, %266 : vector<2x32xf32>
    %268 = arith.truncf %267 : vector<2x32xf32> to vector<2x32xbf16>
    %c0_192 = arith.constant 0 : index
    %c0_193 = arith.constant 0 : index
    %269 = vector.load %arg15[%c0_192, %c0_193] : memref<32x10xbf16, #tpu.memory_space<vmem>>, vector<32x10xbf16>
    %cst_194 = arith.constant dense<0.000000e+00> : vector<2x10xf32>
    %270 = tpu.matmul %268, %269, %cst_194 {dimension_numbers = #tpu.dot_dimension_numbers<[1], [0], [0], [1], [0, 0, 1, 1], [], []>} : vector<2x32xbf16>, vector<32x10xbf16>, vector<2x10xf32> -> vector<2x10xf32>
    %c0_195 = arith.constant 0 : index
    %c0_196 = arith.constant 0 : index
    %271 = vector.load %arg16[%c0_195, %c0_196] : memref<1x10xf32, #tpu.memory_space<vmem>>, vector<1x10xf32>
    %272 = vector.broadcast %271 : vector<1x10xf32> to vector<2x10xf32>
    %273 = arith.addf %270, %272 : vector<2x10xf32>
    %c0_197 = arith.constant 0 : index
    %c0_198 = arith.constant 0 : index
    %274 = vector.load %arg17[%c0_197, %c0_198] : memref<2x10xf32, #tpu.memory_space<vmem>>, vector<2x10xf32>
    tpu.vector_store %arg17[%c0_197, %c0_198], %273 {strides = array<i32>} : memref<2x10xf32, #tpu.memory_space<vmem>>, vector<2x10xf32>,
    return
  }
}

</mosaic_0001>

<bundles_post_ra>
// kernel: cnn5_forward.1
= control target key start
LH: loop header
LB: loop body
LE: loop exit
PB: predicated region body
PF: predicated region fallthrough
CT: control target
= control target key end

     0   :  { %s8475_s0 = inlined_call_operand.vmem [shape: bf16[2,32,96], index: 0, kind: input, shape index: {}]   ;;  %s8476_s1 = inlined_call_operand.hbm [shape: bf16[3,96,256], index: 1, kind: input, shape index: {}]   ;;  %s8477_s2 = inlined_call_operand.vmem [shape: f32[3,256], index: 2, kind: input, shape index: {}]   ;;  %s8478_s3 = inlined_call_operand.vmem [shape: f32[256,256], index: 3, kind: input, shape index: {}]   ;;  %s8479_s4 = inlined_call_operand.hbm [shape: f32[2,256,128], index: 4, kind: input, shape index: {}]   ;;  %s8480_s5 = inlined_call_operand.vmem [shape: bf16[3,128,256], index: 5, kind: input, shape index: {}]   ;;  %s8481_s6 = inlined_call_operand.hbm [shape: f32[3,256], index: 6, kind: input, shape index: {}]   ;;  %s8482_s7 = inlined_call_operand.hbm [shape: f32[256,256], index: 7, kind: input, shape index: {}]   ;;  %s8483_s8 = inlined_call_operand.hbm [shape: f32[2,256,128], index: 8, kind: input, shape index: {}]   ;;  %s8484_s9 = inlined_call_operand.hbm [shape: bf16[3,128,256], index: 9, kind: input, shape index: {}]   ;;  %s8485_s10 = inlined_call_operand.hbm [shape: f32[3,256], index: 10, kind: input, shape index: {}]   ;;  %s8486_s11 = inlined_call_operand.hbm [shape: f32[256,256], index: 11, kind: input, shape index: {}]   ;;  %s8487_s12 = inlined_call_operand.hbm [shape: f32[2,256,128], index: 12, kind: input, shape index: {}]   ;;  %s8488_s13 = inlined_call_operand.vmem [shape: bf16[4,128,32], index: 13, kind: input, shape index: {}]   ;;  %s8489_s14 = inlined_call_operand.hbm [shape: f32[3,32], index: 14, kind: input, shape index: {}]   ;;  %s8490_s15 = inlined_call_operand.vmem [shape: bf16[32,10], index: 15, kind: input, shape index: {}]   ;;  %s8491_s16 = inlined_call_operand.vmem [shape: f32[1,10], index: 16, kind: input, shape index: {}]   ;;  %s8492_s17 = inlined_call_operand.hbm [shape: f32[2,10], index: 17, kind: output, shape index: {}]  }
   0x1   :  { %8494 = sst [smem:[#allocation30_spill]] %s8475_s0 }
   0x2   :  { %8495 = sst [smem:[#allocation31_spill]] %s8476_s1 }
   0x3   :  { %22 = vsyncpa [#allocation6], 0 }
   0x4   :  { %23 = vsyncpa [#allocation9], 0 }
   0x5   :  { %24 = vsyncpa [#allocation12], 0 }
   0x6   :  { %25 = vsyncpa [#allocation15], 0 }
   0x7   :  { %26 = vsyncpa [#allocation18], 0 }
   0x8   :  { %27 = vsyncpa [#allocation21], 0 }
   0x9   :  { %28 = vsyncpa [#allocation7], 0  ;;  %s6929_s24 = smov [#allocation8]   ;;  %s6930_s26 = smov [#allocation11]  }
   0xa   :  { %s52_s25 = sshll.u32 %s6929_s24, 4  ;;  %s76_s27 = sshll.u32 %s6930_s26, 4  ;;  %s53_s25 = int_to_ptr.vmem [resolvable:$true] %s52_s25  ;;  %s77_s27 = int_to_ptr.vmem [resolvable:$true] %s76_s27 }
   0xb   :  { %s6703_s28 = scalar_lea.vmem %s53_s25, 8192  ;;  %p6708_p1 = scmp.lt.s32.totalorder %s53_s25, %s53_s25 }
   0xc   :  { %p6704_p0 = scmp.ne.s32.totalorder %s53_s25, %s6703_s28  ;;  %p6709_p2 = scmp.lt.s32.totalorder %s6703_s28, %s6703_s28 }
   0xe   :  { %p6710_p3 = por %p6709_p2, %p6708_p1 }
  0x10   :  { %p6711_p4 = pnand %p6710_p3, %p6704_p0 }
  0x12   :  { %6714 = shalt.err (!%p6711_p4)
}
  0x13   :  { %s6931_s29 = smov 128   ;;  %s6932_s0 = smov 8  }
  0x14   :  { %58 = dma.hbm_to_vmem [thread:$0]  %s8479_s4, 8192, %s53_s25, [#allocation9], %s6931_s29, %s6931_s29, %s6932_s0  }
  0x15   :  { %s6723_s19 = scalar_lea.vmem %s77_s27, 8192  ;;  %p6728_p6 = scmp.lt.s32.totalorder %s77_s27, %s77_s27 }
  0x16   :  { %p6724_p5 = scmp.ne.s32.totalorder %s77_s27, %s6723_s19  ;;  %p6729_p7 = scmp.lt.s32.totalorder %s6723_s19, %s6723_s19 }
  0x18   :  { %p6730_p8 = por %p6729_p7, %p6728_p6 }
  0x1a   :  { %p6731_p9 = pnand %p6730_p8, %p6724_p5 }
  0x1c   :  { %6734 = shalt.err (!%p6731_p9)
}
  0x1d   :  { %s6933_s1 = smov 256   ;;  %s6934_s20 = smov 16  }
  0x1e   :  { %82 = dma.hbm_to_vmem [thread:$0]  %s8482_s7, 8192, %s77_s27, [#allocation12], %s6933_s1, %s6933_s1, %s6934_s20  }
  0x1f   :  { %s6935_s23 = smov [#allocation14]   ;;  %s6936_s26 = smov [#allocation17]  }
  0x20   :  { %s100_s24 = sshll.u32 %s6935_s23, 4  ;;  %s122_s28 = sshll.u32 %s6936_s26, 4  ;;  %s101_s24 = int_to_ptr.vmem [resolvable:$true] %s100_s24  ;;  %s123_s28 = int_to_ptr.vmem [resolvable:$true] %s122_s28 }
  0x21   :  { %s6743_s4 = scalar_lea.vmem %s101_s24, 6144  ;;  %p6748_p11 = scmp.lt.s32.totalorder %s101_s24, %s101_s24 }
  0x22   :  { %p6744_p10 = scmp.ne.s32.totalorder %s101_s24, %s6743_s4  ;;  %p6749_p12 = scmp.lt.s32.totalorder %s6743_s4, %s6743_s4 }
  0x24   :  { %p6750_p13 = por %p6749_p12, %p6748_p11 }
  0x26   :  { %p6751_p0 = pnand %p6750_p13, %p6744_p10 }
  0x28   :  { %6754 = shalt.err (!%p6751_p0)
}
  0x29   :  { %106 = dma.hbm_to_vmem [thread:$0]  %s8484_s9, 6144, %s101_s24, [#allocation15], %s6931_s29, %s6931_s29, %s6932_s0  }
  0x2a   :  { %s6763_s7 = scalar_lea.vmem %s123_s28, 8192  ;;  %p6768_p2 = scmp.lt.s32.totalorder %s123_s28, %s123_s28 }
  0x2b   :  { %p6764_p1 = scmp.ne.s32.totalorder %s123_s28, %s6763_s7  ;;  %p6769_p3 = scmp.lt.s32.totalorder %s6763_s7, %s6763_s7 }
  0x2d   :  { %p6770_p4 = por %p6769_p3, %p6768_p2 }
  0x2f   :  { %p6771_p5 = pnand %p6770_p4, %p6764_p1 }
  0x31   :  { %6774 = shalt.err (!%p6771_p5)
}
  0x32   :  { %128 = dma.hbm_to_vmem [thread:$0]  %s8486_s11, 8192, %s123_s28, [#allocation18], %s6933_s1, %s6933_s1, %s6934_s20  }
  0x33   :  { %s6937_s19 = smov [#allocation5]   ;;  %s6938_s22 = smov [#allocation10]  }
  0x34   :  { %s36_s21 = sshll.u32 %s6937_s19, 4  ;;  %s67_s23 = sshll.u32 %s6938_s22, 4  ;;  %s37_s21 = int_to_ptr.vmem [resolvable:$true] %s36_s21  ;;  %s68_s23 = int_to_ptr.vmem [resolvable:$true] %s67_s23 }
  0x35   :  { %s6783_s26 = scalar_lea.vmem %s37_s21, 4608  ;;  %p6788_p7 = scmp.lt.s32.totalorder %s37_s21, %s37_s21 }
  0x36   :  { %p6784_p6 = scmp.ne.s32.totalorder %s37_s21, %s6783_s26  ;;  %p6789_p8 = scmp.lt.s32.totalorder %s6783_s26, %s6783_s26 }
  0x38   :  { %p6790_p9 = por %p6789_p8, %p6788_p7 }
  0x3a   :  { %p6791_p10 = pnand %p6790_p9, %p6784_p6 }
  0x3c   :  { %6794 = shalt.err (!%p6791_p10)
}
  0x3d   :  { %s8496_s4 = sld [smem:[#allocation31_spill]]  ;;  %s6803_s11 = scalar_lea.vmem %s68_s23, 128 }
  0x3e   :  { %p6804_p11 = scmp.ne.s32.totalorder %s68_s23, %s6803_s11  ;;  %p6808_p12 = scmp.lt.s32.totalorder %s68_s23, %s68_s23 }
  0x3f   :  { %p6809_p13 = scmp.lt.s32.totalorder %s6803_s11, %s6803_s11 }
  0x41   :  { %p6810_p0 = por %p6809_p13, %p6808_p12 }
  0x43   :  { %42 = dma.hbm_to_vmem [thread:$0]  %s8496_s4, 4608, %s37_s21, [#allocation6], %s6931_s29, %s6931_s29, %s6932_s0  }
  0x44   :  { %p6811_p1 = pnand %p6810_p0, %p6804_p11 }
  0x46   :  { %6814 = shalt.err (!%p6811_p1)
}
  0x47   :  { %70 = dma.hbm_to_vmem [thread:$0]  %s8481_s6, 128, %s68_s23, [#allocation9]  }
  0x48   :  { %s6939_s28 = smov [#allocation13]   ;;  %s6940_s30 = smov [#allocation16]  }
  0x49   :  { %s88_s25 = sshll.u32 %s6939_s28, 4  ;;  %s113_s7 = sshll.u32 %s6940_s30, 4  ;;  %s89_s25 = int_to_ptr.vmem [resolvable:$true] %s88_s25  ;;  %s114_s7 = int_to_ptr.vmem [resolvable:$true] %s113_s7 }
  0x4a   :  { %s6823_s27 = scalar_lea.vmem %s89_s25, 8192  ;;  %p6828_p3 = scmp.lt.s32.totalorder %s89_s25, %s89_s25 }
  0x4b   :  { %p6824_p2 = scmp.ne.s32.totalorder %s89_s25, %s6823_s27  ;;  %p6829_p4 = scmp.lt.s32.totalorder %s6823_s27, %s6823_s27 }
  0x4d   :  { %p6830_p5 = por %p6829_p4, %p6828_p3 }
  0x4f   :  { %p6831_p6 = pnand %p6830_p5, %p6824_p2 }
  0x51   :  { %6834 = shalt.err (!%p6831_p6)
}
  0x52   :  { %94 = dma.hbm_to_vmem [thread:$0]  %s8483_s8, 8192, %s89_s25, [#allocation12], %s6931_s29, %s6931_s29, %s6932_s0  }
  0x53   :  { %s6843_s6 = scalar_lea.vmem %s114_s7, 128  ;;  %p6848_p8 = scmp.lt.s32.totalorder %s114_s7, %s114_s7 }
  0x54   :  { %p6844_p7 = scmp.ne.s32.totalorder %s114_s7, %s6843_s6  ;;  %p6849_p9 = scmp.lt.s32.totalorder %s6843_s6, %s6843_s6 }
  0x56   :  { %p6850_p10 = por %p6849_p9, %p6848_p8 }
  0x58   :  { %p6851_p11 = pnand %p6850_p10, %p6844_p7 }
  0x5a   :  { %6854 = shalt.err (!%p6851_p11)
}
  0x5b   :  { %116 = dma.hbm_to_vmem [thread:$0]  %s8485_s10, 128, %s114_s7, [#allocation15]  }
  0x5c   :  { %s6941_s23 = smov [#allocation19]   ;;  %s6942_s9 = smov [#allocation20]  }
  0x5d   :  { %s134_s26 = sshll.u32 %s6941_s23, 4  ;;  %s149_s24 = sshll.u32 %s6942_s9, 4  ;;  %s135_s26 = int_to_ptr.vmem [resolvable:$true] %s134_s26  ;;  %s150_s24 = int_to_ptr.vmem [resolvable:$true] %s149_s24 }
  0x5e   :  { %s6863_s4 = scalar_lea.vmem %s135_s26, 8192  ;;  %p6868_p13 = scmp.lt.s32.totalorder %s135_s26, %s135_s26 }
  0x5f   :  { %p6864_p12 = scmp.ne.s32.totalorder %s135_s26, %s6863_s4  ;;  %p6869_p0 = scmp.lt.s32.totalorder %s6863_s4, %s6863_s4 }
  0x61   :  { %p6870_p1 = por %p6869_p0, %p6868_p13 }
  0x63   :  { %p6871_p2 = pnand %p6870_p1, %p6864_p12 }
  0x65   :  { %6874 = shalt.err (!%p6871_p2)
}
  0x66   :  { %140 = dma.hbm_to_vmem [thread:$0]  %s8487_s12, 8192, %s135_s26, [#allocation18], %s6931_s29, %s6931_s29, %s6932_s0  }
  0x67   :  { %s6883_s10 = scalar_lea.vmem %s150_s24, 64  ;;  %p6888_p4 = scmp.lt.s32.totalorder %s150_s24, %s150_s24 }
  0x68   :  { %p6884_p3 = scmp.ne.s32.totalorder %s150_s24, %s6883_s10  ;;  %p6889_p5 = scmp.lt.s32.totalorder %s6883_s10, %s6883_s10 }
  0x6a   :  { %p6890_p6 = por %p6889_p5, %p6888_p4 }
  0x6c   :  { %p6891_p7 = pnand %p6890_p6, %p6884_p3 }
  0x6e   :  { %6894 = shalt.err (!%p6891_p7)
}
  0x6f   :  { %152 = dma.hbm_to_vmem [thread:$0]  %s8489_s14, 64, %s150_s24, [#allocation21]  }
  0x70   :  { %6915 = dma.done.wait [#allocation6], 4608  }
  0x71   :  { %6916 = vsyncadd [#allocation6], 4294962688 }
  0x72   :  { %6917 = dma.done.wait [#allocation9], 8320  }
  0x73   :  { %6918 = vsyncadd [#allocation9], 4294958976 }
  0x74   :  { %6919 = dma.done.wait [#allocation12], 16384  }
  0x75   :  { %6920 = vsyncadd [#allocation12], 4294950912 }
  0x76   :  { %6921 = dma.done.wait [#allocation15], 6272  }
  0x77   :  { %6922 = vsyncadd [#allocation15], 4294961024 }
  0x78   :  { %6923 = dma.done.wait [#allocation18], 16384  }
  0x79   :  { %6924 = vsyncadd [#allocation18], 4294950912 }
  0x7a   :  { %6925 = dma.done.wait [#allocation21], 64  }
  0x7b   :  { %6926 = vsyncadd [#allocation21], 4294967232  ;;  %v6943_v0 = vmov 0   ;;  %v6444_v1 = vld [vmem:[#allocation5 + $0xb4] ss:$8 sps:$4 sm:$0xff]   ;;  %vm196_vm0 = vcmask 778240  }
  0x7c   :  { %559 = vmatprep.mubr.bf16.mxu0 %v6943_v0  ;;  %724 = vmatprep.mubr.bf16.mxu1 %v6943_v0  ;;  %v6446_v2 = vld [vmem:[#allocation5 + $0xb0] ss:$8 sps:$4 sm:$0xff]   ;;  %v6447_v3 = vld [vmem:[#allocation5 + $0x54] ss:$8 sps:$4 sm:$0xff]   ;;  %v6450_v5 = vld [vmem:[#allocation5 + $0xa4] ss:$8 sps:$4 sm:$0xff]  }
  0x7d   :  { %531 = vmatprep.subr.bf16.mxu0 %v6444_v1  ;;  %v6449_v4 = vld [vmem:[#allocation5 + $0x50] ss:$8 sps:$4 sm:$0xff]   ;;  %v6452_v6 = vld [vmem:[#allocation5 + $0xa0] ss:$8 sps:$4 sm:$0xff]   ;;  %696 = vmatprep.subr.bf16.mxu1 %v6447_v3  ;;  %v6453_v7 = vld [vmem:[#allocation5 + $0x44] ss:$8 sps:$4 sm:$0xff]  }
  0x7e   :  { %532 = vmatpush1.bf16.msra.mxu0 %v6446_v2  ;;  %697 = vmatpush1.bf16.msra.mxu1 %v6449_v4  ;;  %v6455_v8 = vld [vmem:[#allocation5 + $0x40] ss:$8 sps:$4 sm:$0xff]   ;;  %v6456_v9 = vld [vmem:[#allocation5 + $0x94] ss:$8 sps:$4 sm:$0xff]   ;;  %v6458_v10 = vld [vmem:[#allocation5 + $0x90] ss:$8 sps:$4 sm:$0xff]  }
  0x7f   :  { %533 = vmatprep.subr.bf16.mxu0 %v6450_v5  ;;  %698 = vmatprep.subr.bf16.mxu1 %v6453_v7  ;;  %v6459_v11 = vld [vmem:[#allocation5 + $0x34] ss:$8 sps:$4 sm:$0xff]   ;;  %v6462_v12 = vld [vmem:[#allocation5 + $0x84] ss:$8 sps:$4 sm:$0xff]   ;;  %v6461_v13 = vld [vmem:[#allocation5 + $0x30] ss:$8 sps:$4 sm:$0xff]  }
  0x80   :  { %v6465_v14 = vld [vmem:[#allocation5 + $0x24] ss:$8 sps:$4 sm:$0xff]   ;;  %v6464_v15 = vld [vmem:[#allocation5 + $0x80] ss:$8 sps:$4 sm:$0xff]   ;;  %vm197_vm1 = vsmask.f32 256 }
  0x81   :  { %v6468_v16 = vld [vmem:[#allocation5 + $0x74] ss:$8 sps:$4 sm:$0xff]   ;;  %v6467_v17 = vld [vmem:[#allocation5 + $0x20] ss:$8 sps:$4 sm:$0xff]   ;;  %vm7087_vm2 = vmand %vm196_vm0, %vm197_vm1  ;;  %vm205_vm3 = vsmask.f32 7938 }
  0x82   :  { %534 = vmatpush1.bf16.msra.mxu0 %v6452_v6  ;;  %699 = vmatpush1.bf16.msra.mxu1 %v6455_v8  ;;  %v6471_v18 = vld [vmem:[#allocation5 + $0x14] ss:$8 sps:$4 sm:$0xff]   ;;  %v6470_v20 = vld [vmem:[#allocation5 + $0x70] ss:$8 sps:$4 sm:$0xff]   ;;  %v6474_v22 = vld [vmem:[#allocation5 + $0x64] ss:$8 sps:$4 sm:$0xff]  }
  0x83   :  { %535 = vmatprep.subr.bf16.mxu0 %v6456_v9  ;;  %700 = vmatprep.subr.bf16.mxu1 %v6459_v11  ;;  %v6473_v21 = vld [vmem:[#allocation5 + $0x10] ss:$8 sps:$4 sm:$0xff]   ;;  %vm213_vm4 = vsmask.f32 4368  ;;  %v6476_v23 = vld [vmem:[#allocation5 + $0x60] ss:$8 sps:$4 sm:$0xff]   ;;  %vm7104_vm5 = vmand %vm196_vm0, %vm205_vm3 }
  0x84   :  { %v6477_v24 = vld [vmem:[#allocation5 + $0x4] ss:$8 sps:$4 sm:$0xff]   ;;  %s8499_s29 = sld [smem:[#allocation30_spill]]  ;;  %v199_v28 = vld [vmem:[#allocation2] sm:$0x1]  ;;  %vm295_vm6 = vcmask 781312   ;;  %vm7110_vm7 = vmor %vm197_vm1, %vm213_vm4 }
  0x85   :  { %v6479_v30 = vld [vmem:[#allocation5] ss:$8 sps:$4 sm:$0xff]   ;;  %v200_v31 = vsel %vm7087_vm2, 0, %v199_v28  ;;  %v6482_v36 = vld [vmem:[#allocation5 + $0x114] ss:$8 sps:$4 sm:$0xff]   ;;  %vm7125_vm8 = vmand %vm295_vm6, %vm205_vm3  ;;  %vm514_vm11 = vcmask 785408  }
  0x86   :  { %536 = vmatpush1.bf16.msra.mxu0 %v6458_v10  ;;  %701 = vmatpush1.bf16.msra.mxu1 %v6461_v13  ;;  %201 = vst [vmem:[#allocation2] sm:$0x1] %v200_v31  ;;  %v207_v44 = vld [vmem:[#allocation2 + $0x10] sm:$0x1]  ;;  %v202_v63 = vld [vmem:[#allocation2 + $0x14] sm:$0x1] }
  0x87   :  { %537 = vmatprep.subr.bf16.mxu0 %v6462_v12  ;;  %702 = vmatprep.subr.bf16.mxu1 %v6465_v14  ;;  %v208_v46 = vsel %vm7104_vm5, 0, %v207_v44  ;;  %v203_v3 = vsel %vm7087_vm2, 0, %v202_v63  ;;  %vm338_vm9 = vsmask.f32 3328  ;;  %vm339_vm10 = vsmask.f32 7440 }
  0x88   :  { %209 = vst [vmem:[#allocation2 + $0x10] sm:$0x1] %v208_v46  ;;  %204 = vst [vmem:[#allocation2 + $0x14] sm:$0x1] %v203_v3  ;;  %vm771_vm13 = vcmask 1042432   ;;  %vm772_vm14 = vcmask 1046532  }
  0x89   :  { %vm7177_vm12 = vmor %vm338_vm9, %vm339_vm10  ;;  %vm2048_vm0 = vcmask 1041409   ;;  %vm2052_vm4 = vcmask 1043459   ;;  %vm2060_vm9 = vcmask 1047559   ;;  %vm2330_vm10 = vcmask 1040384   ;;  %s6947_s19 = smov [#allocation22]  }
  0x8a   :  { %538 = vmatpush1.bf16.msra.mxu0 %v6464_v15  ;;  %703 = vmatpush1.bf16.msra.mxu1 %v6467_v17  ;;  %v188_v25 = vld [vmem:[%s8499_s29] sm:$0xf]  ;;  %v189_v26 = vld [vmem:[%s8499_s29 + $0x4] sm:$0xf]  ;;  %v190_v27 = vld [vmem:[%s8499_s29 + $0x8] sm:$0xf] }
  0x8b   :  { %539 = vmatprep.subr.bf16.mxu0 %v6468_v16  ;;  %704 = vmatprep.subr.bf16.mxu1 %v6471_v18  ;;  %v216_v29 = vshrl.u32 %v188_v25, 16  ;;  %v224_v32 = vshrl.u32 %v189_v26, 16  ;;  %v227_v33 = vshll.u32 %v189_v26, 16  ;;  %v233_v34 = vshrl.u32 %v190_v27, 16  ;;  %v191_v43 = vld [vmem:[%s8499_s29 + $0xc] sm:$0xf]  ;;  %vm7231_vm15 = vmor %vm771_vm13, %vm772_vm14 }
  0x8c   :  { %v219_v38 = vshll.u32 %v188_v25, 16  ;;  %v236_v39 = vshll.u32 %v190_v27, 16  ;;  %v242_v47 = vshrl.u32 %v191_v43, 16  ;;  %v245_v54 = vshll.u32 %v191_v43, 16  ;;  %v192_v58 = vld [vmem:[%s8499_s29 + $0x10] sm:$0xf]  ;;  %vm7873_vm13 = vmand %vm2330_vm10, %vm205_vm3 }
  0x8d   :  { %v218_v37 = vrot.slane %v216_v29, 7  ;;  %v226_v41 = vrot.slane %v224_v32, 7  ;;  %v235_v42 = vrot.slane %v233_v34, 7  ;;  %v193_v59 = vld [vmem:[%s8499_s29 + $0x14] sm:$0xf]  ;;  %v251_v1 = vshrl.u32 %v192_v58, 16 }
  0x8e   :  { %540 = vmatpush1.bf16.msra.mxu0 %v6470_v20  ;;  %705 = vmatpush1.bf16.msra.mxu1 %v6473_v21  ;;  %v244_v53 = vrot.slane %v242_v47, 7  ;;  %v194_v62 = vld [vmem:[%s8499_s29 + $0x18] sm:$0xf]  ;;  %v297_v2 = vld [vmem:[#allocation2] sm:$0xf]  ;;  %v254_v4 = vshll.u32 %v192_v58, 16 }
  0x8f   :  { %541 = vmatprep.subr.bf16.mxu0 %v6474_v22  ;;  %706 = vmatprep.subr.bf16.mxu1 %v6477_v24  ;;  %v222_v45 = vrot.slane %v218_v37, 4  ;;  %v229_v48 = vor.u32 %v227_v33, %v226_v41  ;;  %v231_v49 = vrot.slane %v226_v41, 4  ;;  %v238_v50 = vor.u32 %v236_v39, %v235_v42  ;;  %v195_v13 = vld [vmem:[%s8499_s29 + $0x1c] sm:$0xf]  ;;  %v304_v14 = vld [vmem:[#allocation2 + $0x10] sm:$0x1] }
  0x90   :  { %v221_v51 = vor.u32 %v219_v38, %v218_v37  ;;  %v240_v52 = vrot.slane %v235_v42, 4  ;;  %v247_v60 = vor.u32 %v245_v54, %v244_v53  ;;  %v249_v61 = vrot.slane %v244_v53, 4  ;;  %v210_v17 = vld [vmem:[#allocation2 + $0x24] sm:$0x1]  ;;  %v307_v35 = vld [vmem:[#allocation2 + $0x14] sm:$0xf] }
  0x91   :  { %v230_v55 = vsel %vm7110_vm7, %v222_v45, %v229_v48  ;;  %v239_v56 = vsel %vm7110_vm7, %v231_v49, %v238_v50  ;;  %v259_v5 = vshrl.u32 %v193_v59, 16  ;;  %v262_v6 = vshll.u32 %v193_v59, 16  ;;  %s5690_s6 = sshll.u32 %s6947_s19, 4  ;;  %s5691_s6 = int_to_ptr.vmem [resolvable:$true] %s5690_s6 }
  0x92   :  { %542 = vmatpush1.bf16.msra.mxu0 %v6476_v23  ;;  %707 = vmatpush1.bf16.msra.mxu1 %v6479_v30  ;;  %301 = vst.msk [vmem:[#allocation2 + $0x4] sm:$0xf] %vm295_vm6, %v230_v55  ;;  %302 = vst.msk [vmem:[#allocation2 + $0x8] sm:$0xf] %vm295_vm6, %v239_v56  ;;  %v298_v7 = vsel %vm7125_vm8, %v221_v51, %v297_v2  ;;  %v248_v8 = vsel %vm7110_vm7, %v240_v52, %v247_v60  ;;  %v253_v9 = vrot.slane %v251_v1, 7  ;;  %s6895_s21 = scalar_lea.vmem %s5691_s6, 32  ;;  %p6900_p9 = scmp.lt.s32.totalorder %s5691_s6, %s5691_s6 }
  0x93   :  { %901 = vmatprep.subr.bf16.mxu0 %v6482_v36  ;;  %v268_v10 = vshrl.u32 %v194_v62, 16  ;;  %299 = vst [vmem:[#allocation2] sm:$0xf] %v298_v7  ;;  %303 = vst.msk [vmem:[#allocation2 + $0xc] sm:$0xf] %vm295_vm6, %v248_v8  ;;  %v261_v11 = vrot.slane %v259_v5, 7  ;;  %v305_v18 = vsel %vm7087_vm2, %v249_v61, %v304_v14  ;;  %p6896_p8 = scmp.ne.s32.totalorder %s5691_s6, %s6895_s21  ;;  %p6901_p10 = scmp.lt.s32.totalorder %s6895_s21, %s6895_s21 }
  0x94   :  { %v271_v12 = vshll.u32 %v194_v62, 16  ;;  %v257_v15 = vrot.slane %v253_v9, 4  ;;  %v211_v22 = vsel %vm7104_vm5, 0, %v210_v17  ;;  %306 = vst [vmem:[#allocation2 + $0x10] sm:$0x1] %v305_v18  ;;  %v256_v23 = vor.u32 %v254_v4, %v253_v9 }
  0x95   :  { %v270_v16 = vrot.slane %v268_v10, 7  ;;  %v264_v20 = vor.u32 %v262_v6, %v261_v11  ;;  %v266_v21 = vrot.slane %v261_v11, 4  ;;  %212 = vst [vmem:[#allocation2 + $0x24] sm:$0x1] %v211_v22  ;;  %v277_v25 = vshrl.u32 %v195_v13, 16  ;;  %p6902_p11 = por %p6901_p10, %p6900_p9 }
  0x96   :  { %v280_v37 = vshll.u32 %v195_v13, 16  ;;  %v308_v43 = vsel %vm7125_vm8, %v256_v23, %v307_v35  ;;  %v6480_v9 = vld [vmem:[#allocation5 + $0x110] ss:$8 sps:$4 sm:$0xff]   ;;  %vm2054_vm5 = vcmask 1044484   ;;  %vm2058_vm8 = vcmask 1046534  }
  0x97   :  { %v273_v24 = vor.u32 %v271_v12, %v270_v16  ;;  %v265_v28 = vsel %vm7110_vm7, %v257_v15, %v264_v20  ;;  %v275_v32 = vrot.slane %v270_v16, 4  ;;  %v279_v36 = vrot.slane %v277_v25, 7  ;;  %309 = vst [vmem:[#allocation2 + $0x14] sm:$0xf] %v308_v43  ;;  %v6486_v20 = vld [vmem:[#allocation5 + $0x104] ss:$8 sps:$4 sm:$0xff]   ;;  %p6903_p12 = pnand %p6902_p11, %p6896_p8 }
  0x98   :  { %310 = vst.msk [vmem:[#allocation2 + $0x18] sm:$0xf] %vm295_vm6, %v265_v28  ;;  %v6635_v52 = vld [vmem:[#allocation14 + $0x130] ss:$8 sps:$4 sm:$0xff]  }
  0x99   :  { %v7154_v26 = vld [vmem:[#allocation2 + $0x4] sm:$0xf]  ;;  %v7156_v27 = vld [vmem:[#allocation2 + $0x8] sm:$0xf]  ;;  %v274_v34 = vsel %vm7110_vm7, %v266_v21, %v273_v24  ;;  %v282_v57 = vor.u32 %v280_v37, %v279_v36  ;;  %v284_v4 = vrot.slane %v279_v36, 4 }
  0x9a   :  { %v351_v29 = vshll.u32 %v7154_v26, 16  ;;  %v355_v30 = vshrl.u32 %v7154_v26, 16  ;;  %v361_v31 = vshll.u32 %v7156_v27, 16  ;;  %v365_v33 = vshrl.u32 %v7156_v27, 16  ;;  %v316_v38 = vld [vmem:[#allocation2] sm:$0xf] }
  0x9b   :  { %311 = vst.msk [vmem:[#allocation2 + $0x1c] sm:$0xf] %vm295_vm6, %v274_v34  ;;  %v342_v44 = vshrl.u32 %v316_v38, 16  ;;  %v345_v45 = vshll.u32 %v316_v38, 16  ;;  %v5724_v46 = vcombine.low %v316_v38, %v7154_v26  ;;  %v7171_v47 = vld [vmem:[#allocation2 + $0xc] sm:$0xf]  ;;  %v283_v3 = vsel %vm7110_vm7, %v275_v32, %v282_v57 }
  0x9c   :  { %v353_v39 = vrot.slane %v351_v29, 5  ;;  %v357_v41 = vrot.slane %v355_v30, 4  ;;  %v363_v42 = vrot.slane %v361_v31, 5  ;;  %v367_v48 = vrot.slane %v365_v33, 4  ;;  %v7182_v55 = vld [vmem:[#allocation2 + $0x10] sm:$0x1] }
  0x9d   :  { %v371_v50 = vshll.u32 %v7171_v47, 16  ;;  %v375_v51 = vshrl.u32 %v7171_v47, 16  ;;  %v344_v53 = vrot.slane %v342_v44, 4  ;;  %v347_v54 = vrot.slane %v345_v45, 5  ;;  %5740 = vmatmul.mubr.msk.bf16.vlgmr.msra.gmra.mxu1 %vm514_vm11, %v5724_v46  ;;  %v313_v58 = vld [vmem:[#allocation2 + $0x24] sm:$0x1] }
  0x9e   :  { %v358_v49 = vor.u32 %v357_v41, %v353_v39  ;;  %v368_v56 = vor.u32 %v367_v48, %v363_v42  ;;  %734 = vmatprep.mubr.bf16.mxu1 %v6943_v0  ;;  %v381_v62 = vshll.u32 %v7182_v55, 16  ;;  %v5725_v1 = vcombine.low %v7156_v27, %v7171_v47  ;;  %312 = vst.msk [vmem:[#allocation2 + $0x20] sm:$0xf] %vm295_vm6, %v283_v3  ;;  %v320_v15 = vld [vmem:[#allocation2 + $0x14] sm:$0xf] }
  0x9f   :  { %v373_v60 = vrot.slane %v371_v50, 5  ;;  %v377_v61 = vrot.slane %v375_v51, 4  ;;  %v348_v63 = vor.u32 %v347_v54, %v344_v53  ;;  %v7188_v2 = vld [vmem:[#allocation2 + $0x18] sm:$0xf]  ;;  %v314_v13 = vsel %vm7087_vm2, %v284_v4, %v313_v58  ;;  %v6489_v34 = vld [vmem:[#allocation5 + $0xf4] ss:$8 sps:$4 sm:$0xff]  }
  0xa0   :  { %v359_v59 = vrot.slane %v358_v49, 4  ;;  %v369_v6 = vrot.slane %v368_v56, 4  ;;  %v395_v8 = vshll.u32 %v7188_v2, 16  ;;  %v383_v11 = vrot.slane %v381_v62, 5  ;;  %315 = vst [vmem:[#allocation2 + $0x24] sm:$0x1] %v314_v13 }
  0xa1   :  { %v378_v7 = vor.u32 %v377_v61, %v373_v60  ;;  %v349_v10 = vrot.slane %v348_v63, 4  ;;  %v399_v12 = vshrl.u32 %v7188_v2, 16  ;;  %v386_v21 = vshrl.u32 %v320_v15, 16  ;;  %v6484_v29 = vld [vmem:[#allocation5 + $0x100] ss:$8 sps:$4 sm:$0xff]  }
  0xa2   :  { %v364_v5 = vsel %vm7177_vm12, %v359_v59, %v363_v42  ;;  %v7199_v16 = vld [vmem:[#allocation2 + $0x1c] sm:$0xf]  ;;  %v397_v17 = vrot.slane %v395_v8, 5  ;;  %v389_v22 = vshll.u32 %v320_v15, 16  ;;  %v374_v32 = vsel %vm7177_vm12, %v369_v6, %v373_v60  ;;  %v6490_v53 = vld [vmem:[#allocation5 + $0xe0] ss:$8 sps:$4 sm:$0xff]  }
  0xa3   :  { %v379_v14 = vrot.slane %v378_v7, 4  ;;  %v354_v18 = vsel %vm7177_vm12, %v349_v10, %v353_v39  ;;  %v401_v23 = vrot.slane %v399_v12, 4  ;;  %v388_v25 = vrot.slane %v386_v21, 4  ;;  %v6487_v39 = vld [vmem:[#allocation5 + $0xf0] ss:$8 sps:$4 sm:$0xff]  }
  0xa4   :  { %v5704_v24 = vcombine.low %v354_v18, %v364_v5  ;;  %v391_v28 = vrot.slane %v389_v22, 5  ;;  %v405_v19 = vshll.u32 %v7199_v16, 16  ;;  %v409_v31 = vshrl.u32 %v7199_v16, 16  ;;  %v6492_v44 = vld [vmem:[#allocation5 + $0xe4] ss:$8 sps:$4 sm:$0xff]   ;;  %v4460_v6 = vld [vmem:[#allocation17 + $0xc0] sm:$0xff] }
  0xa5   :  { %5741 = vmatmul.mubr.msk.bf16.gmra.mxu1 %vm514_vm11, %v5725_v1  ;;  %v402_v30 = vor.u32 %v401_v23, %v397_v17  ;;  %v384_v33 = vsel %vm7177_vm12, %v379_v14, %v383_v11  ;;  %v7213_v36 = vld [vmem:[#allocation2 + $0x20] sm:$0xf]  ;;  %v5726_v42 = vcombine.low %v320_v15, %v7188_v2  ;;  %v6496_v54 = vld [vmem:[#allocation5 + $0xd4] ss:$8 sps:$4 sm:$0xff]   ;;  %v6499_v1 = vld [vmem:[#allocation5 + $0xc4] ss:$8 sps:$4 sm:$0xff]  }
  0xa6   :  { %5720 = vmatmul.mubr.msk.bf16.vlgmr.msra.gmra.mxu0 %vm514_vm11, %v5704_v24  ;;  %744 = vmatprep.mubr.bf16.mxu1 %v6943_v0  ;;  %v392_v35 = vor.u32 %v391_v28, %v388_v25  ;;  %v415_v37 = vshll.u32 %v7213_v36, 16  ;;  %v419_v38 = vshrl.u32 %v7213_v36, 16  ;;  %v407_v41 = vrot.slane %v405_v19, 5  ;;  %v6494_v61 = vld [vmem:[#allocation5 + $0xd0] ss:$8 sps:$4 sm:$0xff]  }
  0xa7   :  { %902 = vmatpush1.bf16.msra.mxu0 %v6480_v9  ;;  %569 = vmatprep.mubr.bf16.mxu0 %v6943_v0  ;;  %v5705_v43 = vcombine.low %v374_v32, %v384_v33  ;;  %v403_v45 = vrot.slane %v402_v30, 4  ;;  %v7218_v46 = vld [vmem:[#allocation2 + $0x24] sm:$0x1]  ;;  %v411_v48 = vrot.slane %v409_v31, 4  ;;  %v5727_v62 = vcombine.low %v7199_v16, %v7213_v36  ;;  %v6497_v7 = vld [vmem:[#allocation5 + $0xc0] ss:$8 sps:$4 sm:$0xff]  }
  0xa8   :  { %903 = vmatprep.subr.bf16.mxu0 %v6486_v20  ;;  %v393_v49 = vrot.slane %v392_v35, 4  ;;  %v417_v50 = vrot.slane %v415_v37, 5  ;;  %v421_v51 = vrot.slane %v419_v38, 4  ;;  %v425_v60 = vshll.u32 %v7218_v46, 16  ;;  %v765_v8 = vld [vmem:[#allocation2] sm:$0xe] }
  0xa9   :  { %v412_v56 = vor.u32 %v411_v48, %v407_v41  ;;  %v408_v58 = vsel %vm7177_vm12, %v403_v45, %v407_v41  ;;  %v776_v9 = vrot.slane %v7154_v26, 5  ;;  %v766_v12 = vld [vmem:[#allocation2 + $0x14] sm:$0xe]  ;;  %v782_v13 = vrot.slane %v7171_v47, 5  ;;  %v1045_v38 = vld [vmem:[%s8478_s3 + $0xf8] sm:$0xff]  ;;  %v1043_v41 = vld [vmem:[%s8478_s3 + $0xe8] sm:$0xff] }
  0xaa   :  { %v398_v57 = vsel %vm7177_vm12, %v393_v49, %v397_v17  ;;  %v422_v59 = vor.u32 %v421_v51, %v417_v50  ;;  %v427_v5 = vrot.slane %v425_v60, 5  ;;  %v779_v14 = vrot.slane %v7156_v27, 5  ;;  %1146 = vmatprep.subr.mxu1 %v1045_v38  ;;  %v1039_v45 = vld [vmem:[%s8478_s3 + $0xc8] sm:$0xff]  ;;  %v1037_v48 = vld [vmem:[%s8478_s3 + $0xb8] sm:$0xff]  ;;  %v1036_v49 = vld [vmem:[%s8478_s3 + $0xb0] sm:$0xff] }
  0xab   :  { %904 = vmatpush1.bf16.msra.mxu0 %v6484_v29  ;;  %v5706_v63 = vcombine.low %v398_v57, %v408_v58  ;;  %v413_v3 = vrot.slane %v412_v56, 4  ;;  %v789_v17 = vrot.slane %v7188_v2, 5  ;;  %v795_v26 = vrot.slane %v7213_v36, 5  ;;  %v1034_v51 = vld [vmem:[%s8478_s3 + $0xa0] sm:$0xff]  ;;  %v1031_v56 = vld [vmem:[%s8478_s3 + $0x88] sm:$0xff]  ;;  %v1029_v58 = vld [vmem:[%s8478_s3 + $0x78] sm:$0xff] }
  0xac   :  { %905 = vmatprep.subr.bf16.mxu0 %v6489_v34  ;;  %v423_v4 = vrot.slane %v422_v59, 4  ;;  %v5744_v18 = vrot.slane %v765_v8, 9  ;;  %v778_v20 = vrot.slane %v776_v9, 4  ;;  %v781_v21 = vrot.slane %v779_v14, 4  ;;  %v1030_v57 = vld [vmem:[%s8478_s3 + $0x80] sm:$0xff]  ;;  %v1028_v59 = vld [vmem:[%s8478_s3 + $0x70] sm:$0xff] }
  0xad   :  { %5742 = vmatmul.mubr.msk.bf16.gmra.mxu1 %vm514_vm11, %v5726_v42  ;;  %v418_v10 = vsel %vm7177_vm12, %v413_v3, %v417_v50  ;;  %v785_v22 = vrot.slane %v7182_v55, 5  ;;  %v792_v23 = vrot.slane %v7199_v16, 5  ;;  %v784_v24 = vrot.slane %v782_v13, 4  ;;  %v1042_v42 = vld [vmem:[%s8478_s3 + $0xe0] sm:$0xff]  ;;  %v1035_v50 = vld [vmem:[%s8478_s3 + $0xa8] sm:$0xff] }
  0xae   :  { %5721 = vmatmul.mubr.msk.bf16.gmra.mxu0 %vm514_vm11, %v5705_v43  ;;  %754 = vmatprep.mubr.bf16.mxu1 %v6943_v0  ;;  %v428_v11 = vsel %vm7177_vm12, %v423_v4, %v427_v5  ;;  %v5745_v25 = vrot.slane %v766_v12, 9  ;;  %v798_v28 = vrot.slane %v7218_v46, 5  ;;  %v791_v27 = vrot.slane %v789_v17, 4  ;;  %v1041_v43 = vld [vmem:[%s8478_s3 + $0xd8] sm:$0xff]  ;;  %v1038_v46 = vld [vmem:[%s8478_s3 + $0xc0] sm:$0xff]  ;;  %v1027_v60 = vld [vmem:[%s8478_s3 + $0x68] sm:$0xff] }
  0xaf   :  { %906 = vmatpush1.bf16.msra.mxu0 %v6487_v39  ;;  %579 = vmatprep.mubr.bf16.mxu0 %v6943_v0  ;;  %v5707_v15 = vcombine.low %v418_v10, %v428_v11  ;;  %v794_v47 = vrot.slane %v792_v23, 4  ;;  %v797_v19 = vrot.slane %v795_v26, 4  ;;  %v777_v2 = vsel %vm7231_vm15, %v5744_v18, %v776_v9  ;;  %v1044_v39 = vld [vmem:[%s8478_s3 + $0xf0] sm:$0xff]  ;;  %v1022_v3 = vld [vmem:[%s8478_s3 + $0x40] sm:$0xff]  ;;  %v1021_v4 = vld [vmem:[%s8478_s3 + $0x38] sm:$0xff] }
  0xb0   :  { %907 = vmatprep.subr.bf16.mxu0 %v6492_v44  ;;  %v780_v29 = vsel %vm7231_vm15, %v778_v20, %v779_v14  ;;  %v783_v16 = vsel %vm7231_vm15, %v781_v21, %v782_v13  ;;  %v786_v30 = vsel %vm7231_vm15, %v784_v24, %v785_v22  ;;  %v790_v32 = vsel %vm7231_vm15, %v5745_v25, %v789_v17  ;;  %v1040_v44 = vld [vmem:[%s8478_s3 + $0xd0] sm:$0xff]  ;;  %v1018_v8 = vld [vmem:[%s8478_s3 + $0x20] sm:$0xff]  ;;  %v1017_v9 = vld [vmem:[%s8478_s3 + $0x18] sm:$0xff] }
  0xb1   :  { %v5746_v55 = vcombine.low %v777_v2, %v780_v29  ;;  %v5747_v31 = vcombine.low %v783_v16, %v786_v30  ;;  %v793_v33 = vsel %vm7231_vm15, %v791_v27, %v792_v23  ;;  %v796_v35 = vsel %vm7231_vm15, %v794_v47, %v795_v26  ;;  %1147 = vmatpush1.msra.mxu1 %v1044_v39  ;;  %v1020_v5 = vld [vmem:[%s8478_s3 + $0x30] sm:$0xff]  ;;  %v1015_v11 = vld [vmem:[%s8478_s3 + $0x8] sm:$0xff]  ;;  %v1014_v12 = vld [vmem:[%s8478_s3] sm:$0xff] }
  0xb2   :  { %v5748_v34 = vcombine.low %v790_v32, %v793_v33  ;;  %v799_v36 = vsel %vm7231_vm15, %v797_v19, %v798_v28  ;;  %1148 = vmatprep.subr.mxu1 %v1043_v41  ;;  %v1016_v10 = vld [vmem:[%s8478_s3 + $0x10] sm:$0xff]  ;;  %v1077_v13 = vld [vmem:[%s8478_s3 + $0x1f8] sm:$0xff]  ;;  %v1074_v17 = vld [vmem:[%s8478_s3 + $0x1e0] sm:$0xff]  ;;  %vm2050_vm2 = vcmask 1042434   ;;  %vm2056_vm6 = vcmask 1045509  }
  0xb3   :  { %908 = vmatpush1.bf16.msra.mxu0 %v6490_v53  ;;  %v5749_v37 = vcombine.low %v796_v35, %v799_v36  ;;  %1149 = vmatpush1.msra.mxu1 %v1042_v42  ;;  %v1033_v53 = vld [vmem:[%s8478_s3 + $0x98] sm:$0xff]  ;;  %v1076_v14 = vld [vmem:[%s8478_s3 + $0x1f0] sm:$0xff]  ;;  %v1071_v20 = vld [vmem:[%s8478_s3 + $0x1c8] sm:$0xff] }
  0xb4   :  { %909 = vmatprep.subr.bf16.mxu0 %v6496_v54  ;;  %1150 = vmatprep.subr.mxu1 %v1041_v43  ;;  %v1032_v54 = vld [vmem:[%s8478_s3 + $0x90] sm:$0xff]  ;;  %v1073_v26 = vld [vmem:[%s8478_s3 + $0x1d8] sm:$0xff]  ;;  %v1070_v21 = vld [vmem:[%s8478_s3 + $0x1c0] sm:$0xff] }
  0xb5   :  { %5743 = vmatmul.mubr.msk.bf16.gmra.mxu1 %vm514_vm11, %v5727_v62  ;;  %v1025_v62 = vld [vmem:[%s8478_s3 + $0x58] sm:$0xff]  ;;  %v1072_v18 = vld [vmem:[%s8478_s3 + $0x1d0] sm:$0xff]  ;;  %v1067_v24 = vld [vmem:[%s8478_s3 + $0x1a8] sm:$0xff] }
  0xb6   :  { %5722 = vmatmul.mubr.msk.bf16.gmra.mxu0 %vm514_vm11, %v5706_v63  ;;  %1151 = vmatpush1.msra.mxu1 %v1040_v44  ;;  %v1024_v63 = vld [vmem:[%s8478_s3 + $0x50] sm:$0xff]  ;;  %v1069_v22 = vld [vmem:[%s8478_s3 + $0x1b8] sm:$0xff]  ;;  %v1066_v25 = vld [vmem:[%s8478_s3 + $0x1a0] sm:$0xff] }
  0xb7   :  { %910 = vmatpush1.bf16.msra.mxu0 %v6494_v61  ;;  %589 = vmatprep.mubr.bf16.mxu0 %v6943_v0  ;;  %v1026_v61 = vld [vmem:[%s8478_s3 + $0x60] sm:$0xff]  ;;  %v1068_v23 = vld [vmem:[%s8478_s3 + $0x1b0] sm:$0xff]  ;;  %v1065_v28 = vld [vmem:[%s8478_s3 + $0x198] sm:$0xff] }
  0xb8   :  { %911 = vmatprep.subr.bf16.mxu0 %v6499_v1  ;;  %1152 = vmatprep.subr.mxu1 %v1039_v45  ;;  %v1023_v1 = vld [vmem:[%s8478_s3 + $0x48] sm:$0xff]  ;;  %v1064_v27 = vld [vmem:[%s8478_s3 + $0x190] sm:$0xff]  ;;  %v1062_v19 = vld [vmem:[%s8478_s3 + $0x180] sm:$0xff] }
  0xb9   :  { %1153 = vmatpush1.msra.mxu1 %v1038_v46  ;;  %v1063_v47 = vld [vmem:[%s8478_s3 + $0x188] sm:$0xff]  ;;  %v1061_v2 = vld [vmem:[%s8478_s3 + $0x178] sm:$0xff]  ;;  %v1060_v29 = vld [vmem:[%s8478_s3 + $0x170] sm:$0xff] }
  0xba   :  { %1154 = vmatprep.subr.mxu1 %v1037_v48  ;;  %v1058_v16 = vld [vmem:[%s8478_s3 + $0x160] sm:$0xff]  ;;  %v1057_v30 = vld [vmem:[%s8478_s3 + $0x158] sm:$0xff]  ;;  %v1055_v32 = vld [vmem:[%s8478_s3 + $0x148] sm:$0xff] }
  0xbb   :  { %912 = vmatpush1.bf16.msra.mxu0 %v6497_v7  ;;  %1155 = vmatpush1.msra.mxu1 %v1036_v49  ;;  %v1019_v7 = vld [vmem:[%s8478_s3 + $0x28] sm:$0xff]  ;;  %v1054_v33 = vld [vmem:[%s8478_s3 + $0x140] sm:$0xff]  ;;  %v1052_v35 = vld [vmem:[%s8478_s3 + $0x130] sm:$0xff] }
  0xbc   :  { %1219 = vmatprep.subr.mxu0 %v1045_v38  ;;  %1156 = vmatprep.subr.mxu1 %v1035_v50  ;;  %v1051_v36 = vld [vmem:[%s8478_s3 + $0x128] sm:$0xff]  ;;  %v1049_v38 = vld [vmem:[%s8478_s3 + $0x118] sm:$0xff] }
  0xbd   :  { %1157 = vmatpush1.msra.mxu1 %v1034_v51 }
  0xbe   :  { %5723 = vmatmul.mubr.msk.bf16.gmra.mxu0 %vm514_vm11, %v5707_v15  ;;  %1158 = vmatprep.subr.mxu1 %v1033_v53  ;;  %v1075_v15 = vld [vmem:[%s8478_s3 + $0x1e8] sm:$0xff] }
  0xbf   :  { %929 = vmatprep.mubr.bf16.mxu0 %v6943_v0  ;;  %1159 = vmatpush1.msra.mxu1 %v1032_v54 }
  0xc0   :  { %1160 = vmatprep.subr.mxu1 %v1031_v56 }
  0xc1   :  { %1161 = vmatpush1.msra.mxu1 %v1030_v57 }
  0xc2   :  { %1162 = vmatprep.subr.mxu1 %v1029_v58 }
  0xc3   :  { %1163 = vmatpush1.msra.mxu1 %v1028_v59 }
  0xc4   :  { %1164 = vmatprep.subr.mxu1 %v1027_v60 }
  0xc5   :  { %1165 = vmatpush1.msra.mxu1 %v1026_v61 }
  0xc6   :  { %5762 = vmatmul.mubr.msk.bf16.vlgmr.msra.gmra.mxu0 %vm514_vm11, %v5746_v55  ;;  %1166 = vmatprep.subr.mxu1 %v1025_v62  ;;  %v1059_v55 = vld [vmem:[%s8478_s3 + $0x168] sm:$0xff] }
  0xc7   :  { %939 = vmatprep.mubr.bf16.mxu0 %v6943_v0  ;;  %1220 = vmatpush1.msra.mxu0 %v1044_v39  ;;  %v1048_v39 = vld [vmem:[%s8478_s3 + $0x110] sm:$0xff] }
  0xc8   :  { %1221 = vmatprep.subr.mxu0 %v1043_v41  ;;  %1167 = vmatpush1.msra.mxu1 %v1024_v63  ;;  %v1047_v41 = vld [vmem:[%s8478_s3 + $0x108] sm:$0xff] }
  0xc9   :  { %1222 = vmatpush1.msra.mxu0 %v1042_v42  ;;  %1168 = vmatprep.subr.mxu1 %v1023_v1  ;;  %v1046_v42 = vld [vmem:[%s8478_s3 + $0x100] sm:$0xff] }
  0xca   :  { %1223 = vmatprep.subr.mxu0 %v1041_v43  ;;  %1169 = vmatpush1.msra.mxu1 %v1022_v3 }
  0xcb   :  { %1224 = vmatpush1.msra.mxu0 %v1040_v44  ;;  %1170 = vmatprep.subr.mxu1 %v1021_v4 }
  0xcc   :  { %1225 = vmatprep.subr.mxu0 %v1039_v45  ;;  %1171 = vmatpush1.msra.mxu1 %v1020_v5 }
  0xcd   :  { %1226 = vmatpush1.msra.mxu0 %v1038_v46  ;;  %1172 = vmatprep.subr.mxu1 %v1019_v7 }
  0xce   :  { %5763 = vmatmul.mubr.msk.bf16.gmra.mxu0 %vm514_vm11, %v5747_v31  ;;  %1227 = vmatprep.subr.mxu0 %v1037_v48  ;;  %v1056_v31 = vld [vmem:[%s8478_s3 + $0x150] sm:$0xff] }
  0xcf   :  { %949 = vmatprep.mubr.bf16.mxu0 %v6943_v0  ;;  %1228 = vmatpush1.msra.mxu0 %v1036_v49 }
  0xd0   :  { %1229 = vmatprep.subr.mxu0 %v1035_v50  ;;  %1173 = vmatpush1.msra.mxu1 %v1018_v8 }
  0xd1   :  { %1230 = vmatpush1.msra.mxu0 %v1034_v51  ;;  %1174 = vmatprep.subr.mxu1 %v1017_v9 }
  0xd2   :  { %1231 = vmatprep.subr.mxu0 %v1033_v53  ;;  %1175 = vmatpush1.msra.mxu1 %v1016_v10 }
  0xd3   :  { %1232 = vmatpush1.msra.mxu0 %v1032_v54  ;;  %1176 = vmatprep.subr.mxu1 %v1015_v11 }
  0xd4   :  { %1233 = vmatprep.subr.mxu0 %v1031_v56  ;;  %1177 = vmatpush1.msra.mxu1 %v1014_v12 }
  0xd5   :  { %1234 = vmatpush1.msra.mxu0 %v1030_v57  ;;  %1178 = vmatprep.subr.mxu1 %v1077_v13 }
  0xd6   :  { %5764 = vmatmul.mubr.msk.bf16.gmra.mxu0 %vm514_vm11, %v5748_v34  ;;  %1235 = vmatprep.subr.mxu0 %v1029_v58  ;;  %v1053_v34 = vld [vmem:[%s8478_s3 + $0x138] sm:$0xff] }
  0xd7   :  { %959 = vmatprep.mubr.bf16.mxu0 %v6943_v0  ;;  %1236 = vmatpush1.msra.mxu0 %v1028_v59 }
  0xd8   :  { %1237 = vmatprep.subr.mxu0 %v1027_v60  ;;  %1179 = vmatpush2.msra.mxu1 %v1076_v14 }
  0xd9   :  { %1238 = vmatpush1.msra.mxu0 %v1026_v61  ;;  %1180 = vmatprep.subr.mxu1 %v1075_v15 }
  0xda   :  { %1239 = vmatprep.subr.mxu0 %v1025_v62  ;;  %1181 = vmatpush2.msra.mxu1 %v1074_v17 }
  0xdb   :  { %1240 = vmatpush1.msra.mxu0 %v1024_v63  ;;  %1182 = vmatprep.subr.mxu1 %v1073_v26 }
  0xdc   :  { %1241 = vmatprep.subr.mxu0 %v1023_v1  ;;  %1183 = vmatpush2.msra.mxu1 %v1072_v18 }
  0xdd   :  { %1242 = vmatpush1.msra.mxu0 %v1022_v3  ;;  %1184 = vmatprep.subr.mxu1 %v1071_v20 }
  0xde   :  { %5765 = vmatmul.mubr.msk.bf16.gmra.mxu0 %vm514_vm11, %v5749_v37  ;;  %1243 = vmatprep.subr.mxu0 %v1021_v4  ;;  %v1050_v37 = vld [vmem:[%s8478_s3 + $0x120] sm:$0xff]  ;;  %vm7860_vm11 = vmand %vm2330_vm10, %vm197_vm1  ;;  %vm2397_vm1 = vcmask 1043456  }
  0xdf   :  { %1244 = vmatpush1.msra.mxu0 %v1020_v5  ;;  %1185 = vmatpush2.msra.mxu1 %v1070_v21  ;;  %vm7971_vm14 = vmand %vm2397_vm1, %vm205_vm3  ;;  %vm6946_vm3 = vmmov 0  }
  0xe0   :  { %1245 = vmatprep.subr.mxu0 %v1019_v7  ;;  %1186 = vmatprep.subr.mxu1 %v1069_v22 }
  0xe1   :  { %1246 = vmatpush1.msra.mxu0 %v1018_v8  ;;  %1187 = vmatpush2.msra.mxu1 %v1068_v23 }
  0xe2   :  { %1247 = vmatprep.subr.mxu0 %v1017_v9  ;;  %1188 = vmatprep.subr.mxu1 %v1067_v24 }
  0xe3   :  { %1248 = vmatpush1.msra.mxu0 %v1016_v10  ;;  %1189 = vmatpush2.msra.mxu1 %v1066_v25 }
  0xe4   :  { %1249 = vmatprep.subr.mxu0 %v1015_v11  ;;  %1190 = vmatprep.subr.mxu1 %v1065_v28  ;;  %v988_v11 = vlaneseq }
  0xe5   :  { %1250 = vmatpush1.msra.mxu0 %v1014_v12  ;;  %1191 = vmatpush2.msra.mxu1 %v1064_v27 }
  0xe6   :  { %1251 = vmatprep.subr.mxu0 %v1077_v13  ;;  %1192 = vmatprep.subr.mxu1 %v1063_v47 }
  0xe7   :  { %1252 = vmatpush2.msra.mxu0 %v1076_v14  ;;  %1193 = vmatpush2.msra.mxu1 %v1062_v19 }
  0xe8   :  { %1253 = vmatprep.subr.mxu0 %v1075_v15  ;;  %1194 = vmatprep.subr.mxu1 %v1061_v2  ;;  %v7471_v15 = vshrl.u32 %v988_v11, 7 }
  0xe9   :  { %1254 = vmatpush2.msra.mxu0 %v1074_v17  ;;  %1195 = vmatpush2.msra.mxu1 %v1060_v29 }
  0xea   :  { %1255 = vmatprep.subr.mxu0 %v1073_v26  ;;  %1196 = vmatprep.subr.mxu1 %v1059_v55 }
  0xeb   :  { %1256 = vmatpush2.msra.mxu0 %v1072_v18  ;;  %1197 = vmatpush2.msra.mxu1 %v1058_v16 }
  0xec   :  { %1257 = vmatprep.subr.mxu0 %v1071_v20  ;;  %1198 = vmatprep.subr.mxu1 %v1057_v30  ;;  %v7474_v20 = vsub.s32 0, %v7471_v15 }
  0xed   :  { %1258 = vmatpush2.msra.mxu0 %v1070_v21  ;;  %1199 = vmatpush2.msra.mxu1 %v1056_v31 }
  0xee   :  { %1259 = vmatprep.subr.mxu0 %v1069_v22  ;;  %1200 = vmatprep.subr.mxu1 %v1055_v32  ;;  %v986_v22 = vld [vmem:[%s8477_s2] ss:$4 sm:$0x3] }
  0xef   :  { %1260 = vmatpush2.msra.mxu0 %v1068_v23  ;;  %1201 = vmatpush2.msra.mxu1 %v1054_v33 }
  0xf0   :  { %1261 = vmatprep.subr.mxu0 %v1067_v24  ;;  %1202 = vmatprep.subr.mxu1 %v1053_v34 }
  0xf1   :  { %1262 = vmatpush2.msra.mxu0 %v1066_v25  ;;  %1203 = vmatpush2.msra.mxu1 %v1052_v35 }
  0xf2   :  { %1263 = vmatprep.subr.mxu0 %v1065_v28  ;;  %1204 = vmatprep.subr.mxu1 %v1051_v36  ;;  %v7480_v28 = vsub.s32 1, %v7471_v15 }
  0xf3   :  { %1264 = vmatpush2.msra.mxu0 %v1064_v27  ;;  %1205 = vmatpush2.msra.mxu1 %v1050_v37 }
  0xf4   :  { %1265 = vmatprep.subr.mxu0 %v1063_v47  ;;  %1206 = vmatprep.subr.mxu1 %v1049_v38 }
  0xf5   :  { %1266 = vmatpush2.msra.mxu0 %v1062_v19  ;;  %1207 = vmatpush2.msra.mxu1 %v1048_v39 }
  0xf6   :  { %1267 = vmatprep.subr.mxu0 %v1061_v2  ;;  %1208 = vmatprep.subr.mxu1 %v1047_v41 }
  0xf7   :  { %1268 = vmatpush2.msra.mxu0 %v1060_v29  ;;  %1209 = vmatpush2.msra.mxu1 %v1046_v42 }
  0xf8   :  { %1269 = vmatprep.subr.mxu0 %v1059_v55 }
  0xf9   :  { %1270 = vmatpush2.msra.mxu0 %v1058_v16  ;;  %v7483_v16 = vrot.slane %v986_v22, %v7474_v20 }
  0xfa   :  { %1271 = vmatprep.subr.mxu0 %v1057_v30 }
  0xfb   :  { %1272 = vmatpush2.msra.mxu0 %v1056_v31 }
  0xfc   :  { %1273 = vmatprep.subr.mxu0 %v1055_v32 }
  0xfd   :  { %1274 = vmatpush2.msra.mxu0 %v1054_v33 }
  0xfe   :  { %1275 = vmatprep.subr.mxu0 %v1053_v34 }
  0xff   :  { %1276 = vmatpush2.msra.mxu0 %v1052_v35 }
 0x100   :  { %1277 = vmatprep.subr.mxu0 %v1051_v36  ;;  %v7486_v36 = vrot.slane %v986_v22, %v7480_v28 }
 0x101   :  { %1278 = vmatpush2.msra.mxu0 %v1050_v37 }
 0x102   :  { %1279 = vmatprep.subr.mxu0 %v1049_v38 }
 0x103   :  { %1280 = vmatpush2.msra.mxu0 %v1048_v39 }
 0x104   :  { %1281 = vmatprep.subr.mxu0 %v1047_v41 }
 0x105   :  { %1282 = vmatpush2.msra.mxu0 %v1046_v42 }
 0x15d   :  { %v726_v43 = vpop.f32.mrf.mxu1 }
 0x15f   :  { %v728_v44 = vpop.f32.mrf.mxu1 }
 0x161   :  { %v730_v48 = vpop.f32.mrf.mxu1 }
 0x163   :  { %v732_v51 = vpop.f32.mrf.mxu1 }
 0x165   :  { %v736_v54 = vpop.f32.mrf.mxu1 }
 0x166   :  { %v561_v45 = vpop.f32.mrf.mxu0 }
 0x167   :  { %v738_v58 = vpop.f32.mrf.mxu1  ;;  %v727_v24 = vadd.f32 %v726_v43, %v561_v45 }
 0x168   :  { %v563_v46 = vpop.f32.mrf.mxu0 }
 0x169   :  { %v740_v61 = vpop.f32.mrf.mxu1  ;;  %v729_v29 = vadd.f32 %v728_v44, %v563_v46 }
 0x16a   :  { %v565_v49 = vpop.f32.mrf.mxu0 }
 0x16b   :  { %v742_v1 = vpop.f32.mrf.mxu1  ;;  %v731_v21 = vadd.f32 %v730_v48, %v565_v49 }
 0x16c   :  { %v567_v50 = vpop.f32.mrf.mxu0 }
 0x16d   :  { %v746_v5 = vpop.f32.mrf.mxu1  ;;  %v733_v25 = vadd.f32 %v732_v51, %v567_v50 }
 0x16e   :  { %v571_v53 = vpop.f32.mrf.mxu0 }
 0x16f   :  { %v748_v9 = vpop.f32.mrf.mxu1  ;;  %v737_v27 = vadd.f32 %v736_v54, %v571_v53 }
 0x170   :  { %v573_v56 = vpop.f32.mrf.mxu0 }
 0x171   :  { %v750_v13 = vpop.f32.mrf.mxu1  ;;  %v739_v31 = vadd.f32 %v738_v58, %v573_v56 }
 0x172   :  { %v575_v57 = vpop.f32.mrf.mxu0 }
 0x173   :  { %v752_v26 = vpop.f32.mrf.mxu1  ;;  %v741_v32 = vadd.f32 %v740_v61, %v575_v57 }
 0x174   :  { %v577_v59 = vpop.f32.mrf.mxu0 }
 0x175   :  { %v756_v47 = vpop.f32.mrf.mxu1  ;;  %v743_v37 = vadd.f32 %v742_v1, %v577_v59 }
 0x176   :  { %v581_v60 = vpop.f32.mrf.mxu0 }
 0x177   :  { %v758_v38 = vpop.f32.mrf.mxu1  ;;  %v747_v44 = vadd.f32 %v746_v5, %v581_v60 }
 0x178   :  { %v583_v62 = vpop.f32.mrf.mxu0 }
 0x179   :  { %v749_v51 = vadd.f32 %v748_v9, %v583_v62  ;;  %v760_v58 = vpop.f32.mrf.mxu1 }
 0x17a   :  { %v585_v63 = vpop.f32.mrf.mxu0 }
 0x17b   :  { %v751_v53 = vadd.f32 %v750_v13, %v585_v63 }
 0x17c   :  { %v587_v3 = vpop.f32.mrf.mxu0 }
 0x17d   :  { %v753_v57 = vadd.f32 %v752_v26, %v587_v3 }
 0x17e   :  { %v591_v4 = vpop.f32.mrf.mxu0 }
 0x17f   :  { %v757_v5 = vadd.f32 %v756_v47, %v591_v4 }
 0x180   :  { %v593_v7 = vpop.f32.mrf.mxu0 }
 0x181   :  { %v759_v11 = vadd.f32 %v758_v38, %v593_v7 }
 0x182   :  { %v7467_v8 = vpop.f32.mrf.mxu0 }
 0x183   :  { %v761_v4 = vadd.f32 %v760_v58, %v7467_v8 }
 0x184   :  { %v7469_v10 = vpop.f32.mrf.mxu0 }
 0x186   :  { %v931_v12 = vpop.f32.mrf.mxu0 }
 0x187   :  { %v970_v55 = vadd.f32 %v931_v12, %v727_v24 }
 0x188   :  { %v933_v14 = vpop.f32.mrf.mxu0 }
 0x189   :  { %v971_v35 = vadd.f32 %v933_v14, %v729_v29  ;;  %v7492_v45 = vadd.f32 %v7483_v16, %v970_v55 }
 0x18a   :  { %v935_v17 = vpop.f32.mrf.mxu0 }
 0x18b   :  { %v972_v19 = vadd.f32 %v935_v17, %v731_v21  ;;  %v7501_v54 = vadd.f32 %v7486_v36, %v971_v35  ;;  %v1104_v62 = vmul.f32 %v7492_v45, %v7492_v45 }
 0x18c   :  { %v937_v18 = vpop.f32.mrf.mxu0 }
 0x18d   :  { %v973_v30 = vadd.f32 %v937_v18, %v733_v25  ;;  %v7489_v39 = vadd.f32 %v7483_v16, %v972_v19  ;;  %v1105_v7 = vmul.f32 %v7501_v54, %v7501_v54  ;;  %v762_v19 = vpop.f32.mrf.mxu1 }
 0x18e   :  { %v941_v23 = vpop.f32.mrf.mxu0 }
 0x18f   :  { %v974_v33 = vadd.f32 %v941_v23, %v737_v27  ;;  %v7495_v46 = vadd.f32 %v7486_v36, %v973_v30  ;;  %v1106_v59 = vmul.f32 %v7489_v39, %v7489_v39  ;;  %v1078_v17 = vadd.f32 %v7489_v39, %v7492_v45 }
 0x190   :  { %v943_v2 = vpop.f32.mrf.mxu0 }
 0x191   :  { %v975_v41 = vadd.f32 %v943_v2, %v739_v31  ;;  %v7498_v48 = vadd.f32 %v7483_v16, %v974_v33  ;;  %v1107_v63 = vmul.f32 %v7495_v46, %v7495_v46  ;;  %v1120_v18 = vadd.f32 %v1106_v59, %v1104_v62 }
 0x192   :  { %v945_v34 = vpop.f32.mrf.mxu0  ;;  %v1091_v8 = vadd.f32 %v7495_v46, %v7501_v54 }
 0x193   :  { %v976_v42 = vadd.f32 %v945_v34, %v741_v32  ;;  %v7506_v60 = vadd.f32 %v7486_v36, %v975_v41  ;;  %v1108_v3 = vmul.f32 %v7498_v48, %v7498_v48  ;;  %v1079_v25 = vadd.f32 %v1078_v17, %v7498_v48 }
 0x194   :  { %v947_v43 = vpop.f32.mrf.mxu0  ;;  %v1133_v2 = vadd.f32 %v1107_v63, %v1105_v7 }
 0x195   :  { %v977_v49 = vadd.f32 %v947_v43, %v743_v37  ;;  %v7509_v61 = vadd.f32 %v7483_v16, %v976_v42  ;;  %v1109_v21 = vmul.f32 %v7506_v60, %v7506_v60  ;;  %v1121_v29 = vadd.f32 %v1120_v18, %v1108_v3 }
 0x196   :  { %v951_v50 = vpop.f32.mrf.mxu0  ;;  %v1092_v32 = vadd.f32 %v1091_v8, %v7506_v60 }
 0x197   :  { %v978_v56 = vadd.f32 %v951_v50, %v747_v44  ;;  %v7518_v9 = vadd.f32 %v7486_v36, %v977_v49  ;;  %v1110_v22 = vmul.f32 %v7509_v61, %v7509_v61  ;;  %v1080_v33 = vadd.f32 %v1079_v25, %v7509_v61 }
 0x198   :  { %v953_v1 = vpop.f32.mrf.mxu0  ;;  %v1134_v37 = vadd.f32 %v1133_v2, %v1109_v21  ;;  %v763_v44 = vadd.f32 %v762_v19, %v7469_v10 }
 0x199   :  { %v7521_v12 = vadd.f32 %v7483_v16, %v978_v56  ;;  %v979_v13 = vadd.f32 %v953_v1, %v749_v51  ;;  %v1111_v55 = vmul.f32 %v7518_v9, %v7518_v9  ;;  %v1122_v38 = vadd.f32 %v1121_v29, %v1110_v22 }
 0x19a   :  { %v955_v14 = vpop.f32.mrf.mxu0  ;;  %v1093_v49 = vadd.f32 %v1092_v32, %v7518_v9 }
 0x19b   :  { %v980_v26 = vadd.f32 %v955_v14, %v751_v53  ;;  %v7533_v23 = vadd.f32 %v7486_v36, %v979_v13  ;;  %v1112_v30 = vmul.f32 %v7521_v12, %v7521_v12  ;;  %v1081_v50 = vadd.f32 %v1080_v33, %v7521_v12 }
 0x19c   :  { %v957_v24 = vpop.f32.mrf.mxu0  ;;  %v1135_v53 = vadd.f32 %v1134_v37, %v1111_v55 }
 0x19d   :  { %v7539_v27 = vadd.f32 %v7483_v16, %v980_v26  ;;  %v981_v47 = vadd.f32 %v957_v24, %v753_v57  ;;  %v1113_v41 = vmul.f32 %v7533_v23, %v7533_v23  ;;  %v1123_v56 = vadd.f32 %v1122_v38, %v1112_v30 }
 0x19e   :  { %v961_v31 = vpop.f32.mrf.mxu0  ;;  %v1094_v1 = vadd.f32 %v1093_v49, %v7533_v23 }
 0x19f   :  { %v7548_v34 = vadd.f32 %v7486_v36, %v981_v47  ;;  %v982_v35 = vadd.f32 %v961_v31, %v757_v5  ;;  %v1114_v42 = vmul.f32 %v7539_v27, %v7539_v27  ;;  %v1082_v5 = vadd.f32 %v1081_v50, %v7539_v27 }
 0x1a0   :  { %v963_v43 = vpop.f32.mrf.mxu0  ;;  %v1136_v63 = vadd.f32 %v1135_v53, %v1113_v41 }
 0x1a1   :  { %v7558_v51 = vadd.f32 %v7483_v16, %v982_v35  ;;  %v1115_v57 = vmul.f32 %v7548_v34, %v7548_v34  ;;  %v983_v58 = vadd.f32 %v963_v43, %v759_v11  ;;  %v1124_v3 = vadd.f32 %v1123_v56, %v1114_v42 }
 0x1a2   :  { %v965_v59 = vpop.f32.mrf.mxu0  ;;  %v1095_v7 = vadd.f32 %v1094_v1, %v7548_v34 }
 0x1a3   :  { %v1116_v10 = vmul.f32 %v7558_v51, %v7558_v51  ;;  %v984_v62 = vadd.f32 %v965_v59, %v761_v4  ;;  %v7567_v13 = vadd.f32 %v7486_v36, %v983_v58  ;;  %v1083_v17 = vadd.f32 %v1082_v5, %v7558_v51 }
 0x1a4   :  { %v967_v14 = vpop.f32.mrf.mxu0  ;;  %v1137_v18 = vadd.f32 %v1136_v63, %v1115_v57  ;;  %v1759_v63 = vld [vmem:[#allocation8 + $0xf8] sm:$0xff] }
 0x1a5   :  { %v7572_v11 = vadd.f32 %v7483_v16, %v984_v62  ;;  %v985_v26 = vadd.f32 %v967_v14, %v763_v44  ;;  %v1125_v21 = vadd.f32 %v1124_v3, %v1116_v10  ;;  %v1117_v22 = vmul.f32 %v7567_v13, %v7567_v13  ;;  %v2236_v3 = vld [vmem:[#allocation8 + $0x1f8] sm:$0xff]  ;;  %6064 = vmatprep.subr.mxu1 %v1759_v63  ;;  %v2226_v63 = vld [vmem:[#allocation8 + $0x1a8] sm:$0xff] }
 0x1a6   :  { %v1096_v4 = vadd.f32 %v1095_v7, %v7567_v13  ;;  %6108 = vmatprep.subr.mxu0 %v2236_v3  ;;  %v1743_v14 = vld [vmem:[#allocation8 + $0x78] sm:$0xff]  ;;  %v1733_v3 = vld [vmem:[#allocation8 + $0x28] sm:$0xff] }
 0x1a7   :  { %v1084_v24 = vadd.f32 %v1083_v17, %v7572_v11  ;;  %v1118_v8 = vmul.f32 %v7572_v11, %v7572_v11  ;;  %v7581_v25 = vadd.f32 %v7486_v36, %v985_v26  ;;  %v1138_v47 = vadd.f32 %v1137_v18, %v1117_v22  ;;  %v2220_v7 = vld [vmem:[#allocation8 + $0x178] sm:$0xff]  ;;  %v1758_v17 = vld [vmem:[#allocation8 + $0xf0] sm:$0xff]  ;;  %v1757_v22 = vld [vmem:[#allocation8 + $0xe8] sm:$0xff] }
 0x1a8   :  { %v2235_v26 = vld [vmem:[#allocation8 + $0x1f0] sm:$0xff] }
 0x1a9   :  { %v1085_v19 = vrot.slane %v1084_v24, 4  ;;  %v1126_v16 = vadd.f32 %v1125_v21, %v1118_v8  ;;  %v1097_v2 = vadd.f32 %v1096_v4, %v7581_v25  ;;  %v1119_v29 = vmul.f32 %v7581_v25, %v7581_v25  ;;  %v1742_v18 = vld [vmem:[#allocation8 + $0x70] sm:$0xff]  ;;  %v2234_v4 = vld [vmem:[#allocation8 + $0x1e8] sm:$0xff] }
 0x1aa   :  { %v2219_v21 = vld [vmem:[#allocation8 + $0x170] sm:$0xff]  ;;  %v2218_v8 = vld [vmem:[#allocation8 + $0x168] sm:$0xff] }
 0x1ab   :  { %v1086_v55 = vadd.f32 %v1085_v19, %v1084_v24  ;;  %v1127_v30 = vrot.slane %v1126_v16, 4  ;;  %v1098_v31 = vrot.slane %v1097_v2, 4  ;;  %v1139_v32 = vadd.f32 %v1138_v47, %v1119_v29  ;;  %v1741_v24 = vld [vmem:[#allocation8 + $0x68] sm:$0xff]  ;;  %v1756_v47 = vld [vmem:[#allocation8 + $0xe0] sm:$0xff]  ;;  %v1755_v29 = vld [vmem:[#allocation8 + $0xd8] sm:$0xff] }
 0x1ac   :  { %v2233_v19 = vld [vmem:[#allocation8 + $0x1e0] sm:$0xff] }
 0x1ad   :  { %v1087_v33 = vrot.slane %v1086_v55, 2  ;;  %v1128_v35 = vadd.f32 %v1127_v30, %v1126_v16  ;;  %v1099_v37 = vadd.f32 %v1098_v31, %v1097_v2  ;;  %v1140_v38 = vrot.slane %v1139_v32, 4  ;;  %v1740_v16 = vld [vmem:[#allocation8 + $0x60] sm:$0xff]  ;;  %v1739_v30 = vld [vmem:[#allocation8 + $0x58] sm:$0xff] }
 0x1ae   :  { %v2217_v2 = vld [vmem:[#allocation8 + $0x160] sm:$0xff]  ;;  %v2216_v31 = vld [vmem:[#allocation8 + $0x158] sm:$0xff] }
 0x1af   :  { %v1088_v41 = vadd.f32 %v1087_v33, %v1086_v55  ;;  %v1129_v42 = vrot.slane %v1128_v35, 2  ;;  %v1100_v36 = vrot.slane %v1099_v37, 2  ;;  %v1141_v43 = vadd.f32 %v1140_v38, %v1139_v32  ;;  %v2232_v55 = vld [vmem:[#allocation8 + $0x1d8] sm:$0xff]  ;;  %v1754_v32 = vld [vmem:[#allocation8 + $0xd0] sm:$0xff]  ;;  %v1753_v38 = vld [vmem:[#allocation8 + $0xc8] sm:$0xff] }
 0x1b0   :  { %v2231_v33 = vld [vmem:[#allocation8 + $0x1d0] sm:$0xff] }
 0x1b1   :  { %v1130_v44 = vadd.f32 %v1129_v42, %v1128_v35  ;;  %v1101_v49 = vadd.f32 %v1100_v36, %v1099_v37  ;;  %v1142_v50 = vrot.slane %v1141_v43, 2  ;;  %v1089_v53 = vrot.slane %v1088_v41, 1  ;;  %v1738_v35 = vld [vmem:[#allocation8 + $0x50] sm:$0xff]  ;;  %v1737_v42 = vld [vmem:[#allocation8 + $0x48] sm:$0xff] }
 0x1b2   :  { %v2215_v37 = vld [vmem:[#allocation8 + $0x150] sm:$0xff]  ;;  %v2214_v36 = vld [vmem:[#allocation8 + $0x148] sm:$0xff] }
 0x1b3   :  { %v1102_v56 = vrot.slane %v1101_v49, 1  ;;  %v1143_v57 = vadd.f32 %v1142_v50, %v1141_v43  ;;  %v1131_v58 = vrot.slane %v1130_v44, 1  ;;  %v1090_v5 = vadd.f32 %v1089_v53, %v1088_v41  ;;  %v2230_v41 = vld [vmem:[#allocation8 + $0x1c8] sm:$0xff]  ;;  %v1752_v43 = vld [vmem:[#allocation8 + $0xc0] sm:$0xff]  ;;  %v1751_v53 = vld [vmem:[#allocation8 + $0xb8] sm:$0xff] }
 0x1b4   :  { %v2213_v50 = vld [vmem:[#allocation8 + $0x140] sm:$0xff] }
 0x1b5   :  { %v1103_v59 = vadd.f32 %v1102_v56, %v1101_v49  ;;  %v1144_v1 = vrot.slane %v1143_v57, 1  ;;  %v1132_v62 = vadd.f32 %v1131_v58, %v1130_v44  ;;  %v2229_v44 = vld [vmem:[#allocation8 + $0x1c0] sm:$0xff]  ;;  %v2228_v56 = vld [vmem:[#allocation8 + $0x1b8] sm:$0xff] }
 0x1b6   :  { %v1736_v49 = vld [vmem:[#allocation8 + $0x40] sm:$0xff]  ;;  %v2212_v58 = vld [vmem:[#allocation8 + $0x138] sm:$0xff] }
 0x1b7   :  { %1210 = vmatprep.mubr.f32.mxu1 %v1103_v59  ;;  %v1145_v10 = vadd.f32 %v1144_v1, %v1143_v57  ;;  %v1735_v57 = vld [vmem:[#allocation8 + $0x38] sm:$0xff]  ;;  %v1750_v59 = vld [vmem:[#allocation8 + $0xb0] sm:$0xff] }
 0x1b8   :  { %1211 = vmatmul.mubr.f32.vlgmr.msra.gmra.mxu1 %v1090_v5  ;;  %v2227_v1 = vld [vmem:[#allocation8 + $0x1b0] sm:$0xff] }
 0x1b9   :  { %1283 = vmatprep.mubr.f32.mxu0 %v1145_v10  ;;  %6065 = vmatpush3.msra.mxu1 %v1743_v14  ;;  %v1734_v5 = vld [vmem:[#allocation8 + $0x30] sm:$0xff]  ;;  %v2210_v14 = vld [vmem:[#allocation8 + $0x128] sm:$0xff] }
 0x1ba   :  { %1284 = vmatmul.mubr.f32.vlgmr.msra.gmra.mxu0 %v1132_v62  ;;  %6066 = vmatprep.subr.mxu1 %v1758_v17  ;;  %v2211_v10 = vld [vmem:[#allocation8 + $0x130] sm:$0xff]  ;;  %v1749_v62 = vld [vmem:[#allocation8 + $0xa8] sm:$0xff]  ;;  %v2225_v17 = vld [vmem:[#allocation8 + $0x1a0] sm:$0xff] }
 0x1bb   :  { %6109 = vmatpush3.msra.mxu0 %v2220_v7  ;;  %6067 = vmatpush3.msra.mxu1 %v1742_v18  ;;  %v1748_v7 = vld [vmem:[#allocation8 + $0xa0] sm:$0xff] }
 0x1bc   :  { %6110 = vmatprep.subr.mxu0 %v2235_v26  ;;  %6068 = vmatprep.subr.mxu1 %v1757_v22  ;;  %v1732_v26 = vld [vmem:[#allocation8 + $0x20] sm:$0xff]  ;;  %v2224_v22 = vld [vmem:[#allocation8 + $0x198] sm:$0xff] }
 0x1bd   :  { %6111 = vmatpush3.msra.mxu0 %v2219_v21  ;;  %6069 = vmatpush3.msra.mxu1 %v1741_v24  ;;  %v2209_v18 = vld [vmem:[#allocation8 + $0x120] sm:$0xff]  ;;  %v1747_v21 = vld [vmem:[#allocation8 + $0x98] sm:$0xff] }
 0x1be   :  { %6112 = vmatprep.subr.mxu0 %v2234_v4  ;;  %6070 = vmatprep.subr.mxu1 %v1756_v47  ;;  %v1731_v4 = vld [vmem:[#allocation8 + $0x18] sm:$0xff]  ;;  %v2223_v47 = vld [vmem:[#allocation8 + $0x190] sm:$0xff] }
 0x1bf   :  { %6113 = vmatpush3.msra.mxu0 %v2218_v8  ;;  %6071 = vmatpush3.msra.mxu1 %v1740_v16  ;;  %v2208_v24 = vld [vmem:[#allocation8 + $0x118] sm:$0xff]  ;;  %v1746_v8 = vld [vmem:[#allocation8 + $0x90] sm:$0xff] }
 0x1c0   :  { %6114 = vmatprep.subr.mxu0 %v2233_v19  ;;  %6072 = vmatprep.subr.mxu1 %v1755_v29  ;;  %v1730_v19 = vld [vmem:[#allocation8 + $0x10] sm:$0xff]  ;;  %v2222_v29 = vld [vmem:[#allocation8 + $0x188] sm:$0xff] }
 0x1c1   :  { %6115 = vmatpush3.msra.mxu0 %v2217_v2  ;;  %6073 = vmatpush3.msra.mxu1 %v1739_v30  ;;  %v2207_v16 = vld [vmem:[#allocation8 + $0x110] sm:$0xff]  ;;  %v1745_v2 = vld [vmem:[#allocation8 + $0x88] sm:$0xff] }
 0x1c2   :  { %6116 = vmatprep.subr.mxu0 %v2232_v55  ;;  %6074 = vmatprep.subr.mxu1 %v1754_v32  ;;  %v1729_v55 = vld [vmem:[#allocation8 + $0x8] sm:$0xff]  ;;  %v2221_v32 = vld [vmem:[#allocation8 + $0x180] sm:$0xff] }
 0x1c3   :  { %6117 = vmatpush3.msra.mxu0 %v2216_v31  ;;  %6075 = vmatpush3.msra.mxu1 %v1738_v35  ;;  %v2206_v30 = vld [vmem:[#allocation8 + $0x108] sm:$0xff]  ;;  %v1744_v31 = vld [vmem:[#allocation8 + $0x80] sm:$0xff] }
 0x1c4   :  { %6118 = vmatprep.subr.mxu0 %v2231_v33  ;;  %6076 = vmatprep.subr.mxu1 %v1753_v38  ;;  %v1728_v33 = vld [vmem:[#allocation8] sm:$0xff] }
 0x1c5   :  { %6119 = vmatpush3.msra.mxu0 %v2215_v37  ;;  %6077 = vmatpush3.msra.mxu1 %v1737_v42  ;;  %v2205_v35 = vld [vmem:[#allocation8 + $0x100] sm:$0xff] }
 0x1c6   :  { %6120 = vmatprep.subr.mxu0 %v2230_v41  ;;  %6078 = vmatprep.subr.mxu1 %v1752_v43 }
 0x1c7   :  { %6121 = vmatpush3.msra.mxu0 %v2214_v36  ;;  %6079 = vmatpush3.msra.mxu1 %v1736_v49 }
 0x1c8   :  { %6122 = vmatprep.subr.mxu0 %v2229_v44  ;;  %6080 = vmatprep.subr.mxu1 %v1751_v53 }
 0x1c9   :  { %6123 = vmatpush3.msra.mxu0 %v2213_v50  ;;  %6081 = vmatpush3.msra.mxu1 %v1735_v57 }
 0x1ca   :  { %6124 = vmatprep.subr.mxu0 %v2228_v56  ;;  %6082 = vmatprep.subr.mxu1 %v1750_v59 }
 0x1cb   :  { %6125 = vmatpush3.msra.mxu0 %v2212_v58  ;;  %6083 = vmatpush3.msra.mxu1 %v1734_v5  ;;  %v6944_v5 = vmov 1983009808  }
 0x1cc   :  { %6126 = vmatprep.subr.mxu0 %v2227_v1  ;;  %6084 = vmatprep.subr.mxu1 %v1749_v62 }
 0x1cd   :  { %6127 = vmatpush3.msra.mxu0 %v2211_v10  ;;  %6085 = vmatpush3.msra.mxu1 %v1733_v3  ;;  %v1427_v10 = vunpack.c.l.s4 %v6944_v5 }
 0x1ce   :  { %6128 = vmatprep.subr.mxu0 %v2226_v63  ;;  %6086 = vmatprep.subr.mxu1 %v1748_v7 }
 0x1cf   :  { %6129 = vmatpush3.msra.mxu0 %v2210_v14  ;;  %6087 = vmatpush3.msra.mxu1 %v1732_v26  ;;  %v1428_v3 = vunpack.c.0.s8 %v1427_v10  ;;  %v5766_v14 = vld [vmem:[%s8477_s2 + $0x1] ss:$4 sm:$0x3]  ;;  %v7595_v26 = vsub.s32 2, %v7471_v15 }
 0x1d0   :  { %6130 = vmatprep.subr.mxu0 %v2225_v17  ;;  %6088 = vmatprep.subr.mxu1 %v1747_v21  ;;  %v5767_v17 = vld [vmem:[%s8477_s2 + $0x2] ss:$4 sm:$0x3]  ;;  %v1328_v21 = vrot.slane %v5766_v14, %v7474_v20 }
 0x1d1   :  { %6131 = vmatpush3.msra.mxu0 %v2209_v18  ;;  %6089 = vmatpush3.msra.mxu1 %v1731_v4  ;;  %v1332_v4 = vrot.slane %v5766_v14, %v7480_v28 }
 0x1d2   :  { %6132 = vmatprep.subr.mxu0 %v2224_v22  ;;  %6090 = vmatprep.subr.mxu1 %v1746_v8  ;;  %v7600_v22 = vsub.s32 %v1428_v3, %v7471_v15  ;;  %v7607_v8 = vrot.slane %v5767_v17, %v7480_v28 }
 0x1d3   :  { %6133 = vmatpush3.msra.mxu0 %v2208_v24  ;;  %6091 = vmatpush3.msra.mxu1 %v1730_v19  ;;  %v7604_v24 = vrot.slane %v5767_v17, %v7474_v20 }
 0x1d4   :  { %6134 = vmatprep.subr.mxu0 %v2223_v47  ;;  %6092 = vmatprep.subr.mxu1 %v1745_v2 }
 0x1d5   :  { %6135 = vmatpush3.msra.mxu0 %v2207_v16  ;;  %6093 = vmatpush3.msra.mxu1 %v1729_v55 }
 0x1d6   :  { %6136 = vmatprep.subr.mxu0 %v2222_v29  ;;  %6094 = vmatprep.subr.mxu1 %v1744_v31 }
 0x1d7   :  { %6137 = vmatpush3.msra.mxu0 %v2206_v30  ;;  %6095 = vmatpush3.msra.mxu1 %v1728_v33 }
 0x1d8   :  { %6138 = vmatprep.subr.mxu0 %v2221_v32 }
 0x1d9   :  { %6139 = vmatpush3.msra.mxu0 %v2205_v35 }
 0x278   :  { %v1212_v37 = vpop.f32.mrf.mxu1 }
 0x279   :  { %v1217_v38 = vmul.f32 0.00048828125, %v1212_v37 }
 0x27a   :  { %v1214_v41 = vpop.f32.mrf.mxu1  ;;  %v1285_v42 = vpop.f32.mrf.mxu0 }
 0x27b   :  { %v1292_v36 = vmul.f32 %v1217_v38, %v1217_v38  ;;  %v1218_v43 = vmul.f32 0.00048828125, %v1214_v41  ;;  %v1290_v44 = vmul.f32 0.00048828125, %v1285_v42  ;;  %v1303_v63 = vrot.slane %v1217_v38, %v7474_v20 }
 0x27c   :  { %v1287_v49 = vpop.f32.mrf.mxu0 }
 0x27d   :  { %v1293_v50 = vmul.f32 %v1218_v43, %v1218_v43  ;;  %v1294_v53 = vsub.f32 %v1290_v44, %v1292_v36  ;;  %v1291_v56 = vmul.f32 0.00048828125, %v1287_v49  ;;  %v1307_v7 = vrot.slane %v1218_v43, %v7474_v20 }
 0x27e   :  { %v1308_v18 = vsub.f32 %v7492_v45, %v1303_v63  ;;  %v1310_v19 = vsub.f32 %v7489_v39, %v1303_v63  ;;  %v1312_v45 = vsub.f32 %v7498_v48, %v1303_v63  ;;  %v1314_v15 = vsub.f32 %v7509_v61, %v1303_v63 }
 0x27f   :  { %v1296_v57 = vmax.f32 %v1294_v53, 0.0  ;;  %v1295_v58 = vsub.f32 %v1291_v56, %v1293_v50  ;;  %v1309_v47 = vsub.f32 %v7501_v54, %v1307_v7  ;;  %v1311_v16 = vsub.f32 %v7495_v46, %v1307_v7 }
 0x280   :  { %v1313_v2 = vsub.f32 %v7506_v60, %v1307_v7  ;;  %v1315_v29 = vsub.f32 %v7518_v9, %v1307_v7  ;;  %v1316_v55 = vsub.f32 %v7521_v12, %v1303_v63  ;;  %v1335_v30 = vmul.f32 %v1328_v21, %v1308_v18 }
 0x281   :  { %v1351_v59 = vadd.f32 1e-05, %v1296_v57  ;;  %v1297_v1 = vmax.f32 %v1295_v58, 0.0  ;;  %v1317_v31 = vsub.f32 %v7533_v23, %v1307_v7  ;;  %v1318_v32 = vsub.f32 %v7539_v27, %v1303_v63 }
 0x282   :  { %v1319_v54 = vsub.f32 %v7548_v34, %v1307_v7  ;;  %v1320_v39 = vsub.f32 %v7558_v51, %v1303_v63  ;;  %v1321_v46 = vsub.f32 %v7567_v13, %v1307_v7  ;;  %v1322_v48 = vsub.f32 %v7572_v11, %v1303_v63 }
 0x283   :  { %6681 = vrsqrt.f32 %v1351_v59  ;;  %v1352_v62 = vadd.f32 1e-05, %v1297_v1  ;;  %v1323_v60 = vsub.f32 %v7581_v25, %v1307_v7  ;;  %v1336_v61 = vmul.f32 %v1332_v4, %v1309_v47 }
 0x284   :  { %v1337_v33 = vmul.f32 %v1328_v21, %v1310_v19  ;;  %v1338_v9 = vmul.f32 %v1332_v4, %v1311_v16  ;;  %v1339_v35 = vmul.f32 %v1328_v21, %v1312_v45  ;;  %v1340_v37 = vmul.f32 %v1332_v4, %v1313_v2 }
 0x285   :  { %6683 = vrsqrt.f32 %v1352_v62  ;;  %v1341_v38 = vmul.f32 %v1328_v21, %v1314_v15  ;;  %v1342_v23 = vmul.f32 %v1332_v4, %v1315_v29  ;;  %v1343_v41 = vmul.f32 %v1328_v21, %v1316_v55 }
 0x286   :  { %v1344_v34 = vmul.f32 %v1332_v4, %v1317_v31  ;;  %v1345_v51 = vmul.f32 %v1328_v21, %v1318_v32  ;;  %v1346_v42 = vmul.f32 %v1332_v4, %v1319_v54  ;;  %v1347_v36 = vmul.f32 %v1328_v21, %v1320_v39 }
 0x287   :  { %v7627_v11 = vmul.f32 %v1332_v4, %v1321_v46  ;;  %v7629_v25 = vmul.f32 %v1328_v21, %v1322_v48  ;;  %v7631_v43 = vmul.f32 %v1332_v4, %v1323_v60 }
 0x290   :  { %v6682_v12 = vpop.eup %6681 }
 0x291   :  { %v7625_v27 = vrot.slane %v6682_v12, %v7474_v20 }
 0x292   :  { %v6684_v13 = vpop.eup %6683 }
 0x293   :  { %v7634_v44 = vrot.slane %v6684_v13, %v7474_v20  ;;  %v1363_v49 = vmul.f32 %v7625_v27, %v1335_v30  ;;  %v1365_v50 = vmul.f32 %v7625_v27, %v1337_v33  ;;  %v1367_v53 = vmul.f32 %v7625_v27, %v1339_v35 }
 0x294   :  { %v1369_v56 = vmul.f32 %v7625_v27, %v1341_v38  ;;  %v1371_v57 = vmul.f32 %v7625_v27, %v1343_v41  ;;  %v1373_v58 = vmul.f32 %v7625_v27, %v1345_v51  ;;  %v7643_v59 = vmul.f32 %v7625_v27, %v1347_v36 }
 0x295   :  { %v1364_v1 = vmul.f32 %v7634_v44, %v1336_v61  ;;  %v1366_v5 = vmul.f32 %v7634_v44, %v1338_v9  ;;  %v1392_v10 = vadd.f32 %v7604_v24, %v1363_v49  ;;  %v1394_v62 = vadd.f32 %v7604_v24, %v1365_v50 }
 0x296   :  { %v1368_v63 = vmul.f32 %v7634_v44, %v1340_v37  ;;  %v1370_v3 = vmul.f32 %v7634_v44, %v1342_v23  ;;  %v1396_v14 = vadd.f32 %v7604_v24, %v1367_v53  ;;  %v1398_v7 = vadd.f32 %v7604_v24, %v1369_v56 }
 0x297   :  { %v1393_v17 = vadd.f32 %v7607_v8, %v1364_v1  ;;  %v1395_v18 = vadd.f32 %v7607_v8, %v1366_v5  ;;  %v7656_v21 = vmul.f32 %v7634_v44, %v1344_v34  ;;  %v7659_v4 = vmul.f32 %v7634_v44, %v1346_v42 }
 0x298   :  { %v1397_v47 = vadd.f32 %v7607_v8, %v1368_v63  ;;  %v1399_v19 = vadd.f32 %v7607_v8, %v1370_v3  ;;  %v7664_v16 = vadd.f32 %v7604_v24, %v1371_v57  ;;  %v7667_v45 = vadd.f32 %v7604_v24, %v1373_v58 }
 0x299   :  { %v1424_v2 = vcombine.low %v1392_v10, %v1393_v17  ;;  %v1425_v15 = vcombine.high %v1392_v10, %v1393_v17  ;;  %v1442_v29 = vcombine.low %v1394_v62, %v1395_v18  ;;  %v1443_v55 = vcombine.high %v1394_v62, %v1395_v18 }
 0x29a   :  { %v1460_v30 = vcombine.low %v1396_v14, %v1397_v47  ;;  %v1461_v31 = vcombine.high %v1396_v14, %v1397_v47  ;;  %v1478_v32 = vcombine.low %v1398_v7, %v1399_v19  ;;  %v1479_v54 = vcombine.high %v1398_v7, %v1399_v19 }
 0x29b   :  { %v1432_v39 = vrot.slane %v1424_v2, %v7600_v22  ;;  %v1439_v46 = vrot.slane %v1425_v15, %v7600_v22  ;;  %v1450_v48 = vrot.slane %v1442_v29, %v7600_v22  ;;  %v1457_v60 = vrot.slane %v1443_v55, %v7600_v22 }
 0x29c   :  { %v7674_v61 = vrot.slane %v1460_v30, %v7600_v22  ;;  %v7677_v33 = vrot.slane %v1461_v31, %v7600_v22  ;;  %v7680_v9 = vrot.slane %v1478_v32, %v7600_v22  ;;  %v7683_v35 = vrot.slane %v1479_v54, %v7600_v22 }
 0x29d   :  { %v1440_v12 = vcombine.high %v1432_v39, %v1432_v39  ;;  %v1441_v37 = vcombine.high %v1439_v46, %v1439_v46  ;;  %v1458_v38 = vcombine.high %v1450_v48, %v1450_v48  ;;  %v1459_v23 = vcombine.high %v1457_v60, %v1457_v60 }
 0x29e   :  { %v5768_v41 = vrot.slane %v1432_v39, 9  ;;  %v5770_v34 = vrot.slane %v1439_v46, 9  ;;  %v5772_v51 = vrot.slane %v1450_v48, 9  ;;  %v5774_v42 = vrot.slane %v1457_v60, 9 }
 0x29f   :  { %v5769_v13 = vrot.slane %v1440_v12, 9  ;;  %v5771_v36 = vrot.slane %v1441_v37, 9  ;;  %v5773_v49 = vrot.slane %v1458_v38, 9  ;;  %v5775_v50 = vrot.slane %v1459_v23, 9 }
 0x2a0   :  { %v1696_v53 = vmax.f32 %v1432_v39, %v5768_v41  ;;  %v1698_v56 = vmax.f32 %v1439_v46, %v5770_v34  ;;  %v1700_v57 = vmax.f32 %v1450_v48, %v5772_v51  ;;  %v1702_v58 = vmax.f32 %v1457_v60, %v5774_v42 }
 0x2a1   :  { %v1697_v1 = vmax.f32 %v1440_v12, %v5769_v13  ;;  %v1699_v5 = vmax.f32 %v1441_v37, %v5771_v36  ;;  %v1701_v10 = vmax.f32 %v1458_v38, %v5773_v49  ;;  %v1703_v62 = vmax.f32 %v1459_v23, %v5775_v50 }
 0x2a2   :  { %v1799_v63 = vrot.slane %v1696_v53, %v7595_v26  ;;  %v1815_v3 = vrot.slane %v1698_v56, %v7595_v26  ;;  %v1831_v14 = vrot.slane %v1700_v57, %v7595_v26  ;;  %v1847_v7 = vrot.slane %v1702_v58, %v7595_v26 }
 0x2a3   :  { %v1807_v17 = vrot.slane %v1697_v1, %v7595_v26  ;;  %v1823_v18 = vrot.slane %v1699_v5, %v7595_v26  ;;  %v1839_v47 = vrot.slane %v1701_v10, %v7595_v26  ;;  %v1855_v19 = vrot.slane %v1703_v62, %v7595_v26 }
 0x2a4   :  { %v1795_v2 = vrot.slane %v1696_v53, %v7474_v20  ;;  %v1803_v15 = vrot.slane %v1697_v1, %v7474_v20  ;;  %v1811_v29 = vrot.slane %v1698_v56, %v7474_v20  ;;  %v1819_v55 = vrot.slane %v1699_v5, %v7474_v20 }
 0x2a5   :  { %v2062_v30 = vsel %vm2048_vm0, %v1807_v17, %v1799_v63  ;;  %v1827_v31 = vrot.slane %v1700_v57, %v7474_v20  ;;  %v1835_v32 = vrot.slane %v1701_v10, %v7474_v20  ;;  %v1843_v54 = vrot.slane %v1702_v58, %v7474_v20 }
 0x2a6   :  { %v2063_v39 = vsel %vm2050_vm2, %v1815_v3, %v2062_v30  ;;  %v1851_v46 = vrot.slane %v1703_v62, %v7474_v20  ;;  %v2049_v48 = vsel %vm2048_vm0, %v1803_v15, %v1795_v2  ;;  %v1476_v60 = vcombine.high %v7674_v61, %v7674_v61 }
 0x2a7   :  { %v2064_v12 = vsel %vm2052_vm4, %v1823_v18, %v2063_v39  ;;  %v2051_v37 = vsel %vm2050_vm2, %v1811_v29, %v2049_v48  ;;  %v1477_v38 = vcombine.high %v7677_v33, %v7677_v33  ;;  %v1494_v23 = vcombine.high %v7680_v9, %v7680_v9 }
 0x2a8   :  { %v2065_v41 = vsel %vm2054_vm5, %v1831_v14, %v2064_v12  ;;  %v2053_v34 = vsel %vm2052_vm4, %v1819_v55, %v2051_v37  ;;  %v1495_v51 = vcombine.high %v7683_v35, %v7683_v35  ;;  %v5776_v42 = vrot.slane %v7674_v61, 9 }
 0x2a9   :  { %v2066_v13 = vsel %vm2056_vm6, %v1839_v47, %v2065_v41  ;;  %v2055_v36 = vsel %vm2054_vm5, %v1827_v31, %v2053_v34  ;;  %v5777_v49 = vrot.slane %v1476_v60, 9  ;;  %v5778_v50 = vrot.slane %v7677_v33, 9 }
 0x2aa   :  { %v2067_v53 = vsel %vm2058_vm8, %v1847_v7, %v2066_v13  ;;  %v2057_v56 = vsel %vm2056_vm6, %v1835_v32, %v2055_v36  ;;  %v5779_v57 = vrot.slane %v1477_v38, 9  ;;  %v5780_v58 = vrot.slane %v7680_v9, 9 }
 0x2ab   :  { %v2068_v1 = vsel %vm2060_vm9, %v1855_v19, %v2067_v53  ;;  %v2059_v5 = vsel %vm2058_vm8, %v1843_v54, %v2057_v56  ;;  %v5781_v10 = vrot.slane %v1494_v23, 9  ;;  %v5782_v62 = vrot.slane %v7683_v35, 9 }
 0x2ac   :  { %2183 = vmatprep.mubr.f32.mxu1 %v2068_v1  ;;  %2301 = vmatprep.mubr.f32.mxu0 %v2068_v1  ;;  %v2061_v63 = vsel %vm2060_vm9, %v1851_v46, %v2059_v5  ;;  %v5783_v3 = vrot.slane %v1495_v51, 9  ;;  %v1704_v14 = vmax.f32 %v7674_v61, %v5776_v42  ;;  %v1705_v7 = vmax.f32 %v1476_v60, %v5777_v49 }
 0x2ad   :  { %2184 = vmatmul.mubr.f32.vlgmr.msra.gmra.mxu1 %v2061_v63  ;;  %2302 = vmatmul.mubr.f32.vlgmr.msra.gmra.mxu0 %v2061_v63  ;;  %v1706_v17 = vmax.f32 %v7677_v33, %v5778_v50  ;;  %v1707_v18 = vmax.f32 %v1477_v38, %v5779_v57  ;;  %v1708_v47 = vmax.f32 %v7680_v9, %v5780_v58 }
 0x2ae   :  { %v1709_v19 = vmax.f32 %v1494_v23, %v5781_v10  ;;  %v1710_v2 = vmax.f32 %v7683_v35, %v5782_v62  ;;  %v1711_v15 = vmax.f32 %v1495_v51, %v5783_v3  ;;  %v1863_v29 = vrot.slane %v1704_v14, %v7595_v26 }
 0x2af   :  { %v1871_v55 = vrot.slane %v1705_v7, %v7595_v26  ;;  %v1879_v30 = vrot.slane %v1706_v17, %v7595_v26  ;;  %v1887_v61 = vrot.slane %v1707_v18, %v7595_v26  ;;  %v1895_v31 = vrot.slane %v1708_v47, %v7595_v26 }
 0x2b0   :  { %v1903_v32 = vrot.slane %v1709_v19, %v7595_v26  ;;  %v1911_v33 = vrot.slane %v1710_v2, %v7595_v26  ;;  %v1919_v9 = vrot.slane %v1711_v15, %v7595_v26  ;;  %v1859_v54 = vrot.slane %v1704_v14, %v7474_v20 }
 0x2b1   :  { %v2076_v35 = vsel %vm2048_vm0, %v1871_v55, %v1863_v29  ;;  %v1867_v39 = vrot.slane %v1705_v7, %v7474_v20  ;;  %v1875_v46 = vrot.slane %v1706_v17, %v7474_v20  ;;  %v1883_v48 = vrot.slane %v1707_v18, %v7474_v20 }
 0x2b2   :  { %v2077_v60 = vsel %vm2050_vm2, %v1879_v30, %v2076_v35  ;;  %v1891_v12 = vrot.slane %v1708_v47, %v7474_v20  ;;  %v1899_v37 = vrot.slane %v1709_v19, %v7474_v20  ;;  %v1907_v38 = vrot.slane %v1710_v2, %v7474_v20 }
 0x2b3   :  { %v2078_v23 = vsel %vm2052_vm4, %v1887_v61, %v2077_v60  ;;  %v1915_v41 = vrot.slane %v1711_v15, %v7474_v20  ;;  %v2069_v34 = vsel %vm2048_vm0, %v1867_v39, %v1859_v54  ;;  %v1401_v51 = vadd.f32 %v7607_v8, %v7656_v21 }
 0x2b4   :  { %v2079_v42 = vsel %vm2054_vm5, %v1895_v31, %v2078_v23  ;;  %v2070_v13 = vsel %vm2050_vm2, %v1875_v46, %v2069_v34  ;;  %v1403_v36 = vadd.f32 %v7607_v8, %v7659_v4  ;;  %v7759_v49 = vmul.f32 %v7634_v44, %v7627_v11 }
 0x2b5   :  { %v2080_v50 = vsel %vm2056_vm6, %v1903_v32, %v2079_v42  ;;  %v2071_v53 = vsel %vm2052_vm4, %v1883_v48, %v2070_v13  ;;  %v1496_v56 = vcombine.low %v7664_v16, %v1401_v51  ;;  %v1497_v57 = vcombine.high %v7664_v16, %v1401_v51 }
 0x2b6   :  { %v2081_v21 = vsel %vm2058_vm8, %v1911_v33, %v2080_v50  ;;  %v2072_v58 = vsel %vm2054_vm5, %v1891_v12, %v2071_v53  ;;  %v1514_v1 = vcombine.low %v7667_v45, %v1403_v36  ;;  %v1515_v4 = vcombine.high %v7667_v45, %v1403_v36 }
 0x2b7   :  { %v2082_v5 = vsel %vm2060_vm9, %v1919_v9, %v2081_v21  ;;  %v2073_v11 = vsel %vm2056_vm6, %v1899_v37, %v2072_v58  ;;  %v1504_v10 = vrot.slane %v1496_v56, %v7600_v22  ;;  %v1511_v62 = vrot.slane %v1497_v57, %v7600_v22 }
 0x2b8   :  { %2188 = vmatprep.mubr.f32.mxu1 %v2082_v5  ;;  %2306 = vmatprep.mubr.f32.mxu0 %v2082_v5  ;;  %v2074_v16 = vsel %vm2058_vm8, %v1907_v38, %v2073_v11  ;;  %v1522_v63 = vrot.slane %v1514_v1, %v7600_v22  ;;  %v1529_v3 = vrot.slane %v1515_v4, %v7600_v22 }
 0x2b9   :  { %v2075_v14 = vsel %vm2060_vm9, %v1915_v41, %v2074_v16  ;;  %v1512_v7 = vcombine.high %v1504_v10, %v1504_v10  ;;  %v1513_v45 = vcombine.high %v1511_v62, %v1511_v62  ;;  %v5784_v17 = vrot.slane %v1504_v10, 9 }
 0x2ba   :  { %2189 = vmatmul.mubr.f32.gmra.mxu1 %v2075_v14  ;;  %2307 = vmatmul.mubr.f32.gmra.mxu0 %v2075_v14  ;;  %v1530_v18 = vcombine.high %v1522_v63, %v1522_v63  ;;  %v1531_v47 = vcombine.high %v1529_v3, %v1529_v3  ;;  %v5786_v19 = vrot.slane %v1511_v62, 9  ;;  %v5788_v2 = vrot.slane %v1522_v63, 9 }
 0x2bb   :  { %v5785_v15 = vrot.slane %v1512_v7, 9  ;;  %v5787_v29 = vrot.slane %v1513_v45, 9  ;;  %v5790_v55 = vrot.slane %v1529_v3, 9  ;;  %v1712_v30 = vmax.f32 %v1504_v10, %v5784_v17 }
 0x2bc   :  { %v5789_v61 = vrot.slane %v1530_v18, 9  ;;  %v5791_v31 = vrot.slane %v1531_v47, 9  ;;  %v1714_v32 = vmax.f32 %v1511_v62, %v5786_v19  ;;  %v1716_v33 = vmax.f32 %v1522_v63, %v5788_v2 }
 0x2bd   :  { %v1713_v9 = vmax.f32 %v1512_v7, %v5785_v15  ;;  %v1715_v54 = vmax.f32 %v1513_v45, %v5787_v29  ;;  %v1718_v35 = vmax.f32 %v1529_v3, %v5790_v55  ;;  %v1927_v39 = vrot.slane %v1712_v30, %v7595_v26 }
 0x2be   :  { %v1717_v46 = vmax.f32 %v1530_v18, %v5789_v61  ;;  %v1719_v48 = vmax.f32 %v1531_v47, %v5791_v31  ;;  %v1943_v60 = vrot.slane %v1714_v32, %v7595_v26  ;;  %v1959_v12 = vrot.slane %v1716_v33, %v7595_v26 }
 0x2bf   :  { %v1935_v37 = vrot.slane %v1713_v9, %v7595_v26  ;;  %v1951_v38 = vrot.slane %v1715_v54, %v7595_v26  ;;  %v1975_v23 = vrot.slane %v1718_v35, %v7595_v26  ;;  %v1923_v41 = vrot.slane %v1712_v30, %v7474_v20 }
 0x2c0   :  { %v1967_v34 = vrot.slane %v1717_v46, %v7595_v26  ;;  %v1983_v51 = vrot.slane %v1719_v48, %v7595_v26  ;;  %v1931_v42 = vrot.slane %v1713_v9, %v7474_v20  ;;  %v1939_v13 = vrot.slane %v1714_v32, %v7474_v20 }
 0x2c1   :  { %v2090_v36 = vsel %vm2048_vm0, %v1935_v37, %v1927_v39  ;;  %v1947_v50 = vrot.slane %v1715_v54, %v7474_v20  ;;  %v1955_v53 = vrot.slane %v1716_v33, %v7474_v20  ;;  %v1963_v56 = vrot.slane %v1717_v46, %v7474_v20 }
 0x2c2   :  { %v2091_v57 = vsel %vm2050_vm2, %v1943_v60, %v2090_v36  ;;  %v1971_v21 = vrot.slane %v1718_v35, %v7474_v20  ;;  %v1979_v58 = vrot.slane %v1719_v48, %v7474_v20  ;;  %v2083_v1 = vsel %vm2048_vm0, %v1931_v42, %v1923_v41 }
 0x2c3   :  { %v2092_v4 = vsel %vm2052_vm4, %v1951_v38, %v2091_v57  ;;  %v2084_v5 = vsel %vm2050_vm2, %v1939_v13, %v2083_v1  ;;  %v1377_v11 = vmul.f32 %v7625_v27, %v7629_v25  ;;  %v1378_v10 = vmul.f32 %v7634_v44, %v7631_v43 }
 0x2c4   :  { %v2093_v62 = vsel %vm2054_vm5, %v1959_v12, %v2092_v4  ;;  %v2085_v16 = vsel %vm2052_vm4, %v1947_v50, %v2084_v5  ;;  %v1404_v63 = vadd.f32 %v7604_v24, %v7643_v59  ;;  %v1405_v3 = vadd.f32 %v7607_v8, %v7759_v49 }
 0x2c5   :  { %v2094_v14 = vsel %vm2056_vm6, %v1967_v34, %v2093_v62  ;;  %v2086_v7 = vsel %vm2054_vm5, %v1955_v53, %v2085_v16  ;;  %v1406_v45 = vadd.f32 %v7604_v24, %v1377_v11  ;;  %v1407_v27 = vadd.f32 %v7607_v8, %v1378_v10 }
 0x2c6   :  { %v2095_v25 = vsel %vm2058_vm8, %v1975_v23, %v2094_v14  ;;  %v2087_v43 = vsel %vm2056_vm6, %v1963_v56, %v2086_v7  ;;  %v1532_v44 = vcombine.low %v1404_v63, %v1405_v3  ;;  %v1533_v17 = vcombine.high %v1404_v63, %v1405_v3 }
 0x2c7   :  { %v2096_v18 = vsel %vm2060_vm9, %v1983_v51, %v2095_v25  ;;  %v2088_v59 = vsel %vm2058_vm8, %v1971_v21, %v2087_v43  ;;  %v1550_v47 = vcombine.low %v1406_v45, %v1407_v27  ;;  %v1551_v49 = vcombine.high %v1406_v45, %v1407_v27 }
 0x2c8   :  { %2193 = vmatprep.mubr.f32.mxu1 %v2096_v18  ;;  %2311 = vmatprep.mubr.f32.mxu0 %v2096_v18  ;;  %v2089_v19 = vsel %vm2060_vm9, %v1979_v58, %v2088_v59  ;;  %v1540_v24 = vrot.slane %v1532_v44, %v7600_v22  ;;  %v1547_v8 = vrot.slane %v1533_v17, %v7600_v22 }
 0x2c9   :  { %2194 = vmatmul.mubr.f32.gmra.mxu1 %v2089_v19  ;;  %2312 = vmatmul.mubr.f32.gmra.mxu0 %v2089_v19  ;;  %v1558_v2 = vrot.slane %v1550_v47, %v7600_v22  ;;  %v1565_v15 = vrot.slane %v1551_v49, %v7600_v22  ;;  %v6500_v49 = vld [vmem:[%s8480_s5 + $0x70] ss:$8 sps:$4 sm:$0xff]   ;;  %v6502_v19 = vld [vmem:[%s8480_s5 + $0x74] ss:$8 sps:$4 sm:$0xff]  }
 0x2ca   :  { %v1548_v29 = vcombine.high %v1540_v24, %v1540_v24  ;;  %v1549_v55 = vcombine.high %v1547_v8, %v1547_v8  ;;  %v5792_v30 = vrot.slane %v1540_v24, 9  ;;  %v5794_v61 = vrot.slane %v1547_v8, 9  ;;  %2733 = vmatprep.subr.bf16.mxu0 %v6502_v19 }
 0x2cb   :  { %v1566_v31 = vcombine.high %v1558_v2, %v1558_v2  ;;  %v1567_v32 = vcombine.high %v1565_v15, %v1565_v15  ;;  %v5796_v33 = vrot.slane %v1558_v2, 9  ;;  %v5798_v46 = vrot.slane %v1565_v15, 9  ;;  %2734 = vmatpush1.bf16.msra.mxu0 %v6500_v49 }
 0x2cc   :  { %v5793_v9 = vrot.slane %v1548_v29, 9  ;;  %v5795_v54 = vrot.slane %v1549_v55, 9  ;;  %v1720_v35 = vmax.f32 %v1540_v24, %v5792_v30  ;;  %v1722_v48 = vmax.f32 %v1547_v8, %v5794_v61  ;;  %v2332_v24 = vld [vmem:[#allocation3] sm:$0x1]  ;;  %v2339_v30 = vld [vmem:[#allocation3 + $0x8] sm:$0x1] }
 0x2cd   :  { %v5797_v39 = vrot.slane %v1566_v31, 9  ;;  %v5799_v60 = vrot.slane %v1567_v32, 9  ;;  %v1724_v38 = vmax.f32 %v1558_v2, %v5796_v33  ;;  %v1726_v42 = vmax.f32 %v1565_v15, %v5798_v46  ;;  %v6503_v15 = vld [vmem:[%s8480_s5 + $0x60] ss:$8 sps:$4 sm:$0xff]   ;;  %v6509_v33 = vld [vmem:[%s8480_s5 + $0x50] ss:$8 sps:$4 sm:$0xff]  }
 0x2ce   :  { %v1721_v12 = vmax.f32 %v1548_v29, %v5793_v9  ;;  %v1723_v37 = vmax.f32 %v1549_v55, %v5795_v54  ;;  %v1991_v41 = vrot.slane %v1720_v35, %v7595_v26  ;;  %v2007_v13 = vrot.slane %v1722_v48, %v7595_v26  ;;  %v6505_v29 = vld [vmem:[%s8480_s5 + $0x64] ss:$8 sps:$4 sm:$0xff]   ;;  %v6511_v9 = vld [vmem:[%s8480_s5 + $0x54] ss:$8 sps:$4 sm:$0xff]   ;;  %v6592_v55 = vld [vmem:[#allocation14 + $0xd0] ss:$8 sps:$4 sm:$0xff]  }
 0x2cf   :  { %v1725_v23 = vmax.f32 %v1566_v31, %v5797_v39  ;;  %v1987_v36 = vrot.slane %v1720_v35, %v7474_v20  ;;  %v1727_v50 = vmax.f32 %v1567_v32, %v5799_v60  ;;  %v2003_v57 = vrot.slane %v1722_v48, %v7474_v20  ;;  %2735 = vmatprep.subr.bf16.mxu0 %v6505_v29  ;;  %v6506_v31 = vld [vmem:[%s8480_s5 + $0xf0] ss:$8 sps:$4 sm:$0xff]   ;;  %v6508_v32 = vld [vmem:[%s8480_s5 + $0xf4] ss:$8 sps:$4 sm:$0xff]   ;;  %v6512_v39 = vld [vmem:[%s8480_s5 + $0xe0] ss:$8 sps:$4 sm:$0xff]  }
 0x2d0   :  { %v1999_v34 = vrot.slane %v1721_v12, %v7595_v26  ;;  %v1995_v51 = vrot.slane %v1721_v12, %v7474_v20  ;;  %v2015_v53 = vrot.slane %v1723_v37, %v7595_v26  ;;  %v2023_v21 = vrot.slane %v1724_v38, %v7595_v26  ;;  %2736 = vmatpush1.bf16.msra.mxu0 %v6503_v15  ;;  %v2335_v54 = vld [vmem:[#allocation3 + $0xc] sm:$0x1]  ;;  %v6514_v46 = vld [vmem:[%s8480_s5 + $0xe4] ss:$8 sps:$4 sm:$0xff]   ;;  %v6515_v48 = vld [vmem:[%s8480_s5 + $0x40] ss:$8 sps:$4 sm:$0xff]  }
 0x2d1   :  { %v2011_v1 = vrot.slane %v1723_v37, %v7474_v20  ;;  %v2031_v5 = vrot.slane %v1725_v23, %v7595_v26  ;;  %v2019_v10 = vrot.slane %v1724_v38, %v7474_v20  ;;  %v2039_v16 = vrot.slane %v1726_v42, %v7595_v26  ;;  %2588 = vmatprep.subr.bf16.mxu1 %v6508_v32  ;;  %v6517_v60 = vld [vmem:[%s8480_s5 + $0x44] ss:$8 sps:$4 sm:$0xff]   ;;  %v2342_v12 = vld [vmem:[#allocation3 + $0x14] sm:$0x1]  ;;  %v6518_v38 = vld [vmem:[%s8480_s5 + $0xd0] ss:$8 sps:$4 sm:$0xff]  }
 0x2d2   :  { %v2104_v56 = vsel %vm2048_vm0, %v1999_v34, %v1991_v41  ;;  %v2097_v4 = vsel %vm2048_vm0, %v1995_v51, %v1987_v36  ;;  %v2027_v3 = vrot.slane %v1725_v23, %v7474_v20  ;;  %v2047_v7 = vrot.slane %v1727_v50, %v7595_v26  ;;  %2737 = vmatprep.subr.bf16.mxu0 %v6511_v9  ;;  %v6520_v23 = vld [vmem:[%s8480_s5 + $0xd4] ss:$8 sps:$4 sm:$0xff]   ;;  %v6521_v41 = vld [vmem:[%s8480_s5 + $0x30] ss:$8 sps:$4 sm:$0xff]   ;;  %v6526_v51 = vld [vmem:[%s8480_s5 + $0xc4] ss:$8 sps:$4 sm:$0xff]  }
 0x2d3   :  { %v2105_v58 = vsel %vm2050_vm2, %v2007_v13, %v2104_v56  ;;  %v2098_v62 = vsel %vm2050_vm2, %v2003_v57, %v2097_v4  ;;  %v2035_v27 = vrot.slane %v1726_v42, %v7474_v20  ;;  %v2043_v44 = vrot.slane %v1727_v50, %v7474_v20  ;;  %2589 = vmatpush1.bf16.msra.mxu1 %v6506_v31  ;;  %v6523_v34 = vld [vmem:[%s8480_s5 + $0x34] ss:$8 sps:$4 sm:$0xff]   ;;  %v6529_v42 = vld [vmem:[%s8480_s5 + $0x24] ss:$8 sps:$4 sm:$0xff]   ;;  %v6524_v13 = vld [vmem:[%s8480_s5 + $0xc0] ss:$8 sps:$4 sm:$0xff]  }
 0x2d4   :  { %v2106_v11 = vsel %vm2052_vm4, %v2015_v53, %v2105_v58  ;;  %v2099_v14 = vsel %vm2052_vm4, %v2011_v1, %v2098_v62  ;;  %v2333_v2 = vsel %vm7860_vm11, 0, %v2332_v24  ;;  %v2340_v61 = vsel %vm7873_vm13, 0, %v2339_v30  ;;  %2738 = vmatpush1.bf16.msra.mxu0 %v6509_v33  ;;  %2590 = vmatprep.subr.bf16.mxu1 %v6514_v46  ;;  %v6527_v36 = vld [vmem:[%s8480_s5 + $0x20] ss:$8 sps:$4 sm:$0xff]   ;;  %v6532_v50 = vld [vmem:[%s8480_s5 + $0xb4] ss:$8 sps:$4 sm:$0xff]  }
 0x2d5   :  { %v2107_v63 = vsel %vm2054_vm5, %v2023_v21, %v2106_v11  ;;  %v2100_v25 = vsel %vm2054_vm5, %v2019_v10, %v2099_v14  ;;  %2334 = vst [vmem:[#allocation3] sm:$0x1] %v2333_v2  ;;  %2341 = vst [vmem:[#allocation3 + $0x8] sm:$0x1] %v2340_v61  ;;  %v2336_v35 = vsel %vm7860_vm11, 0, %v2335_v54  ;;  %2739 = vmatprep.subr.bf16.mxu0 %v6517_v60  ;;  %v2343_v37 = vsel %vm7873_vm13, 0, %v2342_v12 }
 0x2d6   :  { %v2108_v45 = vsel %vm2056_vm6, %v2031_v5, %v2107_v63  ;;  %v2101_v17 = vsel %vm2056_vm6, %v2027_v3, %v2100_v25  ;;  %2337 = vst [vmem:[#allocation3 + $0xc] sm:$0x1] %v2336_v35  ;;  %2344 = vst [vmem:[#allocation3 + $0x14] sm:$0x1] %v2343_v37  ;;  %v6535_v53 = vld [vmem:[%s8480_s5 + $0x14] ss:$8 sps:$4 sm:$0xff]  }
 0x2d7   :  { %v2109_v43 = vsel %vm2058_vm8, %v2039_v16, %v2108_v45  ;;  %v2102_v59 = vsel %vm2058_vm8, %v2035_v27, %v2101_v17  ;;  %2591 = vmatpush1.bf16.msra.mxu1 %v6512_v39  ;;  %v6530_v56 = vld [vmem:[%s8480_s5 + $0xb0] ss:$8 sps:$4 sm:$0xff]   ;;  %v6538_v21 = vld [vmem:[%s8480_s5 + $0xa4] ss:$8 sps:$4 sm:$0xff]   ;;  %v6536_v1 = vld [vmem:[%s8480_s5 + $0xa0] ss:$8 sps:$4 sm:$0xff]  }
 0x2d8   :  { %v2110_v18 = vsel %vm2060_vm9, %v2047_v7, %v2109_v43  ;;  %v2103_v47 = vsel %vm2060_vm9, %v2043_v44, %v2102_v59  ;;  %2740 = vmatpush1.bf16.msra.mxu0 %v6515_v48  ;;  %2592 = vmatprep.subr.bf16.mxu1 %v6520_v23  ;;  %v6533_v57 = vld [vmem:[%s8480_s5 + $0x10] ss:$8 sps:$4 sm:$0xff]   ;;  %v6541_v58 = vld [vmem:[%s8480_s5 + $0x4] ss:$8 sps:$4 sm:$0xff]   ;;  %v6539_v4 = vld [vmem:[%s8480_s5] ss:$8 sps:$4 sm:$0xff]  }
 0x2d9   :  { %2198 = vmatprep.mubr.f32.mxu1 %v2110_v18  ;;  %2316 = vmatprep.mubr.f32.mxu0 %v2110_v18  ;;  %v6544_v5 = vld [vmem:[%s8480_s5 + $0x94] ss:$8 sps:$4 sm:$0xff]   ;;  %v6542_v11 = vld [vmem:[%s8480_s5 + $0x90] ss:$8 sps:$4 sm:$0xff]   ;;  %v6548_v10 = vld [vmem:[%s8480_s5 + $0x84] ss:$8 sps:$4 sm:$0xff]  }
 0x2da   :  { %2199 = vmatmul.mubr.f32.gmra.mxu1 %v2103_v47  ;;  %2317 = vmatmul.mubr.f32.gmra.mxu0 %v2103_v47  ;;  %v6546_v62 = vld [vmem:[%s8480_s5 + $0x80] ss:$8 sps:$4 sm:$0xff]   ;;  %v6552_v16 = vld [vmem:[%s8480_s5 + $0x174] ss:$8 sps:$4 sm:$0xff]  }
 0x2db   :  { %2765 = vmatprep.mubr.bf16.mxu0 %v6943_v0  ;;  %2620 = vmatprep.mubr.bf16.mxu1 %v6943_v0 }
 0x2dc   :  { %2741 = vmatprep.subr.bf16.mxu0 %v6523_v34  ;;  %2593 = vmatpush1.bf16.msra.mxu1 %v6518_v38  ;;  %v2399_v24 = vld [vmem:[#allocation3] sm:$0xf]  ;;  %v2403_v46 = vld [vmem:[#allocation3 + $0x8] sm:$0x1] }
 0x2dd   :  { %2742 = vmatpush1.bf16.msra.mxu0 %v6521_v41  ;;  %2594 = vmatprep.subr.bf16.mxu1 %v6526_v51 }
 0x2de   :  { %2743 = vmatprep.subr.bf16.mxu0 %v6529_v42 }
 0x2e0   :  { %2595 = vmatpush1.bf16.msra.mxu1 %v6524_v13 }
 0x2e1   :  { %2744 = vmatpush1.bf16.msra.mxu0 %v6527_v36  ;;  %2596 = vmatprep.subr.bf16.mxu1 %v6532_v50 }
 0x2e2   :  { %2745 = vmatprep.subr.bf16.mxu0 %v6535_v53 }
 0x2e4   :  { %2597 = vmatpush1.bf16.msra.mxu1 %v6530_v56 }
 0x2e5   :  { %2746 = vmatpush1.bf16.msra.mxu0 %v6533_v57  ;;  %2598 = vmatprep.subr.bf16.mxu1 %v6538_v21 }
 0x2e6   :  { %2747 = vmatprep.subr.bf16.mxu0 %v6541_v58 }
 0x2e8   :  { %2599 = vmatpush1.bf16.msra.mxu1 %v6536_v1 }
 0x2e9   :  { %2748 = vmatpush1.bf16.msra.mxu0 %v6539_v4  ;;  %2600 = vmatprep.subr.bf16.mxu1 %v6544_v5 }
 0x2ec   :  { %2601 = vmatpush1.bf16.msra.mxu1 %v6542_v11 }
 0x2ed   :  { %2602 = vmatprep.subr.bf16.mxu1 %v6548_v10 }
 0x2f0   :  { %2603 = vmatpush1.bf16.msra.mxu1 %v6546_v62 }
 0x2f1   :  { %2911 = vmatprep.subr.bf16.mxu1 %v6552_v16 }
 0x36d   :  { %v6096_v63 = vpop.f32.mrf.mxu1  ;;  %v6140_v3 = vpop.f32.mrf.mxu0 }
 0x36f   :  { %v6097_v14 = vpop.f32.mrf.mxu1  ;;  %v6141_v7 = vpop.f32.mrf.mxu0 }
 0x370   :  { %v6098_v45 = vadd.f32 %v6097_v14, %v6096_v63  ;;  %v6142_v27 = vadd.f32 %v6141_v7, %v6140_v3 }
 0x372   :  { %v2322_v25 = vmax.f32 %v6098_v45, %v6142_v27  ;;  %v2406_v45 = vld [vmem:[#allocation3 + $0xc] sm:$0xf] }
 0x374   :  { %v2326_v43 = vmax.f32 %v2322_v25, 0.0 }
 0x376   :  { %v6058_v44 = vpack.c.bf16 %v2326_v43, %v2326_v43 }
 0x378   :  { %v2358_v17 = vshrl.u32 %v6058_v44, 16  ;;  %v2361_v59 = vshll.u32 %v6058_v44, 16 }
 0x37a   :  { %v2360_v18 = vrot.slane %v2358_v17, 7  ;;  %v6099_v47 = vpop.f32.mrf.mxu1  ;;  %v6143_v49 = vpop.f32.mrf.mxu0 }
 0x37c   :  { %v2363_v2 = vor.u32 %v2361_v59, %v2360_v18  ;;  %v6100_v15 = vpop.f32.mrf.mxu1  ;;  %v6144_v29 = vpop.f32.mrf.mxu0  ;;  %v2364_v48 = vrot.slane %v2360_v18, 4 }
 0x37d   :  { %v6101_v30 = vadd.f32 %v6100_v15, %v6099_v47  ;;  %v6145_v61 = vadd.f32 %v6144_v29, %v6143_v49 }
 0x37e   :  { %v2400_v31 = vsel %vm7971_vm14, %v2363_v2, %v2399_v24 }
 0x37f   :  { %2401 = vst [vmem:[#allocation3] sm:$0xf] %v2400_v31  ;;  %v2323_v32 = vmax.f32 %v6101_v30, %v6145_v61  ;;  %v6550_v61 = vld [vmem:[%s8480_s5 + $0x170] ss:$8 sps:$4 sm:$0xff]  }
 0x381   :  { %v2327_v33 = vmax.f32 %v2323_v32, 0.0 }
 0x383   :  { %v6059_v9 = vpack.c.bf16 %v2327_v33, %v2327_v33 }
 0x385   :  { %v2366_v54 = vshrl.u32 %v6059_v9, 16  ;;  %v2369_v39 = vshll.u32 %v6059_v9, 16  ;;  %v6555_v9 = vld [vmem:[%s8480_s5 + $0x164] ss:$8 sps:$4 sm:$0xff]  }
 0x386   :  { %v2413_v23 = vld [vmem:[#allocation3] sm:$0xf] }
 0x387   :  { %v2368_v35 = vrot.slane %v2366_v54, 7  ;;  %v2436_v50 = vshrl.u32 %v2413_v23, 16  ;;  %v2439_v53 = vshll.u32 %v2413_v23, 16 }
 0x389   :  { %v2371_v60 = vor.u32 %v2369_v39, %v2368_v35  ;;  %v2373_v12 = vrot.slane %v2368_v35, 4  ;;  %v6102_v37 = vpop.f32.mrf.mxu1  ;;  %v6146_v38 = vpop.f32.mrf.mxu0  ;;  %v2438_v21 = vrot.slane %v2436_v50, 4  ;;  %v2441_v58 = vrot.slane %v2439_v53, 5  ;;  %v6553_v39 = vld [vmem:[%s8480_s5 + $0x160] ss:$8 sps:$4 sm:$0xff]  }
 0x38a   :  { %v6564_v50 = vld [vmem:[%s8480_s5 + $0x134] ss:$8 sps:$4 sm:$0xff]  }
 0x38b   :  { %v2372_v41 = vsel %vm7110_vm7, %v2364_v48, %v2371_v60  ;;  %v2404_v34 = vsel %vm7860_vm11, %v2373_v12, %v2403_v46  ;;  %v6103_v51 = vpop.f32.mrf.mxu1  ;;  %v6147_v42 = vpop.f32.mrf.mxu0  ;;  %v2442_v16 = vor.u32 %v2441_v58, %v2438_v21  ;;  %v6558_v46 = vld [vmem:[%s8480_s5 + $0x154] ss:$8 sps:$4 sm:$0xff]   ;;  %v6556_v12 = vld [vmem:[%s8480_s5 + $0x150] ss:$8 sps:$4 sm:$0xff]  }
 0x38c   :  { %2402 = vst [vmem:[#allocation3 + $0x4] sm:$0xf] %v2372_v41  ;;  %2405 = vst [vmem:[#allocation3 + $0x8] sm:$0x1] %v2404_v34  ;;  %v6104_v13 = vadd.f32 %v6103_v51, %v6102_v37  ;;  %v6148_v36 = vadd.f32 %v6147_v42, %v6146_v38  ;;  %v6561_v37 = vld [vmem:[%s8480_s5 + $0x144] ss:$8 sps:$4 sm:$0xff]  }
 0x38d   :  { %v2443_v44 = vrot.slane %v2442_v16, 4  ;;  %v2410_v41 = vld [vmem:[#allocation3 + $0x14] sm:$0x1]  ;;  %v6562_v58 = vld [vmem:[%s8480_s5 + $0x130] ss:$8 sps:$4 sm:$0xff]  }
 0x38e   :  { %v2324_v56 = vmax.f32 %v6104_v13, %v6148_v36  ;;  %v6559_v36 = vld [vmem:[%s8480_s5 + $0x140] ss:$8 sps:$4 sm:$0xff]  }
 0x390   :  { %v2328_v57 = vmax.f32 %v2324_v56, 0.0 }
 0x392   :  { %v6060_v1 = vpack.c.bf16 %v2328_v57, %v2328_v57 }
 0x393   :  { %v7981_v4 = vld [vmem:[#allocation3 + $0x4] sm:$0xf]  ;;  %v7985_v62 = vld [vmem:[#allocation3 + $0x8] sm:$0x1] }
 0x394   :  { %v2375_v5 = vshrl.u32 %v6060_v1, 16  ;;  %v2449_v11 = vshrl.u32 %v7981_v4, 16  ;;  %v5838_v10 = vcombine.low %v2413_v23, %v7981_v4  ;;  %v2445_v63 = vshll.u32 %v7981_v4, 16 }
 0x395   :  { %v2378_v14 = vshll.u32 %v6060_v1, 16  ;;  %v2455_v25 = vshll.u32 %v7985_v62, 16  ;;  %v6567_v1 = vld [vmem:[%s8480_s5 + $0x124] ss:$8 sps:$4 sm:$0xff]  }
 0x396   :  { %v2377_v3 = vrot.slane %v2375_v5, 7  ;;  %2766 = vmatmul.mubr.bf16.vlgmr.msra.gmra.mxu0 %v5838_v10  ;;  %v2451_v7 = vrot.slane %v2449_v11, 4  ;;  %v2447_v27 = vrot.slane %v2445_v63, 5  ;;  %v6565_v11 = vld [vmem:[%s8480_s5 + $0x120] ss:$8 sps:$4 sm:$0xff]  }
 0x397   :  { %2775 = vmatprep.mubr.bf16.mxu0 %v6943_v0  ;;  %v2457_v24 = vrot.slane %v2455_v25, 5  ;;  %v6570_v10 = vld [vmem:[%s8480_s5 + $0x114] ss:$8 sps:$4 sm:$0xff]  }
 0x398   :  { %v2380_v43 = vor.u32 %v2378_v14, %v2377_v3  ;;  %v2452_v17 = vor.u32 %v2451_v7, %v2447_v27  ;;  %v2448_v31 = vsel %vm7177_vm12, %v2443_v44, %v2447_v27  ;;  %v2381_v34 = vrot.slane %v2377_v3, 4  ;;  %v6568_v27 = vld [vmem:[%s8480_s5 + $0x110] ss:$8 sps:$4 sm:$0xff]  }
 0x39a   :  { %v2407_v18 = vsel %vm7971_vm14, %v2380_v43, %v2406_v45  ;;  %v6105_v59 = vpop.f32.mrf.mxu1  ;;  %v6149_v47 = vpop.f32.mrf.mxu0  ;;  %v2453_v49 = vrot.slane %v2452_v17, 4  ;;  %v6573_v17 = vld [vmem:[%s8480_s5 + $0x104] ss:$8 sps:$4 sm:$0xff]  }
 0x39b   :  { %2408 = vst [vmem:[#allocation3 + $0xc] sm:$0xf] %v2407_v18 }
 0x39c   :  { %v6106_v2 = vpop.f32.mrf.mxu1  ;;  %v6150_v15 = vpop.f32.mrf.mxu0  ;;  %v2458_v32 = vsel %vm7177_vm12, %v2453_v49, %v2457_v24 }
 0x39d   :  { %v6107_v29 = vadd.f32 %v6106_v2, %v6105_v59  ;;  %v6151_v30 = vadd.f32 %v6150_v15, %v6149_v47  ;;  %v5820_v33 = vcombine.low %v2448_v31, %v2458_v32  ;;  %v6571_v47 = vld [vmem:[%s8480_s5 + $0x100] ss:$8 sps:$4 sm:$0xff]   ;;  %v2794_v2 = vrot.slane %v7981_v4, 5 }
 0x39e   :  { %v2786_v31 = vld [vmem:[#allocation3] sm:$0xe]  ;;  %v2797_v32 = vrot.slane %v7985_v62, 5 }
 0x39f   :  { %v2325_v54 = vmax.f32 %v6107_v29, %v6151_v30  ;;  %2621 = vmatmul.mubr.bf16.vlgmr.msra.gmra.mxu1 %v5820_v33  ;;  %v5856_v33 = vrot.slane %v2786_v31, 9  ;;  %v3047_v31 = vld [vmem:[#allocation11 + $0x1b8] sm:$0xff] }
 0x3a0   :  { %2912 = vmatpush1.bf16.msra.mxu1 %v6550_v61  ;;  %2630 = vmatprep.mubr.bf16.mxu1 %v6943_v0  ;;  %v2796_v61 = vrot.slane %v2794_v2, 4 }
 0x3a1   :  { %v2329_v35 = vmax.f32 %v2325_v54, 0.0  ;;  %2913 = vmatprep.subr.bf16.mxu1 %v6555_v9  ;;  %v2795_v54 = vsel %vm7231_vm15, %v5856_v33, %v2794_v2  ;;  %v3052_v2 = vld [vmem:[#allocation11 + $0x1e0] sm:$0xff]  ;;  %v3045_v33 = vld [vmem:[#allocation11 + $0x1a8] sm:$0xff] }
 0x3a2   :  { %v2415_v13 = vld [vmem:[#allocation3 + $0xc] sm:$0xf]  ;;  %v2798_v9 = vsel %vm7231_vm15, %v2796_v61, %v2797_v32  ;;  %v3048_v61 = vld [vmem:[#allocation11 + $0x1c0] sm:$0xff]  ;;  %v3046_v32 = vld [vmem:[#allocation11 + $0x1b0] sm:$0xff] }
 0x3a3   :  { %v6061_v48 = vpack.c.bf16 %v2329_v35, %v2329_v35  ;;  %v2460_v57 = vshrl.u32 %v2415_v13, 16  ;;  %v2463_v21 = vshll.u32 %v2415_v13, 16  ;;  %v5874_v35 = vcombine.low %v2795_v54, %v2798_v9  ;;  %v3044_v9 = vld [vmem:[#allocation11 + $0x1a0] sm:$0xff]  ;;  %v3042_v54 = vld [vmem:[#allocation11 + $0x190] sm:$0xff] }
 0x3a4   :  { %2914 = vmatpush1.bf16.msra.mxu1 %v6553_v39 }
 0x3a5   :  { %v2383_v60 = vshrl.u32 %v6061_v48, 16  ;;  %2915 = vmatprep.subr.bf16.mxu1 %v6558_v46  ;;  %v2386_v23 = vshll.u32 %v6061_v48, 16  ;;  %v2462_v5 = vrot.slane %v2460_v57, 4  ;;  %v2465_v40 = vrot.slane %v2463_v21, 5  ;;  %v2787_v46 = vld [vmem:[#allocation3 + $0xc] sm:$0xe] }
 0x3a6   :  { %v3012_v57 = vld [vmem:[#allocation11 + $0xa0] sm:$0xff]  ;;  %v3011_v21 = vld [vmem:[#allocation11 + $0x98] sm:$0xff] }
 0x3a7   :  { %v2385_v38 = vrot.slane %v2383_v60, 7  ;;  %v2466_v7 = vor.u32 %v2465_v40, %v2462_v5  ;;  %v5857_v60 = vrot.slane %v2787_v46, 9  ;;  %v3008_v5 = vld [vmem:[#allocation11 + $0x80] sm:$0xff]  ;;  %v3007_v40 = vld [vmem:[#allocation11 + $0x78] sm:$0xff] }
 0x3a8   :  { %2916 = vmatpush1.bf16.msra.mxu1 %v6556_v12  ;;  %v3039_v46 = vld [vmem:[#allocation11 + $0x178] sm:$0xff] }
 0x3a9   :  { %v2388_v51 = vor.u32 %v2386_v23, %v2385_v38  ;;  %v2390_v42 = vrot.slane %v2385_v38, 4  ;;  %2917 = vmatprep.subr.bf16.mxu1 %v6561_v37  ;;  %v2467_v18 = vrot.slane %v2466_v7, 4  ;;  %v3023_v38 = vld [vmem:[#allocation11 + $0xf8] sm:$0xff]  ;;  %v3022_v23 = vld [vmem:[#allocation11 + $0xf0] sm:$0xff]  ;;  %v3000_v7 = vld [vmem:[#allocation11 + $0x40] sm:$0xff] }
 0x3aa   :  { %3100 = vmatprep.subr.mxu0 %v3023_v38 }
 0x3ab   :  { %v2389_v53 = vsel %vm7110_vm7, %v2381_v34, %v2388_v51  ;;  %v2411_v56 = vsel %vm7860_vm11, %v2390_v42, %v2410_v41  ;;  %3101 = vmatpush1.msra.mxu0 %v3022_v23  ;;  %v3021_v41 = vld [vmem:[#allocation11 + $0xe8] sm:$0xff]  ;;  %v3020_v34 = vld [vmem:[#allocation11 + $0xe0] sm:$0xff]  ;;  %v3019_v51 = vld [vmem:[#allocation11 + $0xd8] sm:$0xff]  ;;  %vm5575_vm7 = vcmask 254976  }
 0x3ac   :  { %2409 = vst [vmem:[#allocation3 + $0x10] sm:$0xf] %v2389_v53  ;;  %2412 = vst [vmem:[#allocation3 + $0x14] sm:$0x1] %v2411_v56  ;;  %2918 = vmatpush1.bf16.msra.mxu1 %v6559_v36  ;;  %3102 = vmatprep.subr.mxu0 %v3021_v41  ;;  %v3018_v42 = vld [vmem:[#allocation11 + $0xd0] sm:$0xff]  ;;  %v3016_v36 = vld [vmem:[#allocation11 + $0xc0] sm:$0xff] }
 0x3ad   :  { %2919 = vmatprep.subr.bf16.mxu1 %v6564_v50  ;;  %3103 = vmatpush1.msra.mxu0 %v3020_v34  ;;  %v3015_v50 = vld [vmem:[#allocation11 + $0xb8] sm:$0xff]  ;;  %v3014_v53 = vld [vmem:[#allocation11 + $0xb0] sm:$0xff]  ;;  %v3013_v56 = vld [vmem:[#allocation11 + $0xa8] sm:$0xff] }
 0x3ae   :  { %3104 = vmatprep.subr.mxu0 %v3019_v51 }
 0x3af   :  { %3105 = vmatpush1.msra.mxu0 %v3018_v42 }
 0x3b0   :  { %2920 = vmatpush1.bf16.msra.mxu1 %v6562_v58  ;;  %v3010_v58 = vld [vmem:[#allocation11 + $0x90] sm:$0xff] }
 0x3b1   :  { %2921 = vmatprep.subr.bf16.mxu1 %v6567_v1  ;;  %v3009_v1 = vld [vmem:[#allocation11 + $0x88] sm:$0xff] }
 0x3b3   :  { %v2416_v16 = vld [vmem:[#allocation3 + $0x10] sm:$0xf]  ;;  %v2434_v63 = vld [vmem:[#allocation3 + $0x14] sm:$0x1] }
 0x3b4   :  { %v2473_v3 = vshrl.u32 %v2416_v16, 16  ;;  %v5839_v14 = vcombine.low %v2415_v13, %v2416_v16  ;;  %v2469_v45 = vshll.u32 %v2416_v16, 16  ;;  %2922 = vmatpush1.bf16.msra.mxu1 %v6565_v11  ;;  %v2479_v44 = vshll.u32 %v2434_v63, 16  ;;  %v3017_v13 = vld [vmem:[#allocation11 + $0xc8] sm:$0xff]  ;;  %v3006_v11 = vld [vmem:[#allocation11 + $0x70] sm:$0xff] }
 0x3b5   :  { %2923 = vmatprep.subr.bf16.mxu1 %v6570_v10  ;;  %v2801_v4 = vrot.slane %v2416_v16, 5  ;;  %v2804_v48 = vrot.slane %v2434_v63, 5  ;;  %3106 = vmatprep.subr.mxu0 %v3017_v13  ;;  %v3005_v10 = vld [vmem:[#allocation11 + $0x68] sm:$0xff]  ;;  %v3004_v16 = vld [vmem:[#allocation11 + $0x60] sm:$0xff]  ;;  %v3003_v63 = vld [vmem:[#allocation11 + $0x58] sm:$0xff] }
 0x3b6   :  { %2776 = vmatmul.mubr.bf16.gmra.mxu0 %v5839_v14  ;;  %v2471_v25 = vrot.slane %v2469_v45, 5  ;;  %v2475_v43 = vrot.slane %v2473_v3, 4  ;;  %v2481_v24 = vrot.slane %v2479_v44, 5  ;;  %v3002_v3 = vld [vmem:[#allocation11 + $0x50] sm:$0xff]  ;;  %v3001_v14 = vld [vmem:[#allocation11 + $0x48] sm:$0xff]  ;;  %v2999_v45 = vld [vmem:[#allocation11 + $0x38] sm:$0xff] }
 0x3b7   :  { %v2803_v39 = vrot.slane %v2801_v4, 4  ;;  %v2802_v62 = vsel %vm7231_vm15, %v5857_v60, %v2801_v4  ;;  %3107 = vmatpush1.msra.mxu0 %v3016_v36  ;;  %v2995_v44 = vld [vmem:[#allocation11 + $0x18] sm:$0xff]  ;;  %v3037_v60 = vld [vmem:[#allocation11 + $0x168] sm:$0xff] }
 0x3b8   :  { %v2476_v59 = vor.u32 %v2475_v43, %v2471_v25  ;;  %2924 = vmatpush1.bf16.msra.mxu1 %v6568_v27  ;;  %v2472_v15 = vsel %vm7177_vm12, %v2467_v18, %v2471_v25  ;;  %3108 = vmatprep.subr.mxu0 %v3015_v50  ;;  %v2998_v27 = vld [vmem:[#allocation11 + $0x30] sm:$0xff]  ;;  %v2997_v25 = vld [vmem:[#allocation11 + $0x28] sm:$0xff]  ;;  %v2996_v43 = vld [vmem:[#allocation11 + $0x20] sm:$0xff] }
 0x3b9   :  { %2925 = vmatprep.subr.bf16.mxu1 %v6573_v17  ;;  %v2805_v12 = vsel %vm7231_vm15, %v2803_v39, %v2804_v48  ;;  %3109 = vmatpush1.msra.mxu0 %v3014_v53  ;;  %v2994_v17 = vld [vmem:[#allocation11 + $0x10] sm:$0xff]  ;;  %v2993_v18 = vld [vmem:[#allocation11 + $0x8] sm:$0xff]  ;;  %v3043_v4 = vld [vmem:[#allocation11 + $0x198] sm:$0xff] }
 0x3ba   :  { %v2477_v49 = vrot.slane %v2476_v59, 4  ;;  %v5875_v37 = vcombine.low %v2802_v62, %v2805_v12  ;;  %3110 = vmatprep.subr.mxu0 %v3013_v56  ;;  %v2992_v59 = vld [vmem:[#allocation11] sm:$0xff]  ;;  %v3038_v48 = vld [vmem:[#allocation11 + $0x170] sm:$0xff]  ;;  %v3035_v62 = vld [vmem:[#allocation11 + $0x158] sm:$0xff] }
 0x3bb   :  { %3111 = vmatpush1.msra.mxu0 %v3012_v57  ;;  %v3040_v39 = vld [vmem:[#allocation11 + $0x180] sm:$0xff] }
 0x3bc   :  { %v2482_v29 = vsel %vm7177_vm12, %v2477_v49, %v2481_v24  ;;  %2926 = vmatpush1.bf16.msra.mxu1 %v6571_v47  ;;  %3112 = vmatprep.subr.mxu0 %v3011_v21  ;;  %v3055_v47 = vld [vmem:[#allocation11 + $0x1f8] sm:$0xff]  ;;  %v3054_v49 = vld [vmem:[#allocation11 + $0x1f0] sm:$0xff]  ;;  %v3053_v24 = vld [vmem:[#allocation11 + $0x1e8] sm:$0xff] }
 0x3bd   :  { %v5821_v30 = vcombine.low %v2472_v15, %v2482_v29  ;;  %3173 = vmatprep.subr.mxu1 %v3023_v38  ;;  %3113 = vmatpush1.msra.mxu0 %v3010_v58  ;;  %v3051_v15 = vld [vmem:[#allocation11 + $0x1d8] sm:$0xff]  ;;  %v3050_v29 = vld [vmem:[#allocation11 + $0x1d0] sm:$0xff]  ;;  %v3036_v12 = vld [vmem:[#allocation11 + $0x160] sm:$0xff] }
 0x3be   :  { %3114 = vmatprep.subr.mxu0 %v3009_v1  ;;  %v3033_v38 = vld [vmem:[#allocation11 + $0x148] sm:$0xff] }
 0x3bf   :  { %2631 = vmatmul.mubr.bf16.gmra.mxu1 %v5821_v30  ;;  %3115 = vmatpush1.msra.mxu0 %v3008_v5  ;;  %v3049_v30 = vld [vmem:[#allocation11 + $0x1c8] sm:$0xff] }
 0x3c0   :  { %2943 = vmatprep.mubr.bf16.mxu1 %v6943_v0  ;;  %3116 = vmatprep.subr.mxu0 %v3007_v40 }
 0x3c1   :  { %3117 = vmatpush1.msra.mxu0 %v3006_v11 }
 0x3c2   :  { %3118 = vmatprep.subr.mxu0 %v3005_v10 }
 0x3c3   :  { %3119 = vmatpush1.msra.mxu0 %v3004_v16 }
 0x3c4   :  { %3120 = vmatprep.subr.mxu0 %v3003_v63 }
 0x3c5   :  { %3121 = vmatpush1.msra.mxu0 %v3002_v3 }
 0x3c6   :  { %3122 = vmatprep.subr.mxu0 %v3001_v14 }
 0x3c7   :  { %2944 = vmatmul.mubr.bf16.vlgmr.msra.gmra.mxu1 %v5874_v35  ;;  %3123 = vmatpush1.msra.mxu0 %v3000_v7  ;;  %v3041_v35 = vld [vmem:[#allocation11 + $0x188] sm:$0xff] }
 0x3c8   :  { %2953 = vmatprep.mubr.bf16.mxu1 %v6943_v0  ;;  %3174 = vmatpush1.msra.mxu1 %v3022_v23  ;;  %v3032_v23 = vld [vmem:[#allocation11 + $0x140] sm:$0xff] }
 0x3c9   :  { %3175 = vmatprep.subr.mxu1 %v3021_v41  ;;  %3124 = vmatprep.subr.mxu0 %v2999_v45  ;;  %v3031_v41 = vld [vmem:[#allocation11 + $0x138] sm:$0xff] }
 0x3ca   :  { %3176 = vmatpush1.msra.mxu1 %v3020_v34  ;;  %3125 = vmatpush1.msra.mxu0 %v2998_v27  ;;  %v3030_v34 = vld [vmem:[#allocation11 + $0x130] sm:$0xff] }
 0x3cb   :  { %3177 = vmatprep.subr.mxu1 %v3019_v51  ;;  %3126 = vmatprep.subr.mxu0 %v2997_v25  ;;  %v3029_v51 = vld [vmem:[#allocation11 + $0x128] sm:$0xff] }
 0x3cc   :  { %3178 = vmatpush1.msra.mxu1 %v3018_v42  ;;  %3127 = vmatpush1.msra.mxu0 %v2996_v43  ;;  %v3028_v42 = vld [vmem:[#allocation11 + $0x120] sm:$0xff] }
 0x3cd   :  { %3179 = vmatprep.subr.mxu1 %v3017_v13  ;;  %3128 = vmatprep.subr.mxu0 %v2995_v44  ;;  %v3027_v13 = vld [vmem:[#allocation11 + $0x118] sm:$0xff] }
 0x3ce   :  { %3180 = vmatpush1.msra.mxu1 %v3016_v36  ;;  %3129 = vmatpush1.msra.mxu0 %v2994_v17  ;;  %v3026_v36 = vld [vmem:[#allocation11 + $0x110] sm:$0xff] }
 0x3cf   :  { %2954 = vmatmul.mubr.bf16.gmra.mxu1 %v5875_v37  ;;  %3181 = vmatprep.subr.mxu1 %v3015_v50  ;;  %v3034_v37 = vld [vmem:[#allocation11 + $0x150] sm:$0xff]  ;;  %v3025_v50 = vld [vmem:[#allocation11 + $0x108] sm:$0xff] }
 0x3d0   :  { %3182 = vmatpush1.msra.mxu1 %v3014_v53  ;;  %3130 = vmatprep.subr.mxu0 %v2993_v18  ;;  %v3024_v53 = vld [vmem:[#allocation11 + $0x100] sm:$0xff] }
 0x3d1   :  { %3183 = vmatprep.subr.mxu1 %v3013_v56  ;;  %3131 = vmatpush1.msra.mxu0 %v2992_v59 }
 0x3d2   :  { %3184 = vmatpush1.msra.mxu1 %v3012_v57  ;;  %3132 = vmatprep.subr.mxu0 %v3055_v47 }
 0x3d3   :  { %3185 = vmatprep.subr.mxu1 %v3011_v21  ;;  %3133 = vmatpush2.msra.mxu0 %v3054_v49 }
 0x3d4   :  { %3186 = vmatpush1.msra.mxu1 %v3010_v58  ;;  %3134 = vmatprep.subr.mxu0 %v3053_v24 }
 0x3d5   :  { %3187 = vmatprep.subr.mxu1 %v3009_v1  ;;  %3135 = vmatpush2.msra.mxu0 %v3052_v2 }
 0x3d6   :  { %3188 = vmatpush1.msra.mxu1 %v3008_v5  ;;  %3136 = vmatprep.subr.mxu0 %v3051_v15 }
 0x3d7   :  { %3189 = vmatprep.subr.mxu1 %v3007_v40  ;;  %3137 = vmatpush2.msra.mxu0 %v3050_v29 }
 0x3d8   :  { %3190 = vmatpush1.msra.mxu1 %v3006_v11  ;;  %3138 = vmatprep.subr.mxu0 %v3049_v30 }
 0x3d9   :  { %3191 = vmatprep.subr.mxu1 %v3005_v10  ;;  %3139 = vmatpush2.msra.mxu0 %v3048_v61 }
 0x3da   :  { %3192 = vmatpush1.msra.mxu1 %v3004_v16  ;;  %3140 = vmatprep.subr.mxu0 %v3047_v31 }
 0x3db   :  { %3193 = vmatprep.subr.mxu1 %v3003_v63  ;;  %3141 = vmatpush2.msra.mxu0 %v3046_v32 }
 0x3dc   :  { %3194 = vmatpush1.msra.mxu1 %v3002_v3  ;;  %3142 = vmatprep.subr.mxu0 %v3045_v33 }
 0x3dd   :  { %3195 = vmatprep.subr.mxu1 %v3001_v14  ;;  %3143 = vmatpush2.msra.mxu0 %v3044_v9 }
 0x3de   :  { %3196 = vmatpush1.msra.mxu1 %v3000_v7  ;;  %3144 = vmatprep.subr.mxu0 %v3043_v4 }
 0x3df   :  { %3197 = vmatprep.subr.mxu1 %v2999_v45  ;;  %3145 = vmatpush2.msra.mxu0 %v3042_v54  ;;  %v2972_v45 = vld [vmem:[#allocation10] ss:$4 sm:$0x3] }
 0x3e0   :  { %3198 = vmatpush1.msra.mxu1 %v2998_v27  ;;  %3146 = vmatprep.subr.mxu0 %v3041_v35 }
 0x3e1   :  { %3199 = vmatprep.subr.mxu1 %v2997_v25  ;;  %3147 = vmatpush2.msra.mxu0 %v3040_v39 }
 0x3e2   :  { %3200 = vmatpush1.msra.mxu1 %v2996_v43  ;;  %3148 = vmatprep.subr.mxu0 %v3039_v46 }
 0x3e3   :  { %3201 = vmatprep.subr.mxu1 %v2995_v44  ;;  %3149 = vmatpush2.msra.mxu0 %v3038_v48 }
 0x3e4   :  { %3202 = vmatpush1.msra.mxu1 %v2994_v17  ;;  %3150 = vmatprep.subr.mxu0 %v3037_v60 }
 0x3e5   :  { %3203 = vmatprep.subr.mxu1 %v2993_v18  ;;  %3151 = vmatpush2.msra.mxu0 %v3036_v12 }
 0x3e6   :  { %3204 = vmatpush1.msra.mxu1 %v2992_v59  ;;  %3152 = vmatprep.subr.mxu0 %v3035_v62  ;;  %v2977_v59 = vrot.slane %v2972_v45, %v7474_v20 }
 0x3e7   :  { %3205 = vmatprep.subr.mxu1 %v3055_v47  ;;  %3153 = vmatpush2.msra.mxu0 %v3034_v37 }
 0x3e8   :  { %3206 = vmatpush2.msra.mxu1 %v3054_v49  ;;  %3154 = vmatprep.subr.mxu0 %v3033_v38 }
 0x3e9   :  { %3207 = vmatprep.subr.mxu1 %v3053_v24  ;;  %3155 = vmatpush2.msra.mxu0 %v3032_v23 }
 0x3ea   :  { %3208 = vmatpush2.msra.mxu1 %v3052_v2  ;;  %3156 = vmatprep.subr.mxu0 %v3031_v41 }
 0x3eb   :  { %3209 = vmatprep.subr.mxu1 %v3051_v15  ;;  %3157 = vmatpush2.msra.mxu0 %v3030_v34  ;;  %v2981_v15 = vrot.slane %v2972_v45, %v7480_v28 }
 0x3ec   :  { %3210 = vmatpush2.msra.mxu1 %v3050_v29  ;;  %3158 = vmatprep.subr.mxu0 %v3029_v51 }
 0x3ed   :  { %3211 = vmatprep.subr.mxu1 %v3049_v30  ;;  %3159 = vmatpush2.msra.mxu0 %v3028_v42 }
 0x3ee   :  { %3212 = vmatpush2.msra.mxu1 %v3048_v61  ;;  %3160 = vmatprep.subr.mxu0 %v3027_v13 }
 0x3ef   :  { %3213 = vmatprep.subr.mxu1 %v3047_v31  ;;  %3161 = vmatpush2.msra.mxu0 %v3026_v36 }
 0x3f0   :  { %3214 = vmatpush2.msra.mxu1 %v3046_v32  ;;  %3162 = vmatprep.subr.mxu0 %v3025_v50 }
 0x3f1   :  { %3215 = vmatprep.subr.mxu1 %v3045_v33  ;;  %3163 = vmatpush2.msra.mxu0 %v3024_v53 }
 0x3f2   :  { %3216 = vmatpush2.msra.mxu1 %v3044_v9 }
 0x3f3   :  { %3217 = vmatprep.subr.mxu1 %v3043_v4 }
 0x3f4   :  { %3218 = vmatpush2.msra.mxu1 %v3042_v54 }
 0x3f5   :  { %3219 = vmatprep.subr.mxu1 %v3041_v35 }
 0x3f6   :  { %3220 = vmatpush2.msra.mxu1 %v3040_v39 }
 0x3f7   :  { %3221 = vmatprep.subr.mxu1 %v3039_v46 }
 0x3f8   :  { %3222 = vmatpush2.msra.mxu1 %v3038_v48 }
 0x3f9   :  { %3223 = vmatprep.subr.mxu1 %v3037_v60 }
 0x3fa   :  { %3224 = vmatpush2.msra.mxu1 %v3036_v12 }
 0x3fb   :  { %3225 = vmatprep.subr.mxu1 %v3035_v62 }
 0x3fc   :  { %3226 = vmatpush2.msra.mxu1 %v3034_v37 }
 0x3fd   :  { %3227 = vmatprep.subr.mxu1 %v3033_v38 }
 0x3fe   :  { %3228 = vmatpush2.msra.mxu1 %v3032_v23 }
 0x3ff   :  { %3229 = vmatprep.subr.mxu1 %v3031_v41 }
 0x400   :  { %3230 = vmatpush2.msra.mxu1 %v3030_v34 }
 0x401   :  { %3231 = vmatprep.subr.mxu1 %v3029_v51 }
 0x402   :  { %3232 = vmatpush2.msra.mxu1 %v3028_v42 }
 0x403   :  { %3233 = vmatprep.subr.mxu1 %v3027_v13 }
 0x404   :  { %3234 = vmatpush2.msra.mxu1 %v3026_v36 }
 0x405   :  { %3235 = vmatprep.subr.mxu1 %v3025_v50 }
 0x406   :  { %3236 = vmatpush2.msra.mxu1 %v3024_v53 }
 0x456   :  { %v2767_v21 = vpop.f32.mrf.mxu0 }
 0x458   :  { %v2769_v1 = vpop.f32.mrf.mxu0 }
 0x45a   :  { %v2771_v40 = vpop.f32.mrf.mxu0 }
 0x45c   :  { %v2773_v16 = vpop.f32.mrf.mxu0 }
 0x45f   :  { %v2622_v56 = vpop.f32.mrf.mxu1 }
 0x460   :  { %v2768_v27 = vadd.f32 %v2767_v21, %v2622_v56 }
 0x461   :  { %v2624_v57 = vpop.f32.mrf.mxu1 }
 0x462   :  { %v2770_v17 = vadd.f32 %v2769_v1, %v2624_v57 }
 0x463   :  { %v2626_v58 = vpop.f32.mrf.mxu1 }
 0x464   :  { %v2772_v43 = vadd.f32 %v2771_v40, %v2626_v58 }
 0x465   :  { %v2628_v5 = vpop.f32.mrf.mxu1 }
 0x466   :  { %v2774_v49 = vadd.f32 %v2773_v16, %v2628_v5 }
 0x476   :  { %v2777_v14 = vpop.f32.mrf.mxu0 }
 0x478   :  { %v2779_v44 = vpop.f32.mrf.mxu0 }
 0x47a   :  { %v2781_v32 = vpop.f32.mrf.mxu0 }
 0x47c   :  { %v2783_v62 = vpop.f32.mrf.mxu0 }
 0x47f   :  { %v2632_v11 = vpop.f32.mrf.mxu1 }
 0x480   :  { %v2778_v30 = vadd.f32 %v2777_v14, %v2632_v11 }
 0x481   :  { %v2634_v10 = vpop.f32.mrf.mxu1 }
 0x482   :  { %v2780_v35 = vadd.f32 %v2779_v44, %v2634_v10 }
 0x483   :  { %v2636_v63 = vpop.f32.mrf.mxu1 }
 0x484   :  { %v2782_v60 = vadd.f32 %v2781_v32, %v2636_v63 }
 0x485   :  { %v2638_v3 = vpop.f32.mrf.mxu1 }
 0x486   :  { %v2784_v34 = vadd.f32 %v2783_v62, %v2638_v3 }
 0x487   :  { %v2945_v7 = vpop.f32.mrf.mxu1 }
 0x488   :  { %v2964_v18 = vadd.f32 %v2945_v7, %v2768_v27 }
 0x489   :  { %v2947_v25 = vpop.f32.mrf.mxu1 }
 0x48a   :  { %v2965_v2 = vadd.f32 %v2947_v25, %v2770_v17  ;;  %v8066_v33 = vadd.f32 %v2977_v59, %v2964_v18 }
 0x48b   :  { %v2949_v47 = vpop.f32.mrf.mxu1 }
 0x48c   :  { %v2966_v24 = vadd.f32 %v2949_v47, %v2772_v43  ;;  %v8070_v39 = vadd.f32 %v2981_v15, %v2965_v2  ;;  %v3074_v37 = vmul.f32 %v8066_v33, %v8066_v33 }
 0x48d   :  { %v2951_v29 = vpop.f32.mrf.mxu1 }
 0x48e   :  { %v8064_v61 = vadd.f32 %v2977_v59, %v2966_v24  ;;  %v2967_v31 = vadd.f32 %v2951_v29, %v2774_v49  ;;  %v3075_v36 = vmul.f32 %v8070_v39, %v8070_v39 }
 0x48f   :  { %v2955_v9 = vpop.f32.mrf.mxu1 }
 0x490   :  { %v8068_v4 = vadd.f32 %v2981_v15, %v2967_v31  ;;  %v2968_v54 = vadd.f32 %v2955_v9, %v2778_v30  ;;  %v3076_v46 = vmul.f32 %v8064_v61, %v8064_v61  ;;  %v3056_v51 = vadd.f32 %v8064_v61, %v8066_v33 }
 0x491   :  { %v2957_v48 = vpop.f32.mrf.mxu1 }
 0x492   :  { %v8074_v12 = vadd.f32 %v2977_v59, %v2968_v54  ;;  %v3077_v38 = vmul.f32 %v8068_v4, %v8068_v4  ;;  %v2969_v23 = vadd.f32 %v2957_v48, %v2780_v35  ;;  %v3082_v50 = vadd.f32 %v3076_v46, %v3074_v37 }
 0x493   :  { %v2959_v41 = vpop.f32.mrf.mxu1  ;;  %v3065_v57 = vadd.f32 %v8068_v4, %v8070_v39 }
 0x494   :  { %v3078_v42 = vmul.f32 %v8074_v12, %v8074_v12  ;;  %v2970_v13 = vadd.f32 %v2959_v41, %v2782_v60  ;;  %v8086_v53 = vadd.f32 %v2981_v15, %v2969_v23  ;;  %v3057_v21 = vadd.f32 %v3056_v51, %v8074_v12  ;;  %v3521_v41 = vld [vmem:[#allocation13 + $0xf8] sm:$0xff] }
 0x495   :  { %v2961_v56 = vpop.f32.mrf.mxu1  ;;  %v3091_v5 = vadd.f32 %v3077_v38, %v3075_v36  ;;  %v3505_v51 = vld [vmem:[#allocation13 + $0x78] sm:$0xff]  ;;  %6152 = vmatprep.subr.mxu0 %v3521_v41  ;;  %v3804_v36 = vld [vmem:[#allocation13 + $0x1f0] sm:$0xff]  ;;  %v3494_v41 = vld [vmem:[#allocation13 + $0x20] sm:$0xff] }
 0x496   :  { %v8091_v58 = vadd.f32 %v2977_v59, %v2970_v13  ;;  %v2971_v1 = vadd.f32 %v2961_v56, %v2784_v34  ;;  %v3083_v40 = vadd.f32 %v3082_v50, %v3078_v42  ;;  %v3079_v11 = vmul.f32 %v8086_v53, %v8086_v53  ;;  %v3805_v34 = vld [vmem:[#allocation13 + $0x1f8] sm:$0xff]  ;;  %v3520_v13 = vld [vmem:[#allocation13 + $0xf0] sm:$0xff] }
 0x497   :  { %v3066_v10 = vadd.f32 %v3065_v57, %v8086_v53  ;;  %6190 = vmatprep.subr.mxu1 %v3805_v34  ;;  %v3789_v42 = vld [vmem:[#allocation13 + $0x178] sm:$0xff]  ;;  %v3504_v50 = vld [vmem:[#allocation13 + $0x70] sm:$0xff]  ;;  %v3519_v57 = vld [vmem:[#allocation13 + $0xe8] sm:$0xff] }
 0x498   :  { %v3058_v16 = vadd.f32 %v3057_v21, %v8091_v58  ;;  %v3080_v63 = vmul.f32 %v8091_v58, %v8091_v58  ;;  %v8099_v3 = vadd.f32 %v2981_v15, %v2971_v1  ;;  %v3092_v14 = vadd.f32 %v3091_v5, %v3079_v11  ;;  %v3788_v56 = vld [vmem:[#allocation13 + $0x170] sm:$0xff]  ;;  %v3803_v21 = vld [vmem:[#allocation13 + $0x1e8] sm:$0xff]  ;;  %v3802_v11 = vld [vmem:[#allocation13 + $0x1e0] sm:$0xff] }
 0x499   :  { %v3503_v1 = vld [vmem:[#allocation13 + $0x68] sm:$0xff]  ;;  %v3778_v34 = vld [vmem:[#allocation13 + $0x120] sm:$0xff] }
 0x49a   :  { %v3059_v7 = vrot.slane %v3058_v16, 4  ;;  %v3084_v45 = vadd.f32 %v3083_v40, %v3080_v63  ;;  %v3067_v27 = vadd.f32 %v3066_v10, %v8099_v3  ;;  %v3081_v25 = vmul.f32 %v8099_v3, %v8099_v3  ;;  %v3787_v5 = vld [vmem:[#allocation13 + $0x168] sm:$0xff]  ;;  %v3518_v40 = vld [vmem:[#allocation13 + $0xe0] sm:$0xff]  ;;  %v3517_v63 = vld [vmem:[#allocation13 + $0xd8] sm:$0xff] }
 0x49b   :  { %v3502_v10 = vld [vmem:[#allocation13 + $0x60] sm:$0xff] }
 0x49c   :  { %v3060_v43 = vadd.f32 %v3059_v7, %v3058_v16  ;;  %v3085_v44 = vrot.slane %v3084_v45, 4  ;;  %v3068_v17 = vrot.slane %v3067_v27, 4  ;;  %v3093_v18 = vadd.f32 %v3092_v14, %v3081_v25  ;;  %v3786_v16 = vld [vmem:[#allocation13 + $0x160] sm:$0xff]  ;;  %v3801_v14 = vld [vmem:[#allocation13 + $0x1d8] sm:$0xff]  ;;  %v3800_v25 = vld [vmem:[#allocation13 + $0x1d0] sm:$0xff] }
 0x49d   :  { %v3501_v7 = vld [vmem:[#allocation13 + $0x58] sm:$0xff] }
 0x49e   :  { %v3061_v59 = vrot.slane %v3060_v43, 2  ;;  %v3086_v47 = vadd.f32 %v3085_v44, %v3084_v45  ;;  %v3069_v49 = vadd.f32 %v3068_v17, %v3067_v27  ;;  %v3094_v24 = vrot.slane %v3093_v18, 4  ;;  %v3785_v45 = vld [vmem:[#allocation13 + $0x158] sm:$0xff]  ;;  %v3516_v27 = vld [vmem:[#allocation13 + $0xd0] sm:$0xff]  ;;  %v3515_v17 = vld [vmem:[#allocation13 + $0xc8] sm:$0xff] }
 0x49f   :  { %v3784_v44 = vld [vmem:[#allocation13 + $0x150] sm:$0xff] }
 0x4a0   :  { %v3062_v2 = vadd.f32 %v3061_v59, %v3060_v43  ;;  %v3087_v29 = vrot.slane %v3086_v47, 2  ;;  %v3070_v15 = vrot.slane %v3069_v49, 2  ;;  %v3095_v30 = vadd.f32 %v3094_v24, %v3093_v18  ;;  %v3500_v43 = vld [vmem:[#allocation13 + $0x50] sm:$0xff]  ;;  %v3799_v18 = vld [vmem:[#allocation13 + $0x1c8] sm:$0xff]  ;;  %v3798_v24 = vld [vmem:[#allocation13 + $0x1c0] sm:$0xff] }
 0x4a1   :  { %v3499_v59 = vld [vmem:[#allocation13 + $0x48] sm:$0xff] }
 0x4a2   :  { %v3088_v31 = vadd.f32 %v3087_v29, %v3086_v47  ;;  %v3071_v32 = vadd.f32 %v3070_v15, %v3069_v49  ;;  %v3096_v9 = vrot.slane %v3095_v30, 2  ;;  %v3063_v54 = vrot.slane %v3062_v2, 1  ;;  %v3783_v47 = vld [vmem:[#allocation13 + $0x148] sm:$0xff]  ;;  %v3514_v49 = vld [vmem:[#allocation13 + $0xc0] sm:$0xff]  ;;  %v3513_v15 = vld [vmem:[#allocation13 + $0xb8] sm:$0xff] }
 0x4a3   :  { %v3782_v29 = vld [vmem:[#allocation13 + $0x140] sm:$0xff] }
 0x4a4   :  { %v3072_v35 = vrot.slane %v3071_v32, 1  ;;  %v3097_v46 = vadd.f32 %v3096_v9, %v3095_v30  ;;  %v3089_v48 = vrot.slane %v3088_v31, 1  ;;  %v3064_v37 = vadd.f32 %v3063_v54, %v3062_v2  ;;  %v3498_v2 = vld [vmem:[#allocation13 + $0x40] sm:$0xff]  ;;  %v3797_v30 = vld [vmem:[#allocation13 + $0x1b8] sm:$0xff]  ;;  %v3512_v9 = vld [vmem:[#allocation13 + $0xb0] sm:$0xff] }
 0x4a5   :  { %v3796_v54 = vld [vmem:[#allocation13 + $0x1b0] sm:$0xff] }
 0x4a6   :  { %v3073_v60 = vadd.f32 %v3072_v35, %v3071_v32  ;;  %v3098_v62 = vrot.slane %v3097_v46, 1  ;;  %v3090_v23 = vadd.f32 %v3089_v48, %v3088_v31  ;;  %v3497_v31 = vld [vmem:[#allocation13 + $0x38] sm:$0xff]  ;;  %v3496_v35 = vld [vmem:[#allocation13 + $0x30] sm:$0xff]  ;;  %v3511_v48 = vld [vmem:[#allocation13 + $0xa8] sm:$0xff] }
 0x4a7   :  { %v3781_v32 = vld [vmem:[#allocation13 + $0x138] sm:$0xff] }
 0x4a8   :  { %3164 = vmatprep.mubr.f32.mxu0 %v3073_v60  ;;  %v3099_v38 = vadd.f32 %v3098_v62, %v3097_v46  ;;  %v3780_v46 = vld [vmem:[#allocation13 + $0x130] sm:$0xff]  ;;  %v3795_v60 = vld [vmem:[#allocation13 + $0x1a8] sm:$0xff] }
 0x4a9   :  { %3165 = vmatmul.mubr.f32.vlgmr.msra.gmra.mxu0 %v3064_v37  ;;  %v3495_v62 = vld [vmem:[#allocation13 + $0x28] sm:$0xff] }
 0x4aa   :  { %3237 = vmatprep.mubr.f32.mxu1 %v3099_v38  ;;  %6153 = vmatpush3.msra.mxu0 %v3505_v51  ;;  %v3779_v37 = vld [vmem:[#allocation13 + $0x128] sm:$0xff]  ;;  %v3510_v38 = vld [vmem:[#allocation13 + $0xa0] sm:$0xff]  ;;  %v3509_v51 = vld [vmem:[#allocation13 + $0x98] sm:$0xff] }
 0x4ab   :  { %3238 = vmatmul.mubr.f32.vlgmr.msra.gmra.mxu1 %v3090_v23  ;;  %6154 = vmatprep.subr.mxu0 %v3520_v13  ;;  %v3794_v23 = vld [vmem:[#allocation13 + $0x1a0] sm:$0xff]  ;;  %v3493_v13 = vld [vmem:[#allocation13 + $0x18] sm:$0xff] }
 0x4ac   :  { %6191 = vmatpush3.msra.mxu1 %v3789_v42  ;;  %6155 = vmatpush3.msra.mxu0 %v3504_v50  ;;  %v3793_v42 = vld [vmem:[#allocation13 + $0x198] sm:$0xff]  ;;  %v3508_v50 = vld [vmem:[#allocation13 + $0x90] sm:$0xff] }
 0x4ad   :  { %6192 = vmatprep.subr.mxu1 %v3804_v36  ;;  %6156 = vmatprep.subr.mxu0 %v3519_v57  ;;  %v3777_v36 = vld [vmem:[#allocation13 + $0x118] sm:$0xff]  ;;  %v3492_v57 = vld [vmem:[#allocation13 + $0x10] sm:$0xff] }
 0x4ae   :  { %6193 = vmatpush3.msra.mxu1 %v3788_v56  ;;  %6157 = vmatpush3.msra.mxu0 %v3503_v1  ;;  %v3792_v56 = vld [vmem:[#allocation13 + $0x190] sm:$0xff]  ;;  %v3507_v1 = vld [vmem:[#allocation13 + $0x88] sm:$0xff] }
 0x4af   :  { %6194 = vmatprep.subr.mxu1 %v3803_v21  ;;  %6158 = vmatprep.subr.mxu0 %v3518_v40  ;;  %v3776_v21 = vld [vmem:[#allocation13 + $0x110] sm:$0xff]  ;;  %v3491_v40 = vld [vmem:[#allocation13 + $0x8] sm:$0xff] }
 0x4b0   :  { %6195 = vmatpush3.msra.mxu1 %v3787_v5  ;;  %6159 = vmatpush3.msra.mxu0 %v3502_v10  ;;  %v3791_v5 = vld [vmem:[#allocation13 + $0x188] sm:$0xff]  ;;  %v3506_v10 = vld [vmem:[#allocation13 + $0x80] sm:$0xff] }
 0x4b1   :  { %6196 = vmatprep.subr.mxu1 %v3802_v11  ;;  %6160 = vmatprep.subr.mxu0 %v3517_v63  ;;  %v3775_v11 = vld [vmem:[#allocation13 + $0x108] sm:$0xff]  ;;  %v3490_v63 = vld [vmem:[#allocation13] sm:$0xff] }
 0x4b2   :  { %6197 = vmatpush3.msra.mxu1 %v3786_v16  ;;  %6161 = vmatpush3.msra.mxu0 %v3501_v7  ;;  %v3790_v16 = vld [vmem:[#allocation13 + $0x180] sm:$0xff] }
 0x4b3   :  { %6198 = vmatprep.subr.mxu1 %v3801_v14  ;;  %6162 = vmatprep.subr.mxu0 %v3516_v27  ;;  %v3774_v14 = vld [vmem:[#allocation13 + $0x100] sm:$0xff] }
 0x4b4   :  { %6199 = vmatpush3.msra.mxu1 %v3785_v45  ;;  %6163 = vmatpush3.msra.mxu0 %v3500_v43 }
 0x4b5   :  { %6200 = vmatprep.subr.mxu1 %v3800_v25  ;;  %6164 = vmatprep.subr.mxu0 %v3515_v17 }
 0x4b6   :  { %6201 = vmatpush3.msra.mxu1 %v3784_v44  ;;  %6165 = vmatpush3.msra.mxu0 %v3499_v59 }
 0x4b7   :  { %6202 = vmatprep.subr.mxu1 %v3799_v18  ;;  %6166 = vmatprep.subr.mxu0 %v3514_v49 }
 0x4b8   :  { %6203 = vmatpush3.msra.mxu1 %v3783_v47  ;;  %6167 = vmatpush3.msra.mxu0 %v3498_v2 }
 0x4b9   :  { %6204 = vmatprep.subr.mxu1 %v3798_v24  ;;  %6168 = vmatprep.subr.mxu0 %v3513_v15 }
 0x4ba   :  { %6205 = vmatpush3.msra.mxu1 %v3782_v29  ;;  %6169 = vmatpush3.msra.mxu0 %v3497_v31 }
 0x4bb   :  { %6206 = vmatprep.subr.mxu1 %v3797_v30  ;;  %6170 = vmatprep.subr.mxu0 %v3512_v9 }
 0x4bc   :  { %6207 = vmatpush3.msra.mxu1 %v3781_v32  ;;  %6171 = vmatpush3.msra.mxu0 %v3496_v35  ;;  %v3253_v32 = vld [vmem:[#allocation10 + $0x1] ss:$4 sm:$0x3] }
 0x4bd   :  { %6208 = vmatprep.subr.mxu1 %v3796_v54  ;;  %6172 = vmatprep.subr.mxu0 %v3511_v48  ;;  %v3278_v48 = vrot.slane %v3253_v32, %v7480_v28 }
 0x4be   :  { %6209 = vmatpush3.msra.mxu1 %v3780_v46  ;;  %6173 = vmatpush3.msra.mxu0 %v3495_v62  ;;  %v3274_v46 = vrot.slane %v3253_v32, %v7474_v20 }
 0x4bf   :  { %6210 = vmatprep.subr.mxu1 %v3795_v60  ;;  %6174 = vmatprep.subr.mxu0 %v3510_v38  ;;  %v3310_v60 = vld [vmem:[#allocation10 + $0x2] ss:$4 sm:$0x3] }
 0x4c0   :  { %6211 = vmatpush3.msra.mxu1 %v3779_v37  ;;  %6175 = vmatpush3.msra.mxu0 %v3494_v41 }
 0x4c1   :  { %6212 = vmatprep.subr.mxu1 %v3794_v23  ;;  %6176 = vmatprep.subr.mxu0 %v3509_v51 }
 0x4c2   :  { %6213 = vmatpush3.msra.mxu1 %v3778_v34  ;;  %6177 = vmatpush3.msra.mxu0 %v3493_v13 }
 0x4c3   :  { %6214 = vmatprep.subr.mxu1 %v3793_v42  ;;  %6178 = vmatprep.subr.mxu0 %v3508_v50 }
 0x4c4   :  { %6215 = vmatpush3.msra.mxu1 %v3777_v36  ;;  %6179 = vmatpush3.msra.mxu0 %v3492_v57  ;;  %v3319_v36 = vrot.slane %v3310_v60, %v7480_v28 }
 0x4c5   :  { %6216 = vmatprep.subr.mxu1 %v3792_v56  ;;  %6180 = vmatprep.subr.mxu0 %v3507_v1 }
 0x4c6   :  { %6217 = vmatpush3.msra.mxu1 %v3776_v21  ;;  %6181 = vmatpush3.msra.mxu0 %v3491_v40 }
 0x4c7   :  { %6218 = vmatprep.subr.mxu1 %v3791_v5  ;;  %6182 = vmatprep.subr.mxu0 %v3506_v10 }
 0x4c8   :  { %6219 = vmatpush3.msra.mxu1 %v3775_v11  ;;  %6183 = vmatpush3.msra.mxu0 %v3490_v63 }
 0x4c9   :  { %6220 = vmatprep.subr.mxu1 %v3790_v16 }
 0x4ca   :  { %6221 = vmatpush3.msra.mxu1 %v3774_v14 }
 0x569   :  { %v3166_v7 = vpop.f32.mrf.mxu0 }
 0x56a   :  { %v3171_v45 = vmul.f32 0.001953125, %v3166_v7 }
 0x56b   :  { %v3168_v27 = vpop.f32.mrf.mxu0  ;;  %v3239_v25 = vpop.f32.mrf.mxu1 }
 0x56c   :  { %v3246_v43 = vmul.f32 %v3171_v45, %v3171_v45  ;;  %v3172_v44 = vmul.f32 0.001953125, %v3168_v27  ;;  %v3244_v17 = vmul.f32 0.001953125, %v3239_v25  ;;  %v3257_v31 = vrot.slane %v3171_v45, %v7474_v20 }
 0x56d   :  { %v3241_v18 = vpop.f32.mrf.mxu1 }
 0x56e   :  { %v3247_v59 = vmul.f32 %v3172_v44, %v3172_v44  ;;  %v3248_v47 = vsub.f32 %v3244_v17, %v3246_v43  ;;  %v3245_v49 = vmul.f32 0.001953125, %v3241_v18  ;;  %v3261_v9 = vrot.slane %v3172_v44, %v7474_v20 }
 0x56f   :  { %v3262_v54 = vsub.f32 %v8066_v33, %v3257_v31  ;;  %v3264_v35 = vsub.f32 %v8064_v61, %v3257_v31  ;;  %v3266_v62 = vsub.f32 %v8074_v12, %v3257_v31  ;;  %v3268_v37 = vsub.f32 %v8091_v58, %v3257_v31 }
 0x570   :  { %v3250_v24 = vmax.f32 %v3248_v47, 0.0  ;;  %v3249_v2 = vsub.f32 %v3245_v49, %v3247_v59  ;;  %v3263_v38 = vsub.f32 %v8070_v39, %v3261_v9  ;;  %v3265_v23 = vsub.f32 %v8068_v4, %v3261_v9 }
 0x571   :  { %v3267_v41 = vsub.f32 %v8086_v53, %v3261_v9  ;;  %v3269_v33 = vsub.f32 %v8099_v3, %v3261_v9  ;;  %v3315_v61 = vrot.slane %v3310_v60, %v7474_v20  ;;  %v3281_v51 = vmul.f32 %v3274_v46, %v3262_v54 }
 0x572   :  { %v3289_v29 = vadd.f32 1e-05, %v3250_v24  ;;  %v3251_v15 = vmax.f32 %v3249_v2, 0.0  ;;  %v3283_v42 = vmul.f32 %v3274_v46, %v3264_v35  ;;  %v3285_v50 = vmul.f32 %v3274_v46, %v3266_v62 }
 0x573   :  { %v3287_v58 = vmul.f32 %v3274_v46, %v3268_v37  ;;  %v3282_v56 = vmul.f32 %v3278_v48, %v3263_v38  ;;  %v3284_v39 = vmul.f32 %v3278_v48, %v3265_v23  ;;  %v3286_v57 = vmul.f32 %v3278_v48, %v3267_v41 }
 0x574   :  { %6685 = vrsqrt.f32 %v3289_v29  ;;  %v3290_v30 = vadd.f32 1e-05, %v3251_v15  ;;  %v3288_v1 = vmul.f32 %v3278_v48, %v3269_v33 }
 0x576   :  { %6687 = vrsqrt.f32 %v3290_v30 }
 0x581   :  { %v6686_v34 = vpop.eup %6685 }
 0x582   :  { %v3296_v13 = vrot.slane %v6686_v34, %v7474_v20 }
 0x583   :  { %v6688_v12 = vpop.eup %6687 }
 0x584   :  { %v3301_v4 = vmul.f32 %v3296_v13, %v3281_v51  ;;  %v3300_v53 = vrot.slane %v6688_v12, %v7474_v20  ;;  %v3303_v21 = vmul.f32 %v3296_v13, %v3283_v42  ;;  %v3305_v3 = vmul.f32 %v3296_v13, %v3285_v50 }
 0x585   :  { %v3307_v5 = vmul.f32 %v3296_v13, %v3287_v58 }
 0x586   :  { %v3302_v40 = vmul.f32 %v3300_v53, %v3282_v56  ;;  %v3306_v11 = vmul.f32 %v3300_v53, %v3286_v57  ;;  %v3304_v10 = vmul.f32 %v3300_v53, %v3284_v39  ;;  %v3322_v16 = vadd.f32 %v3315_v61, %v3301_v4 }
 0x587   :  { %v3308_v63 = vmul.f32 %v3300_v53, %v3288_v1  ;;  %v3324_v7 = vadd.f32 %v3315_v61, %v3303_v21  ;;  %v3326_v25 = vadd.f32 %v3315_v61, %v3305_v3  ;;  %v3328_v43 = vadd.f32 %v3315_v61, %v3307_v5 }
 0x588   :  { %v3323_v14 = vadd.f32 %v3319_v36, %v3302_v40  ;;  %v3325_v45 = vadd.f32 %v3319_v36, %v3304_v10  ;;  %v3327_v27 = vadd.f32 %v3319_v36, %v3306_v11 }
 0x589   :  { %v3329_v44 = vadd.f32 %v3319_v36, %v3308_v63 }
 0x58a   :  { %v3338_v17 = vcombine.low %v3322_v16, %v3323_v14  ;;  %v3339_v18 = vcombine.high %v3322_v16, %v3323_v14  ;;  %v3356_v59 = vcombine.low %v3324_v7, %v3325_v45  ;;  %v3357_v47 = vcombine.high %v3324_v7, %v3325_v45 }
 0x58b   :  { %v3374_v49 = vcombine.low %v3326_v25, %v3327_v27  ;;  %v3375_v24 = vcombine.high %v3326_v25, %v3327_v27  ;;  %v3392_v2 = vcombine.low %v3328_v43, %v3329_v44  ;;  %v3393_v29 = vcombine.high %v3328_v43, %v3329_v44 }
 0x58c   :  { %v3346_v15 = vrot.slane %v3338_v17, %v7600_v22  ;;  %v3353_v30 = vrot.slane %v3339_v18, %v7600_v22  ;;  %v3364_v31 = vrot.slane %v3356_v59, %v7600_v22  ;;  %v3371_v32 = vrot.slane %v3357_v47, %v7600_v22 }
 0x58d   :  { %v8125_v9 = vrot.slane %v3374_v49, %v7600_v22  ;;  %v8128_v54 = vrot.slane %v3375_v24, %v7600_v22  ;;  %v8131_v35 = vrot.slane %v3392_v2, %v7600_v22  ;;  %v8134_v46 = vrot.slane %v3393_v29, %v7600_v22 }
 0x58e   :  { %v3354_v48 = vcombine.high %v3346_v15, %v3346_v15  ;;  %v3355_v60 = vcombine.high %v3353_v30, %v3353_v30  ;;  %v3372_v62 = vcombine.high %v3364_v31, %v3364_v31  ;;  %v3373_v37 = vcombine.high %v3371_v32, %v3371_v32 }
 0x58f   :  { %v5892_v38 = vrot.slane %v3346_v15, 9  ;;  %v5894_v23 = vrot.slane %v3353_v30, 9  ;;  %v5896_v41 = vrot.slane %v3364_v31, 9  ;;  %v5898_v34 = vrot.slane %v3371_v32, 9 }
 0x590   :  { %v5893_v33 = vrot.slane %v3354_v48, 9  ;;  %v5895_v61 = vrot.slane %v3355_v60, 9  ;;  %v5897_v51 = vrot.slane %v3372_v62, 9  ;;  %v5899_v42 = vrot.slane %v3373_v37, 9 }
 0x591   :  { %v3474_v13 = vmax.f32 %v3346_v15, %v5892_v38  ;;  %v3476_v36 = vmax.f32 %v3353_v30, %v5894_v23  ;;  %v3478_v12 = vmax.f32 %v3364_v31, %v5896_v41  ;;  %v3480_v50 = vmax.f32 %v3371_v32, %v5898_v34 }
 0x592   :  { %v3475_v58 = vmax.f32 %v3354_v48, %v5893_v33  ;;  %v3477_v56 = vmax.f32 %v3355_v60, %v5895_v61  ;;  %v3479_v39 = vmax.f32 %v3372_v62, %v5897_v51  ;;  %v3481_v57 = vmax.f32 %v3373_v37, %v5899_v42 }
 0x593   :  { %v3545_v4 = vrot.slane %v3474_v13, %v7595_v26  ;;  %v3561_v53 = vrot.slane %v3476_v36, %v7595_v26  ;;  %v3577_v21 = vrot.slane %v3478_v12, %v7595_v26  ;;  %v3593_v1 = vrot.slane %v3480_v50, %v7595_v26 }
 0x594   :  { %v3553_v3 = vrot.slane %v3475_v58, %v7595_v26  ;;  %v3569_v5 = vrot.slane %v3477_v56, %v7595_v26  ;;  %v3585_v40 = vrot.slane %v3479_v39, %v7595_v26  ;;  %v3601_v11 = vrot.slane %v3481_v57, %v7595_v26 }
 0x595   :  { %v3541_v10 = vrot.slane %v3474_v13, %v7474_v20  ;;  %v3549_v16 = vrot.slane %v3475_v58, %v7474_v20  ;;  %v3557_v63 = vrot.slane %v3476_v36, %v7474_v20  ;;  %v3565_v14 = vrot.slane %v3477_v56, %v7474_v20 }
 0x596   :  { %v3673_v7 = vsel %vm2048_vm0, %v3553_v3, %v3545_v4  ;;  %v3573_v45 = vrot.slane %v3478_v12, %v7474_v20  ;;  %v3581_v27 = vrot.slane %v3479_v39, %v7474_v20  ;;  %v3589_v25 = vrot.slane %v3480_v50, %v7474_v20 }
 0x597   :  { %v3674_v43 = vsel %vm2050_vm2, %v3561_v53, %v3673_v7  ;;  %v3597_v44 = vrot.slane %v3481_v57, %v7474_v20  ;;  %v3666_v17 = vsel %vm2048_vm0, %v3549_v16, %v3541_v10  ;;  %v3390_v18 = vcombine.high %v8125_v9, %v8125_v9 }
 0x598   :  { %v3675_v59 = vsel %vm2052_vm4, %v3569_v5, %v3674_v43  ;;  %v3667_v47 = vsel %vm2050_vm2, %v3557_v63, %v3666_v17  ;;  %v3391_v49 = vcombine.high %v8128_v54, %v8128_v54  ;;  %v3408_v24 = vcombine.high %v8131_v35, %v8131_v35 }
 0x599   :  { %v3676_v2 = vsel %vm2054_vm5, %v3577_v21, %v3675_v59  ;;  %v3668_v29 = vsel %vm2052_vm4, %v3565_v14, %v3667_v47  ;;  %v3409_v15 = vcombine.high %v8134_v46, %v8134_v46  ;;  %v5900_v30 = vrot.slane %v8125_v9, 9 }
 0x59a   :  { %v3677_v31 = vsel %vm2056_vm6, %v3585_v40, %v3676_v2  ;;  %v3669_v32 = vsel %vm2054_vm5, %v3573_v45, %v3668_v29  ;;  %v5901_v48 = vrot.slane %v3390_v18, 9  ;;  %v5902_v60 = vrot.slane %v8128_v54, 9 }
 0x59b   :  { %v3678_v62 = vsel %vm2058_vm8, %v3593_v1, %v3677_v31  ;;  %v3670_v37 = vsel %vm2056_vm6, %v3581_v27, %v3669_v32  ;;  %v5903_v38 = vrot.slane %v3391_v49, 9  ;;  %v5904_v23 = vrot.slane %v8131_v35, 9  ;;  %v3885_v31 = vld [vmem:[#allocation4] sm:$0x1]  ;;  %v3891_v32 = vld [vmem:[#allocation4 + $0x4] sm:$0x1] }
 0x59c   :  { %v3679_v41 = vsel %vm2060_vm9, %v3601_v11, %v3678_v62  ;;  %v3671_v34 = vsel %vm2058_vm8, %v3589_v25, %v3670_v37  ;;  %v5905_v33 = vrot.slane %v3408_v24, 9  ;;  %v5906_v61 = vrot.slane %v8134_v46, 9  ;;  %v6577_v62 = vld [vmem:[#allocation14 + $0x60] ss:$8 sps:$4 sm:$0xff]   ;;  %v6579_v37 = vld [vmem:[#allocation14 + $0x64] ss:$8 sps:$4 sm:$0xff]  }
 0x59d   :  { %3762 = vmatprep.mubr.f32.mxu0 %v3679_v41  ;;  %3870 = vmatprep.mubr.f32.mxu1 %v3679_v41  ;;  %v3672_v51 = vsel %vm2060_vm9, %v3597_v44, %v3671_v34  ;;  %v5907_v42 = vrot.slane %v3409_v15, 9  ;;  %v3482_v13 = vmax.f32 %v8125_v9, %v5900_v30  ;;  %v3483_v36 = vmax.f32 %v3390_v18, %v5901_v48  ;;  %v6576_v30 = vld [vmem:[#allocation14 + $0x74] ss:$8 sps:$4 sm:$0xff]  }
 0x59e   :  { %3763 = vmatmul.mubr.f32.vlgmr.msra.gmra.mxu0 %v3672_v51  ;;  %3871 = vmatmul.mubr.f32.vlgmr.msra.gmra.mxu1 %v3672_v51  ;;  %v3484_v12 = vmax.f32 %v8128_v54, %v5902_v60  ;;  %v3485_v50 = vmax.f32 %v3391_v49, %v5903_v38  ;;  %v3486_v58 = vmax.f32 %v8131_v35, %v5904_v23  ;;  %v3886_v48 = vsel %vm7860_vm11, 0, %v3885_v31  ;;  %v3888_v38 = vld [vmem:[#allocation4 + $0x8] sm:$0x1]  ;;  %v3894_v23 = vld [vmem:[#allocation4 + $0xc] sm:$0x1] }
 0x59f   :  { %v3487_v56 = vmax.f32 %v3408_v24, %v5905_v33  ;;  %v3609_v39 = vrot.slane %v3482_v13, %v7595_v26  ;;  %v3617_v57 = vrot.slane %v3483_v36, %v7595_v26  ;;  %v3488_v4 = vmax.f32 %v8134_v46, %v5906_v61  ;;  %4215 = vmatprep.subr.bf16.mxu1 %v6576_v30  ;;  %v6580_v33 = vld [vmem:[#allocation14 + $0xf0] ss:$8 sps:$4 sm:$0xff]   ;;  %v6582_v61 = vld [vmem:[#allocation14 + $0xf4] ss:$8 sps:$4 sm:$0xff]  }
 0x5a0   :  { %v3489_v53 = vmax.f32 %v3409_v15, %v5907_v42  ;;  %v3625_v21 = vrot.slane %v3484_v12, %v7595_v26  ;;  %v3633_v9 = vrot.slane %v3485_v50, %v7595_v26  ;;  %v3605_v3 = vrot.slane %v3482_v13, %v7474_v20  ;;  %v6574_v15 = vld [vmem:[#allocation14 + $0x70] ss:$8 sps:$4 sm:$0xff]   ;;  %3887 = vst [vmem:[#allocation4] sm:$0x1] %v3886_v48  ;;  %v6585_v42 = vld [vmem:[#allocation14 + $0x54] ss:$8 sps:$4 sm:$0xff]  }
 0x5a1   :  { %v3687_v1 = vsel %vm2048_vm0, %v3617_v57, %v3609_v39  ;;  %v3613_v54 = vrot.slane %v3483_v36, %v7474_v20  ;;  %v3641_v35 = vrot.slane %v3486_v58, %v7595_v26  ;;  %v3621_v40 = vrot.slane %v3484_v12, %v7474_v20  ;;  %4216 = vmatpush1.bf16.msra.mxu1 %v6574_v15  ;;  %v6583_v51 = vld [vmem:[#allocation14 + $0x50] ss:$8 sps:$4 sm:$0xff]   ;;  %v6588_v13 = vld [vmem:[#allocation14 + $0xe4] ss:$8 sps:$4 sm:$0xff]   ;;  %v6586_v12 = vld [vmem:[#allocation14 + $0xe0] ss:$8 sps:$4 sm:$0xff]  }
 0x5a2   :  { %v3688_v5 = vsel %vm2050_vm2, %v3625_v21, %v3687_v1  ;;  %v3649_v11 = vrot.slane %v3487_v56, %v7595_v26  ;;  %v3629_v10 = vrot.slane %v3485_v50, %v7474_v20  ;;  %v3657_v63 = vrot.slane %v3488_v4, %v7595_v26  ;;  %4217 = vmatprep.subr.bf16.mxu1 %v6579_v37  ;;  %v6591_v36 = vld [vmem:[#allocation14 + $0x44] ss:$8 sps:$4 sm:$0xff]   ;;  %v6589_v50 = vld [vmem:[#allocation14 + $0x40] ss:$8 sps:$4 sm:$0xff]   ;;  %v6595_v39 = vld [vmem:[#allocation14 + $0x30] ss:$8 sps:$4 sm:$0xff]  }
 0x5a3   :  { %v3689_v46 = vsel %vm2052_vm4, %v3633_v9, %v3688_v5  ;;  %v3680_v16 = vsel %vm2048_vm0, %v3613_v54, %v3605_v3  ;;  %v3637_v7 = vrot.slane %v3486_v58, %v7474_v20  ;;  %v3665_v27 = vrot.slane %v3489_v53, %v7595_v26  ;;  %4086 = vmatprep.subr.bf16.mxu0 %v6582_v61  ;;  %v6594_v58 = vld [vmem:[#allocation14 + $0xd4] ss:$8 sps:$4 sm:$0xff]   ;;  %v6600_v57 = vld [vmem:[#allocation14 + $0xc4] ss:$8 sps:$4 sm:$0xff]   ;;  %v6601_v21 = vld [vmem:[#allocation14 + $0x20] ss:$8 sps:$4 sm:$0xff]  }
 0x5a4   :  { %v3690_v14 = vsel %vm2054_vm5, %v3641_v35, %v3689_v46  ;;  %v3681_v45 = vsel %vm2050_vm2, %v3621_v40, %v3680_v16  ;;  %v3645_v43 = vrot.slane %v3487_v56, %v7474_v20  ;;  %v3653_v18 = vrot.slane %v3488_v4, %v7474_v20  ;;  %4087 = vmatpush1.bf16.msra.mxu0 %v6580_v33  ;;  %v6597_v56 = vld [vmem:[#allocation14 + $0x34] ss:$8 sps:$4 sm:$0xff]   ;;  %v6603_v4 = vld [vmem:[#allocation14 + $0x24] ss:$8 sps:$4 sm:$0xff]   ;;  %v6604_v3 = vld [vmem:[#allocation14 + $0xb0] ss:$8 sps:$4 sm:$0xff]  }
 0x5a5   :  { %v3691_v25 = vsel %vm2056_vm6, %v3649_v11, %v3690_v14  ;;  %v3682_v44 = vsel %vm2052_vm4, %v3629_v10, %v3681_v45  ;;  %v3661_v49 = vrot.slane %v3489_v53, %v7474_v20  ;;  %v3892_v60 = vsel %vm7873_vm13, 0, %v3891_v32  ;;  %4218 = vmatpush1.bf16.msra.mxu1 %v6577_v62  ;;  %4088 = vmatprep.subr.bf16.mxu0 %v6588_v13  ;;  %v6598_v53 = vld [vmem:[#allocation14 + $0xc0] ss:$8 sps:$4 sm:$0xff]   ;;  %v6606_v9 = vld [vmem:[#allocation14 + $0xb4] ss:$8 sps:$4 sm:$0xff]  }
 0x5a6   :  { %v3692_v17 = vsel %vm2058_vm8, %v3657_v63, %v3691_v25  ;;  %v3683_v59 = vsel %vm2054_vm5, %v3637_v7, %v3682_v44  ;;  %3893 = vst [vmem:[#allocation4 + $0x4] sm:$0x1] %v3892_v60  ;;  %v3889_v41 = vsel %vm7860_vm11, 0, %v3888_v38  ;;  %v3895_v34 = vsel %vm7873_vm13, 0, %v3894_v23  ;;  %4219 = vmatprep.subr.bf16.mxu1 %v6585_v42  ;;  %v6609_v1 = vld [vmem:[#allocation14 + $0x14] ss:$8 sps:$4 sm:$0xff]  }
 0x5a7   :  { %v3693_v47 = vsel %vm2060_vm9, %v3665_v27, %v3692_v17  ;;  %v3684_v24 = vsel %vm2056_vm6, %v3645_v43, %v3683_v59  ;;  %3890 = vst [vmem:[#allocation4 + $0x8] sm:$0x1] %v3889_v41  ;;  %3896 = vst [vmem:[#allocation4 + $0xc] sm:$0x1] %v3895_v34  ;;  %v6607_v54 = vld [vmem:[#allocation14 + $0x10] ss:$8 sps:$4 sm:$0xff]  }
 0x5a8   :  { %3767 = vmatprep.mubr.f32.mxu0 %v3693_v47  ;;  %3875 = vmatprep.mubr.f32.mxu1 %v3693_v47  ;;  %v3685_v2 = vsel %vm2058_vm8, %v3653_v18, %v3684_v24  ;;  %v6612_v35 = vld [vmem:[#allocation14 + $0xa4] ss:$8 sps:$4 sm:$0xff]   ;;  %v6610_v40 = vld [vmem:[#allocation14 + $0xa0] ss:$8 sps:$4 sm:$0xff]   ;;  %v6618_v46 = vld [vmem:[#allocation14 + $0x94] ss:$8 sps:$4 sm:$0xff]  }
 0x5a9   :  { %v3686_v29 = vsel %vm2060_vm9, %v3661_v49, %v3685_v2  ;;  %4220 = vmatpush1.bf16.msra.mxu1 %v6583_v51  ;;  %4089 = vmatpush1.bf16.msra.mxu0 %v6586_v12  ;;  %v6615_v5 = vld [vmem:[#allocation14 + $0x4] ss:$8 sps:$4 sm:$0xff]   ;;  %v6613_v11 = vld [vmem:[#allocation14] ss:$8 sps:$4 sm:$0xff]   ;;  %v6616_v10 = vld [vmem:[#allocation14 + $0x90] ss:$8 sps:$4 sm:$0xff]  }
 0x5aa   :  { %3768 = vmatmul.mubr.f32.gmra.mxu0 %v3686_v29  ;;  %3876 = vmatmul.mubr.f32.gmra.mxu1 %v3686_v29  ;;  %v6622_v16 = vld [vmem:[#allocation14 + $0x84] ss:$8 sps:$4 sm:$0xff]   ;;  %v6620_v63 = vld [vmem:[#allocation14 + $0x80] ss:$8 sps:$4 sm:$0xff]   ;;  %v6625_v14 = vld [vmem:[#allocation14 + $0x174] ss:$8 sps:$4 sm:$0xff]  }
 0x5ab   :  { %4247 = vmatprep.mubr.bf16.mxu1 %v6943_v0  ;;  %4118 = vmatprep.mubr.bf16.mxu0 %v6943_v0  ;;  %v3925_v15 = vld [vmem:[#allocation4] sm:$0xf] }
 0x5ac   :  { %4221 = vmatprep.subr.bf16.mxu1 %v6591_v36  ;;  %4090 = vmatprep.subr.bf16.mxu0 %v6594_v58 }
 0x5ad   :  { %4222 = vmatpush1.bf16.msra.mxu1 %v6589_v50  ;;  %4091 = vmatpush1.bf16.msra.mxu0 %v6592_v55  ;;  %v3928_v30 = vld [vmem:[#allocation4 + $0x4] sm:$0x1] }
 0x5ae   :  { %4223 = vmatprep.subr.bf16.mxu1 %v6597_v56  ;;  %4092 = vmatprep.subr.bf16.mxu0 %v6600_v57  ;;  %v3931_v13 = vld [vmem:[#allocation4 + $0x8] sm:$0xf]  ;;  %v3934_v36 = vld [vmem:[#allocation4 + $0xc] sm:$0x1] }
 0x5b1   :  { %4224 = vmatpush1.bf16.msra.mxu1 %v6595_v39  ;;  %4093 = vmatpush1.bf16.msra.mxu0 %v6598_v53 }
 0x5b2   :  { %4225 = vmatprep.subr.bf16.mxu1 %v6603_v4  ;;  %4094 = vmatprep.subr.bf16.mxu0 %v6606_v9 }
 0x5b5   :  { %4226 = vmatpush1.bf16.msra.mxu1 %v6601_v21  ;;  %4095 = vmatpush1.bf16.msra.mxu0 %v6604_v3 }
 0x5b6   :  { %4227 = vmatprep.subr.bf16.mxu1 %v6609_v1  ;;  %4096 = vmatprep.subr.bf16.mxu0 %v6612_v35 }
 0x5b9   :  { %4228 = vmatpush1.bf16.msra.mxu1 %v6607_v54  ;;  %4097 = vmatpush1.bf16.msra.mxu0 %v6610_v40 }
 0x5ba   :  { %4229 = vmatprep.subr.bf16.mxu1 %v6615_v5  ;;  %4098 = vmatprep.subr.bf16.mxu0 %v6618_v46 }
 0x5bd   :  { %4230 = vmatpush1.bf16.msra.mxu1 %v6613_v11  ;;  %4099 = vmatpush1.bf16.msra.mxu0 %v6616_v10 }
 0x5be   :  { %4100 = vmatprep.subr.bf16.mxu0 %v6622_v16 }
 0x5c1   :  { %4101 = vmatpush1.bf16.msra.mxu0 %v6620_v63 }
 0x5c2   :  { %4373 = vmatprep.subr.bf16.mxu0 %v6625_v14 }
 0x65e   :  { %v6184_v7 = vpop.f32.mrf.mxu0  ;;  %v6222_v45 = vpop.f32.mrf.mxu1 }
 0x660   :  { %v6185_v27 = vpop.f32.mrf.mxu0  ;;  %v6223_v25 = vpop.f32.mrf.mxu1 }
 0x661   :  { %v6186_v43 = vadd.f32 %v6185_v27, %v6184_v7  ;;  %v6224_v44 = vadd.f32 %v6223_v25, %v6222_v45  ;;  %v6623_v7 = vld [vmem:[#allocation14 + $0x170] ss:$8 sps:$4 sm:$0xff]  }
 0x663   :  { %v3881_v17 = vmax.f32 %v6186_v43, %v6224_v44  ;;  %v6628_v43 = vld [vmem:[#allocation14 + $0x164] ss:$8 sps:$4 sm:$0xff]   ;;  %v6626_v44 = vld [vmem:[#allocation14 + $0x160] ss:$8 sps:$4 sm:$0xff]  }
 0x665   :  { %v3883_v18 = vmax.f32 %v3881_v17, 0.0  ;;  %v6631_v17 = vld [vmem:[#allocation14 + $0x154] ss:$8 sps:$4 sm:$0xff]  }
 0x667   :  { %v6062_v59 = vpack.c.bf16 %v3883_v18, %v3883_v18  ;;  %v6629_v18 = vld [vmem:[#allocation14 + $0x150] ss:$8 sps:$4 sm:$0xff]  }
 0x669   :  { %v3906_v47 = vshrl.u32 %v6062_v59, 16  ;;  %v3909_v24 = vshll.u32 %v6062_v59, 16  ;;  %v6634_v59 = vld [vmem:[#allocation14 + $0x144] ss:$8 sps:$4 sm:$0xff]  }
 0x66a   :  { %v6187_v2 = vpop.f32.mrf.mxu0  ;;  %v6225_v29 = vpop.f32.mrf.mxu1 }
 0x66b   :  { %v3908_v49 = vrot.slane %v3906_v47, 7  ;;  %v6632_v47 = vld [vmem:[#allocation14 + $0x140] ss:$8 sps:$4 sm:$0xff]  }
 0x66c   :  { %v6188_v48 = vpop.f32.mrf.mxu0  ;;  %v6226_v60 = vpop.f32.mrf.mxu1 }
 0x66d   :  { %v3911_v31 = vor.u32 %v3909_v24, %v3908_v49  ;;  %v3912_v32 = vrot.slane %v3908_v49, 4  ;;  %v6189_v62 = vadd.f32 %v6188_v48, %v6187_v2  ;;  %v6227_v37 = vadd.f32 %v6226_v60, %v6225_v29  ;;  %v6637_v49 = vld [vmem:[#allocation14 + $0x134] ss:$8 sps:$4 sm:$0xff]   ;;  %v6640_v24 = vld [vmem:[#allocation14 + $0x124] ss:$8 sps:$4 sm:$0xff]  }
 0x66e   :  { %v6638_v2 = vld [vmem:[#allocation14 + $0x120] ss:$8 sps:$4 sm:$0xff]   ;;  %v6643_v29 = vld [vmem:[#allocation14 + $0x114] ss:$8 sps:$4 sm:$0xff]  }
 0x66f   :  { %v3926_v38 = vsel %vm7971_vm14, %v3911_v31, %v3925_v15  ;;  %v3929_v23 = vsel %vm7860_vm11, %v3912_v32, %v3928_v30  ;;  %v3882_v41 = vmax.f32 %v6189_v62, %v6227_v37  ;;  %v6646_v30 = vld [vmem:[#allocation14 + $0x104] ss:$8 sps:$4 sm:$0xff]   ;;  %v6644_v60 = vld [vmem:[#allocation14 + $0x100] ss:$8 sps:$4 sm:$0xff]  }
 0x670   :  { %3927 = vst [vmem:[#allocation4] sm:$0xf] %v3926_v38  ;;  %3930 = vst [vmem:[#allocation4 + $0x4] sm:$0x1] %v3929_v23 }
 0x671   :  { %v3884_v34 = vmax.f32 %v3882_v41, 0.0 }
 0x673   :  { %v6063_v33 = vpack.c.bf16 %v3884_v34, %v3884_v34  ;;  %v4467_v34 = vld [vmem:[#allocation17 + $0xf8] sm:$0xff] }
 0x674   :  { %4532 = vmatprep.subr.mxu1 %v4467_v34 }
 0x675   :  { %v3914_v61 = vshrl.u32 %v6063_v33, 16  ;;  %v3917_v42 = vshll.u32 %v6063_v33, 16  ;;  %v4466_v33 = vld [vmem:[#allocation17 + $0xf0] sm:$0xff] }
 0x677   :  { %v3916_v51 = vrot.slane %v3914_v61, 7  ;;  %v3937_v58 = vld [vmem:[#allocation4] sm:$0xf]  ;;  %v3955_v9 = vld [vmem:[#allocation4 + $0x4] sm:$0x1]  ;;  %v4465_v61 = vld [vmem:[#allocation17 + $0xe8] sm:$0xff] }
 0x678   :  { %v3958_v39 = vshrl.u32 %v3937_v58, 16  ;;  %v3961_v57 = vshll.u32 %v3937_v58, 16  ;;  %v3967_v19 = vshll.u32 %v3955_v9, 16  ;;  %v4258_v31 = vld [vmem:[#allocation4] sm:$0xe]  ;;  %v4266_v37 = vrot.slane %v3955_v9, 5 }
 0x679   :  { %v3919_v12 = vor.u32 %v3917_v42, %v3916_v51  ;;  %v3920_v50 = vrot.slane %v3916_v51, 4  ;;  %v5944_v62 = vrot.slane %v4258_v31, 9  ;;  %v4464_v51 = vld [vmem:[#allocation17 + $0xe0] sm:$0xff]  ;;  %v4463_v42 = vld [vmem:[#allocation17 + $0xd8] sm:$0xff]  ;;  %v4449_v9 = vld [vmem:[#allocation17 + $0x68] sm:$0xff] }
 0x67a   :  { %v3960_v4 = vrot.slane %v3958_v39, 4  ;;  %v3963_v53 = vrot.slane %v3961_v57, 5  ;;  %v3969_v16 = vrot.slane %v3967_v19, 5  ;;  %v4454_v39 = vld [vmem:[#allocation17 + $0x90] sm:$0xff]  ;;  %v4453_v57 = vld [vmem:[#allocation17 + $0x88] sm:$0xff]  ;;  %v4480_v31 = vld [vmem:[#allocation17 + $0x160] sm:$0xff] }
 0x67b   :  { %v3932_v56 = vsel %vm7971_vm14, %v3919_v12, %v3931_v13  ;;  %v3935_v55 = vsel %vm7860_vm11, %v3920_v50, %v3934_v36  ;;  %v4267_v23 = vsel %vm7231_vm15, %v5944_v62, %v4266_v37  ;;  %v4462_v13 = vld [vmem:[#allocation17 + $0xd0] sm:$0xff]  ;;  %v4461_v36 = vld [vmem:[#allocation17 + $0xc8] sm:$0xff]  ;;  %v4459_v12 = vld [vmem:[#allocation17 + $0xb8] sm:$0xff] }
 0x67c   :  { %3933 = vst [vmem:[#allocation4 + $0x8] sm:$0xf] %v3932_v56  ;;  %3936 = vst [vmem:[#allocation4 + $0xc] sm:$0x1] %v3935_v55  ;;  %v3964_v5 = vor.u32 %v3963_v53, %v3960_v4  ;;  %v4458_v50 = vld [vmem:[#allocation17 + $0xb0] sm:$0xff]  ;;  %v4456_v56 = vld [vmem:[#allocation17 + $0xa0] sm:$0xff] }
 0x67d   :  { %v4455_v55 = vld [vmem:[#allocation17 + $0x98] sm:$0xff]  ;;  %v4452_v4 = vld [vmem:[#allocation17 + $0x80] sm:$0xff]  ;;  %v4441_v19 = vld [vmem:[#allocation17 + $0x28] sm:$0xff] }
 0x67e   :  { %v3965_v8 = vrot.slane %v3964_v5, 4  ;;  %v4451_v53 = vld [vmem:[#allocation17 + $0x78] sm:$0xff]  ;;  %v4444_v5 = vld [vmem:[#allocation17 + $0x40] sm:$0xff] }
 0x67f   :  { %v4476_v62 = vld [vmem:[#allocation17 + $0x140] sm:$0xff]  ;;  %v4475_v37 = vld [vmem:[#allocation17 + $0x138] sm:$0xff] }
 0x680   :  { %v3970_v45 = vsel %vm7177_vm12, %v3965_v8, %v3969_v16  ;;  %v4439_v8 = vld [vmem:[#allocation17 + $0x18] sm:$0xff]  ;;  %v4437_v16 = vld [vmem:[#allocation17 + $0x8] sm:$0xff] }
 0x683   :  { %v3938_v21 = vld [vmem:[#allocation4 + $0x8] sm:$0xf]  ;;  %v3956_v1 = vld [vmem:[#allocation4 + $0xc] sm:$0x1] }
 0x684   :  { %v3972_v3 = vshrl.u32 %v3938_v21, 16  ;;  %v3975_v54 = vshll.u32 %v3938_v21, 16  ;;  %v5927_v35 = vcombine.low %v3937_v58, %v3938_v21  ;;  %v3981_v46 = vshll.u32 %v3956_v1, 16  ;;  %v4259_v15 = vld [vmem:[#allocation4 + $0x8] sm:$0xe]  ;;  %v4450_v21 = vld [vmem:[#allocation17 + $0x70] sm:$0xff] }
 0x685   :  { %v5945_v32 = vrot.slane %v4259_v15, 9  ;;  %v4270_v48 = vrot.slane %v3956_v1, 5  ;;  %v4457_v58 = vld [vmem:[#allocation17 + $0xa8] sm:$0xff]  ;;  %v4448_v1 = vld [vmem:[#allocation17 + $0x60] sm:$0xff]  ;;  %v4483_v15 = vld [vmem:[#allocation17 + $0x178] sm:$0xff] }
 0x686   :  { %v3974_v40 = vrot.slane %v3972_v3, 4  ;;  %v3977_v11 = vrot.slane %v3975_v54, 5  ;;  %4248 = vmatmul.mubr.bf16.vlgmr.msra.gmra.mxu1 %v5927_v35  ;;  %v3983_v14 = vrot.slane %v3981_v46, 5  ;;  %v4447_v3 = vld [vmem:[#allocation17 + $0x58] sm:$0xff]  ;;  %v4446_v54 = vld [vmem:[#allocation17 + $0x50] sm:$0xff]  ;;  %v4445_v35 = vld [vmem:[#allocation17 + $0x48] sm:$0xff] }
 0x687   :  { %v4271_v38 = vsel %vm7231_vm15, %v5945_v32, %v4270_v48  ;;  %4533 = vmatpush1.msra.mxu1 %v4466_v33  ;;  %v4440_v46 = vld [vmem:[#allocation17 + $0x20] sm:$0xff]  ;;  %v4479_v32 = vld [vmem:[#allocation17 + $0x158] sm:$0xff]  ;;  %v4478_v48 = vld [vmem:[#allocation17 + $0x150] sm:$0xff]  ;;  %vm5682_vm15 = vcmask 74752  }
 0x688   :  { %v3978_v10 = vor.u32 %v3977_v11, %v3974_v40  ;;  %v5946_v41 = vcombine.low %v4267_v23, %v4271_v38  ;;  %4534 = vmatprep.subr.mxu1 %v4465_v61  ;;  %v4443_v40 = vld [vmem:[#allocation17 + $0x38] sm:$0xff]  ;;  %v4442_v11 = vld [vmem:[#allocation17 + $0x30] sm:$0xff]  ;;  %v4473_v23 = vld [vmem:[#allocation17 + $0x128] sm:$0xff] }
 0x689   :  { %4535 = vmatpush1.msra.mxu1 %v4464_v51  ;;  %v4474_v38 = vld [vmem:[#allocation17 + $0x130] sm:$0xff] }
 0x68a   :  { %v3979_v63 = vrot.slane %v3978_v10, 4  ;;  %4536 = vmatprep.subr.mxu1 %v4463_v42  ;;  %v4438_v10 = vld [vmem:[#allocation17 + $0x10] sm:$0xff] }
 0x68b   :  { %4537 = vmatpush1.msra.mxu1 %v4462_v13 }
 0x68c   :  { %v3984_v27 = vsel %vm7177_vm12, %v3979_v63, %v3983_v14  ;;  %4538 = vmatprep.subr.mxu1 %v4461_v36  ;;  %v4436_v63 = vld [vmem:[#allocation17] sm:$0xff]  ;;  %v4499_v14 = vld [vmem:[#allocation17 + $0x1f8] sm:$0xff]  ;;  %vm5638_vm12 = vcmask 261120  }
 0x68d   :  { %v5910_v25 = vcombine.low %v3970_v45, %v3984_v27  ;;  %4539 = vmatpush1.msra.mxu1 %v4460_v6  ;;  %v4497_v45 = vld [vmem:[#allocation17 + $0x1e8] sm:$0xff]  ;;  %v4496_v27 = vld [vmem:[#allocation17 + $0x1e0] sm:$0xff] }
 0x68e   :  { %4540 = vmatprep.subr.mxu1 %v4459_v12 }
 0x68f   :  { %4119 = vmatmul.mubr.bf16.vlgmr.msra.gmra.mxu0 %v5910_v25  ;;  %4541 = vmatpush1.msra.mxu1 %v4458_v50  ;;  %v4495_v25 = vld [vmem:[#allocation17 + $0x1d8] sm:$0xff] }
 0x690   :  { %4374 = vmatpush1.bf16.msra.mxu0 %v6623_v7  ;;  %4405 = vmatprep.mubr.bf16.mxu0 %v6943_v0  ;;  %v6641_v0 = vld [vmem:[#allocation14 + $0x110] ss:$8 sps:$4 sm:$0xff]  }
 0x691   :  { %4375 = vmatprep.subr.bf16.mxu0 %v6628_v43  ;;  %4542 = vmatprep.subr.mxu1 %v4457_v58  ;;  %v4498_v7 = vld [vmem:[#allocation17 + $0x1f0] sm:$0xff] }
 0x692   :  { %4543 = vmatpush1.msra.mxu1 %v4456_v56  ;;  %v4494_v43 = vld [vmem:[#allocation17 + $0x1d0] sm:$0xff] }
 0x693   :  { %4544 = vmatprep.subr.mxu1 %v4455_v55 }
 0x694   :  { %4376 = vmatpush1.bf16.msra.mxu0 %v6626_v44  ;;  %4545 = vmatpush1.msra.mxu1 %v4454_v39  ;;  %v4493_v44 = vld [vmem:[#allocation17 + $0x1c8] sm:$0xff] }
 0x695   :  { %4377 = vmatprep.subr.bf16.mxu0 %v6631_v17  ;;  %4546 = vmatprep.subr.mxu1 %v4453_v57  ;;  %v4492_v17 = vld [vmem:[#allocation17 + $0x1c0] sm:$0xff] }
 0x696   :  { %4547 = vmatpush1.msra.mxu1 %v4452_v4 }
 0x697   :  { %4548 = vmatprep.subr.mxu1 %v4451_v53 }
 0x698   :  { %4378 = vmatpush1.bf16.msra.mxu0 %v6629_v18  ;;  %4549 = vmatpush1.msra.mxu1 %v4450_v21  ;;  %v4491_v18 = vld [vmem:[#allocation17 + $0x1b8] sm:$0xff] }
 0x699   :  { %4379 = vmatprep.subr.bf16.mxu0 %v6634_v59  ;;  %4550 = vmatprep.subr.mxu1 %v4449_v9  ;;  %v4490_v59 = vld [vmem:[#allocation17 + $0x1b0] sm:$0xff] }
 0x69a   :  { %4551 = vmatpush1.msra.mxu1 %v4448_v1 }
 0x69b   :  { %4552 = vmatprep.subr.mxu1 %v4447_v3 }
 0x69c   :  { %4380 = vmatpush1.bf16.msra.mxu0 %v6632_v47  ;;  %4553 = vmatpush1.msra.mxu1 %v4446_v54  ;;  %v4489_v47 = vld [vmem:[#allocation17 + $0x1a8] sm:$0xff] }
 0x69d   :  { %4381 = vmatprep.subr.bf16.mxu0 %v6637_v49  ;;  %4554 = vmatprep.subr.mxu1 %v4445_v35  ;;  %v4488_v49 = vld [vmem:[#allocation17 + $0x1a0] sm:$0xff] }
 0x69e   :  { %4555 = vmatpush1.msra.mxu1 %v4444_v5 }
 0x69f   :  { %4556 = vmatprep.subr.mxu1 %v4443_v40 }
 0x6a0   :  { %4382 = vmatpush1.bf16.msra.mxu0 %v6635_v52  ;;  %4557 = vmatpush1.msra.mxu1 %v4442_v11  ;;  %v4487_v52 = vld [vmem:[#allocation17 + $0x198] sm:$0xff] }
 0x6a1   :  { %4383 = vmatprep.subr.bf16.mxu0 %v6640_v24  ;;  %4558 = vmatprep.subr.mxu1 %v4441_v19  ;;  %v4486_v24 = vld [vmem:[#allocation17 + $0x190] sm:$0xff] }
 0x6a2   :  { %4559 = vmatpush1.msra.mxu1 %v4440_v46 }
 0x6a3   :  { %4560 = vmatprep.subr.mxu1 %v4439_v8 }
 0x6a4   :  { %4384 = vmatpush1.bf16.msra.mxu0 %v6638_v2  ;;  %4561 = vmatpush1.msra.mxu1 %v4438_v10  ;;  %v4485_v2 = vld [vmem:[#allocation17 + $0x188] sm:$0xff] }
 0x6a5   :  { %4385 = vmatprep.subr.bf16.mxu0 %v6643_v29  ;;  %4562 = vmatprep.subr.mxu1 %v4437_v16  ;;  %v4484_v29 = vld [vmem:[#allocation17 + $0x180] sm:$0xff] }
 0x6a6   :  { %4563 = vmatpush1.msra.mxu1 %v4436_v63 }
 0x6a7   :  { %4564 = vmatprep.subr.mxu1 %v4499_v14 }
 0x6a8   :  { %4386 = vmatpush1.bf16.msra.mxu0 %v6641_v0  ;;  %4565 = vmatpush2.msra.mxu1 %v4498_v7  ;;  %v4482_v0 = vld [vmem:[#allocation17 + $0x170] sm:$0xff] }
 0x6a9   :  { %4387 = vmatprep.subr.bf16.mxu0 %v6646_v30  ;;  %4566 = vmatprep.subr.mxu1 %v4497_v45  ;;  %v4481_v30 = vld [vmem:[#allocation17 + $0x168] sm:$0xff] }
 0x6aa   :  { %4567 = vmatpush2.msra.mxu1 %v4496_v27 }
 0x6ab   :  { %4568 = vmatprep.subr.mxu1 %v4495_v25 }
 0x6ac   :  { %4388 = vmatpush1.bf16.msra.mxu0 %v6644_v60  ;;  %4569 = vmatpush2.msra.mxu1 %v4494_v43  ;;  %v4477_v60 = vld [vmem:[#allocation17 + $0x148] sm:$0xff] }
 0x6ad   :  { %4605 = vmatprep.subr.mxu0 %v4467_v34  ;;  %4570 = vmatprep.subr.mxu1 %v4493_v44  ;;  %v4471_v34 = vld [vmem:[#allocation17 + $0x118] sm:$0xff] }
 0x6ae   :  { %4571 = vmatpush2.msra.mxu1 %v4492_v17 }
 0x6af   :  { %4406 = vmatmul.mubr.bf16.vlgmr.msra.gmra.mxu0 %v5946_v41  ;;  %4572 = vmatprep.subr.mxu1 %v4491_v18  ;;  %v4472_v41 = vld [vmem:[#allocation17 + $0x120] sm:$0xff] }
 0x6b0   :  { %4606 = vmatpush1.msra.mxu0 %v4466_v33  ;;  %4573 = vmatpush2.msra.mxu1 %v4490_v59  ;;  %v4470_v33 = vld [vmem:[#allocation17 + $0x110] sm:$0xff] }
 0x6b1   :  { %4607 = vmatprep.subr.mxu0 %v4465_v61  ;;  %4574 = vmatprep.subr.mxu1 %v4489_v47  ;;  %v4469_v61 = vld [vmem:[#allocation17 + $0x108] sm:$0xff] }
 0x6b2   :  { %4608 = vmatpush1.msra.mxu0 %v4464_v51  ;;  %4575 = vmatpush2.msra.mxu1 %v4488_v49  ;;  %v4468_v51 = vld [vmem:[#allocation17 + $0x100] sm:$0xff] }
 0x6b3   :  { %4609 = vmatprep.subr.mxu0 %v4463_v42  ;;  %4576 = vmatprep.subr.mxu1 %v4487_v52 }
 0x6b4   :  { %4610 = vmatpush1.msra.mxu0 %v4462_v13  ;;  %4577 = vmatpush2.msra.mxu1 %v4486_v24 }
 0x6b5   :  { %4611 = vmatprep.subr.mxu0 %v4461_v36  ;;  %4578 = vmatprep.subr.mxu1 %v4485_v2 }
 0x6b6   :  { %4612 = vmatpush1.msra.mxu0 %v4460_v6  ;;  %4579 = vmatpush2.msra.mxu1 %v4484_v29 }
 0x6b7   :  { %4613 = vmatprep.subr.mxu0 %v4459_v12  ;;  %4580 = vmatprep.subr.mxu1 %v4483_v15 }
 0x6b8   :  { %4614 = vmatpush1.msra.mxu0 %v4458_v50  ;;  %4581 = vmatpush2.msra.mxu1 %v4482_v0 }
 0x6b9   :  { %4615 = vmatprep.subr.mxu0 %v4457_v58  ;;  %4582 = vmatprep.subr.mxu1 %v4481_v30  ;;  %v4420_v58 = vld [vmem:[#allocation16] ss:$4 sm:$0x3] }
 0x6ba   :  { %4616 = vmatpush1.msra.mxu0 %v4456_v56  ;;  %4583 = vmatpush2.msra.mxu1 %v4480_v31 }
 0x6bb   :  { %4617 = vmatprep.subr.mxu0 %v4455_v55  ;;  %4584 = vmatprep.subr.mxu1 %v4479_v32 }
 0x6bc   :  { %4618 = vmatpush1.msra.mxu0 %v4454_v39  ;;  %4585 = vmatpush2.msra.mxu1 %v4478_v48 }
 0x6bd   :  { %4619 = vmatprep.subr.mxu0 %v4453_v57  ;;  %4586 = vmatprep.subr.mxu1 %v4477_v60 }
 0x6be   :  { %4620 = vmatpush1.msra.mxu0 %v4452_v4  ;;  %4587 = vmatpush2.msra.mxu1 %v4476_v62 }
 0x6bf   :  { %4621 = vmatprep.subr.mxu0 %v4451_v53  ;;  %4588 = vmatprep.subr.mxu1 %v4475_v37  ;;  %v4425_v53 = vrot.slane %v4420_v58, %v7474_v20 }
 0x6c0   :  { %4622 = vmatpush1.msra.mxu0 %v4450_v21  ;;  %4589 = vmatpush2.msra.mxu1 %v4474_v38 }
 0x6c1   :  { %4623 = vmatprep.subr.mxu0 %v4449_v9  ;;  %4590 = vmatprep.subr.mxu1 %v4473_v23  ;;  %v4429_v9 = vrot.slane %v4420_v58, %v7480_v28  ;;  %v5031_v58 = vld [vmem:[#allocation19 + $0x170] sm:$0xff] }
 0x6c2   :  { %4624 = vmatpush1.msra.mxu0 %v4448_v1  ;;  %4591 = vmatpush2.msra.mxu1 %v4472_v41 }
 0x6c3   :  { %4625 = vmatprep.subr.mxu0 %v4447_v3  ;;  %4592 = vmatprep.subr.mxu1 %v4471_v34 }
 0x6c4   :  { %4626 = vmatpush1.msra.mxu0 %v4446_v54  ;;  %4593 = vmatpush2.msra.mxu1 %v4470_v33 }
 0x6c5   :  { %4627 = vmatprep.subr.mxu0 %v4445_v35  ;;  %4594 = vmatprep.subr.mxu1 %v4469_v61 }
 0x6c6   :  { %4628 = vmatpush1.msra.mxu0 %v4444_v5  ;;  %4595 = vmatpush2.msra.mxu1 %v4468_v51 }
 0x6c7   :  { %4629 = vmatprep.subr.mxu0 %v4443_v40 }
 0x6c8   :  { %4630 = vmatpush1.msra.mxu0 %v4442_v11 }
 0x6c9   :  { %4631 = vmatprep.subr.mxu0 %v4441_v19 }
 0x6ca   :  { %4632 = vmatpush1.msra.mxu0 %v4440_v46 }
 0x6cb   :  { %4633 = vmatprep.subr.mxu0 %v4439_v8 }
 0x6cc   :  { %4634 = vmatpush1.msra.mxu0 %v4438_v10 }
 0x6cd   :  { %4635 = vmatprep.subr.mxu0 %v4437_v16 }
 0x6ce   :  { %4636 = vmatpush1.msra.mxu0 %v4436_v63 }
 0x6cf   :  { %4637 = vmatprep.subr.mxu0 %v4499_v14 }
 0x6d0   :  { %4638 = vmatpush2.msra.mxu0 %v4498_v7 }
 0x6d1   :  { %4639 = vmatprep.subr.mxu0 %v4497_v45 }
 0x6d2   :  { %4640 = vmatpush2.msra.mxu0 %v4496_v27 }
 0x6d3   :  { %4641 = vmatprep.subr.mxu0 %v4495_v25 }
 0x6d4   :  { %4642 = vmatpush2.msra.mxu0 %v4494_v43 }
 0x6d5   :  { %4643 = vmatprep.subr.mxu0 %v4493_v44 }
 0x6d6   :  { %4644 = vmatpush2.msra.mxu0 %v4492_v17 }
 0x6d7   :  { %4645 = vmatprep.subr.mxu0 %v4491_v18 }
 0x6d8   :  { %4646 = vmatpush2.msra.mxu0 %v4490_v59 }
 0x6d9   :  { %4647 = vmatprep.subr.mxu0 %v4489_v47 }
 0x6da   :  { %4648 = vmatpush2.msra.mxu0 %v4488_v49 }
 0x6db   :  { %4649 = vmatprep.subr.mxu0 %v4487_v52 }
 0x6dc   :  { %4650 = vmatpush2.msra.mxu0 %v4486_v24 }
 0x6dd   :  { %4651 = vmatprep.subr.mxu0 %v4485_v2 }
 0x6de   :  { %4652 = vmatpush2.msra.mxu0 %v4484_v29 }
 0x6df   :  { %4653 = vmatprep.subr.mxu0 %v4483_v15 }
 0x6e0   :  { %4654 = vmatpush2.msra.mxu0 %v4482_v0 }
 0x6e1   :  { %4655 = vmatprep.subr.mxu0 %v4481_v30 }
 0x6e2   :  { %4656 = vmatpush2.msra.mxu0 %v4480_v31 }
 0x6e3   :  { %4657 = vmatprep.subr.mxu0 %v4479_v32 }
 0x6e4   :  { %4658 = vmatpush2.msra.mxu0 %v4478_v48 }
 0x6e5   :  { %4659 = vmatprep.subr.mxu0 %v4477_v60 }
 0x6e6   :  { %4660 = vmatpush2.msra.mxu0 %v4476_v62 }
 0x6e7   :  { %4661 = vmatprep.subr.mxu0 %v4475_v37 }
 0x6e8   :  { %4662 = vmatpush2.msra.mxu0 %v4474_v38 }
 0x6e9   :  { %4663 = vmatprep.subr.mxu0 %v4473_v23 }
 0x6ea   :  { %4664 = vmatpush2.msra.mxu0 %v4472_v41 }
 0x6eb   :  { %4665 = vmatprep.subr.mxu0 %v4471_v34 }
 0x6ec   :  { %4666 = vmatpush2.msra.mxu0 %v4470_v33 }
 0x6ed   :  { %4667 = vmatprep.subr.mxu0 %v4469_v61 }
 0x6ee   :  { %4668 = vmatpush2.msra.mxu0 %v4468_v51  ;;  %v4857_v51 = vld [vmem:[#allocation19 + $0xf8] sm:$0xff] }
 0x6ef   :  { %6228 = vmatprep.subr.mxu1 %v4857_v51  ;;  %v4843_v51 = vld [vmem:[#allocation19 + $0x88] sm:$0xff] }
 0x746   :  { %v4249_v36 = vpop.f32.mrf.mxu1 }
 0x748   :  { %v4251_v12 = vpop.f32.mrf.mxu1 }
 0x74a   :  { %v4253_v55 = vpop.f32.mrf.mxu1 }
 0x74c   :  { %v4255_v54 = vpop.f32.mrf.mxu1 }
 0x74f   :  { %v4120_v42 = vpop.f32.mrf.mxu0 }
 0x750   :  { %v4250_v56 = vadd.f32 %v4249_v36, %v4120_v42  ;;  %v5048_v42 = vld [vmem:[#allocation19 + $0x1f8] sm:$0xff] }
 0x751   :  { %v4122_v13 = vpop.f32.mrf.mxu0  ;;  %6263 = vmatprep.subr.mxu0 %v5048_v42  ;;  %v5032_v36 = vld [vmem:[#allocation19 + $0x178] sm:$0xff]  ;;  %v5034_v42 = vld [vmem:[#allocation19 + $0x188] sm:$0xff] }
 0x752   :  { %v4252_v57 = vadd.f32 %v4251_v12, %v4122_v13  ;;  %v4841_v13 = vld [vmem:[#allocation19 + $0x78] sm:$0xff]  ;;  %v5047_v12 = vld [vmem:[#allocation19 + $0x1f0] sm:$0xff] }
 0x753   :  { %v4124_v6 = vpop.f32.mrf.mxu0 }
 0x754   :  { %v4254_v1 = vadd.f32 %v4253_v55, %v4124_v6  ;;  %v4856_v6 = vld [vmem:[#allocation19 + $0xf0] sm:$0xff]  ;;  %v5046_v55 = vld [vmem:[#allocation19 + $0x1e8] sm:$0xff] }
 0x755   :  { %v4126_v50 = vpop.f32.mrf.mxu0 }
 0x756   :  { %v4256_v5 = vadd.f32 %v4255_v54, %v4126_v50  ;;  %v4840_v50 = vld [vmem:[#allocation19 + $0x70] sm:$0xff]  ;;  %v4837_v54 = vld [vmem:[#allocation19 + $0x58] sm:$0xff] }
 0x76f   :  { %v4407_v39 = vpop.f32.mrf.mxu0 }
 0x770   :  { %v4416_v4 = vadd.f32 %v4407_v39, %v4250_v56  ;;  %v4855_v56 = vld [vmem:[#allocation19 + $0xe8] sm:$0xff] }
 0x771   :  { %v4409_v21 = vpop.f32.mrf.mxu0  ;;  %v4839_v39 = vld [vmem:[#allocation19 + $0x68] sm:$0xff] }
 0x772   :  { %v4417_v3 = vadd.f32 %v4409_v21, %v4252_v57  ;;  %v8241_v40 = vadd.f32 %v4425_v53, %v4416_v4  ;;  %v5030_v57 = vld [vmem:[#allocation19 + $0x168] sm:$0xff]  ;;  %v4854_v4 = vld [vmem:[#allocation19 + $0xe0] sm:$0xff] }
 0x773   :  { %v4411_v35 = vpop.f32.mrf.mxu0  ;;  %v4838_v21 = vld [vmem:[#allocation19 + $0x60] sm:$0xff] }
 0x774   :  { %v4418_v11 = vadd.f32 %v4411_v35, %v4254_v1  ;;  %v8243_v19 = vadd.f32 %v4429_v9, %v4417_v3  ;;  %v4514_v16 = vmul.f32 %v8241_v40, %v8241_v40  ;;  %v4853_v1 = vld [vmem:[#allocation19 + $0xd8] sm:$0xff] }
 0x775   :  { %v4413_v46 = vpop.f32.mrf.mxu0  ;;  %v5044_v3 = vld [vmem:[#allocation19 + $0x1d8] sm:$0xff] }
 0x776   :  { %v8245_v8 = vadd.f32 %v4425_v53, %v4418_v11  ;;  %v4419_v10 = vadd.f32 %v4413_v46, %v4256_v5  ;;  %v4515_v45 = vmul.f32 %v8243_v19, %v8243_v19  ;;  %v5045_v53 = vld [vmem:[#allocation19 + $0x1e0] sm:$0xff]  ;;  %v5028_v35 = vld [vmem:[#allocation19 + $0x158] sm:$0xff]  ;;  %v4852_v5 = vld [vmem:[#allocation19 + $0xd0] sm:$0xff] }
 0x777   :  { %v5043_v11 = vld [vmem:[#allocation19 + $0x1d0] sm:$0xff] }
 0x778   :  { %v4500_v63 = vadd.f32 %v8245_v8, %v8241_v40  ;;  %v4516_v14 = vmul.f32 %v8245_v8, %v8245_v8  ;;  %v8253_v7 = vadd.f32 %v4429_v9, %v4419_v10  ;;  %v5029_v9 = vld [vmem:[#allocation19 + $0x160] sm:$0xff]  ;;  %v4836_v46 = vld [vmem:[#allocation19 + $0x50] sm:$0xff] }
 0x779   :  { %v5027_v10 = vld [vmem:[#allocation19 + $0x150] sm:$0xff] }
 0x77a   :  { %v4501_v27 = vrot.slane %v4500_v63, 4  ;;  %v4518_v25 = vadd.f32 %v4516_v14, %v4514_v16  ;;  %v4507_v43 = vadd.f32 %v8253_v7, %v8243_v19  ;;  %v4517_v44 = vmul.f32 %v8253_v7, %v8253_v7  ;;  %v4851_v16 = vld [vmem:[#allocation19 + $0xc8] sm:$0xff] }
 0x77b   :  { %v4835_v14 = vld [vmem:[#allocation19 + $0x48] sm:$0xff] }
 0x77c   :  { %v4502_v17 = vadd.f32 %v4501_v27, %v4500_v63  ;;  %v4519_v18 = vrot.slane %v4518_v25, 4  ;;  %v4508_v59 = vrot.slane %v4507_v43, 4  ;;  %v4525_v47 = vadd.f32 %v4517_v44, %v4515_v45  ;;  %v5042_v63 = vld [vmem:[#allocation19 + $0x1c8] sm:$0xff]  ;;  %v4850_v27 = vld [vmem:[#allocation19 + $0xc0] sm:$0xff] }
 0x77d   :  { %v5026_v45 = vld [vmem:[#allocation19 + $0x148] sm:$0xff]  ;;  %v5025_v44 = vld [vmem:[#allocation19 + $0x140] sm:$0xff] }
 0x77e   :  { %v4503_v49 = vrot.slane %v4502_v17, 2  ;;  %v4520_v52 = vadd.f32 %v4519_v18, %v4518_v25  ;;  %v4509_v24 = vadd.f32 %v4508_v59, %v4507_v43  ;;  %v4526_v2 = vrot.slane %v4525_v47, 4  ;;  %v5041_v25 = vld [vmem:[#allocation19 + $0x1c0] sm:$0xff]  ;;  %v5040_v18 = vld [vmem:[#allocation19 + $0x1b8] sm:$0xff] }
 0x77f   :  { %v4834_v43 = vld [vmem:[#allocation19 + $0x40] sm:$0xff]  ;;  %v4833_v59 = vld [vmem:[#allocation19 + $0x38] sm:$0xff] }
 0x780   :  { %v4510_v29 = vrot.slane %v4509_v24, 2  ;;  %v4504_v15 = vadd.f32 %v4503_v49, %v4502_v17  ;;  %v4527_v0 = vadd.f32 %v4526_v2, %v4525_v47  ;;  %v4521_v30 = vrot.slane %v4520_v52, 2  ;;  %v4849_v17 = vld [vmem:[#allocation19 + $0xb8] sm:$0xff]  ;;  %v4848_v49 = vld [vmem:[#allocation19 + $0xb0] sm:$0xff] }
 0x781   :  { %v5024_v47 = vld [vmem:[#allocation19 + $0x138] sm:$0xff]  ;;  %v5023_v2 = vld [vmem:[#allocation19 + $0x130] sm:$0xff] }
 0x782   :  { %v4511_v31 = vadd.f32 %v4510_v29, %v4509_v24  ;;  %v4528_v32 = vrot.slane %v4527_v0, 2  ;;  %v4522_v48 = vadd.f32 %v4521_v30, %v4520_v52  ;;  %v4505_v60 = vrot.slane %v4504_v15, 1  ;;  %v5039_v52 = vld [vmem:[#allocation19 + $0x1b0] sm:$0xff]  ;;  %v4847_v29 = vld [vmem:[#allocation19 + $0xa8] sm:$0xff] }
 0x783   :  { %v4832_v24 = vld [vmem:[#allocation19 + $0x30] sm:$0xff]  ;;  %v5022_v30 = vld [vmem:[#allocation19 + $0x128] sm:$0xff] }
 0x784   :  { %v4512_v62 = vrot.slane %v4511_v31, 1  ;;  %v4529_v37 = vadd.f32 %v4528_v32, %v4527_v0  ;;  %v4523_v38 = vrot.slane %v4522_v48, 1  ;;  %v4506_v34 = vadd.f32 %v4505_v60, %v4504_v15  ;;  %v5038_v15 = vld [vmem:[#allocation19 + $0x1a8] sm:$0xff]  ;;  %v5037_v32 = vld [vmem:[#allocation19 + $0x1a0] sm:$0xff] }
 0x785   :  { %v4831_v0 = vld [vmem:[#allocation19 + $0x28] sm:$0xff]  ;;  %v5021_v60 = vld [vmem:[#allocation19 + $0x120] sm:$0xff] }
 0x786   :  { %v4513_v23 = vadd.f32 %v4512_v62, %v4511_v31  ;;  %v4530_v41 = vrot.slane %v4529_v37, 1  ;;  %v4524_v61 = vadd.f32 %v4523_v38, %v4522_v48  ;;  %v4846_v31 = vld [vmem:[#allocation19 + $0xa0] sm:$0xff]  ;;  %v4845_v62 = vld [vmem:[#allocation19 + $0x98] sm:$0xff] }
 0x787   :  { %v4830_v48 = vld [vmem:[#allocation19 + $0x20] sm:$0xff]  ;;  %v4829_v38 = vld [vmem:[#allocation19 + $0x18] sm:$0xff] }
 0x788   :  { %4596 = vmatprep.mubr.f32.mxu1 %v4513_v23  ;;  %v4531_v33 = vadd.f32 %v4530_v41, %v4529_v37  ;;  %v5036_v37 = vld [vmem:[#allocation19 + $0x198] sm:$0xff]  ;;  %v4844_v41 = vld [vmem:[#allocation19 + $0x90] sm:$0xff] }
 0x789   :  { %4597 = vmatmul.mubr.f32.vlgmr.msra.gmra.mxu1 %v4506_v34  ;;  %v5020_v23 = vld [vmem:[#allocation19 + $0x118] sm:$0xff]  ;;  %v5035_v34 = vld [vmem:[#allocation19 + $0x190] sm:$0xff] }
 0x78a   :  { %4669 = vmatprep.mubr.f32.mxu0 %v4531_v33  ;;  %6229 = vmatpush3.msra.mxu1 %v4841_v13  ;;  %v4828_v33 = vld [vmem:[#allocation19 + $0x10] sm:$0xff]  ;;  %v4827_v13 = vld [vmem:[#allocation19 + $0x8] sm:$0xff] }
 0x78b   :  { %4670 = vmatmul.mubr.f32.vlgmr.msra.gmra.mxu0 %v4524_v61  ;;  %6230 = vmatprep.subr.mxu1 %v4856_v6  ;;  %v5019_v61 = vld [vmem:[#allocation19 + $0x110] sm:$0xff]  ;;  %v4842_v6 = vld [vmem:[#allocation19 + $0x80] sm:$0xff] }
 0x78c   :  { %6264 = vmatpush3.msra.mxu0 %v5032_v36  ;;  %6231 = vmatpush3.msra.mxu1 %v4840_v50  ;;  %v5018_v36 = vld [vmem:[#allocation19 + $0x108] sm:$0xff]  ;;  %v4826_v50 = vld [vmem:[#allocation19] sm:$0xff] }
 0x78d   :  { %6265 = vmatprep.subr.mxu0 %v5047_v12  ;;  %6232 = vmatprep.subr.mxu1 %v4855_v56  ;;  %v5033_v12 = vld [vmem:[#allocation19 + $0x180] sm:$0xff]  ;;  %v6945_v56 = vmov 0.0  }
 0x78e   :  { %6266 = vmatpush3.msra.mxu0 %v5031_v58  ;;  %6233 = vmatpush3.msra.mxu1 %v4839_v39  ;;  %v5017_v58 = vld [vmem:[#allocation19 + $0x100] sm:$0xff] }
 0x78f   :  { %6267 = vmatprep.subr.mxu0 %v5046_v55  ;;  %6234 = vmatprep.subr.mxu1 %v4854_v4 }
 0x790   :  { %6268 = vmatpush3.msra.mxu0 %v5030_v57  ;;  %6235 = vmatpush3.msra.mxu1 %v4838_v21 }
 0x791   :  { %6269 = vmatprep.subr.mxu0 %v5045_v53  ;;  %6236 = vmatprep.subr.mxu1 %v4853_v1 }
 0x792   :  { %6270 = vmatpush3.msra.mxu0 %v5029_v9  ;;  %6237 = vmatpush3.msra.mxu1 %v4837_v54 }
 0x793   :  { %6271 = vmatprep.subr.mxu0 %v5044_v3  ;;  %6238 = vmatprep.subr.mxu1 %v4852_v5 }
 0x794   :  { %6272 = vmatpush3.msra.mxu0 %v5028_v35  ;;  %6239 = vmatpush3.msra.mxu1 %v4836_v46 }
 0x795   :  { %6273 = vmatprep.subr.mxu0 %v5043_v11  ;;  %6240 = vmatprep.subr.mxu1 %v4851_v16 }
 0x796   :  { %6274 = vmatpush3.msra.mxu0 %v5027_v10  ;;  %6241 = vmatpush3.msra.mxu1 %v4835_v14  ;;  %v4685_v14 = vld [vmem:[#allocation16 + $0x1] ss:$4 sm:$0x3] }
 0x797   :  { %6275 = vmatprep.subr.mxu0 %v5042_v63  ;;  %6242 = vmatprep.subr.mxu1 %v4850_v27 }
 0x798   :  { %6276 = vmatpush3.msra.mxu0 %v5026_v45  ;;  %6243 = vmatpush3.msra.mxu1 %v4834_v43  ;;  %v4702_v43 = vrot.slane %v4685_v14, %v7474_v20 }
 0x799   :  { %6277 = vmatprep.subr.mxu0 %v5041_v25  ;;  %6244 = vmatprep.subr.mxu1 %v4849_v17  ;;  %v4706_v17 = vrot.slane %v4685_v14, %v7480_v28 }
 0x79a   :  { %6278 = vmatpush3.msra.mxu0 %v5025_v44  ;;  %6245 = vmatpush3.msra.mxu1 %v4833_v59  ;;  %v4730_v59 = vld [vmem:[#allocation16 + $0x2] ss:$4 sm:$0x3] }
 0x79b   :  { %6279 = vmatprep.subr.mxu0 %v5040_v18  ;;  %6246 = vmatprep.subr.mxu1 %v4848_v49 }
 0x79c   :  { %6280 = vmatpush3.msra.mxu0 %v5024_v47  ;;  %6247 = vmatpush3.msra.mxu1 %v4832_v24 }
 0x79d   :  { %6281 = vmatprep.subr.mxu0 %v5039_v52  ;;  %6248 = vmatprep.subr.mxu1 %v4847_v29 }
 0x79e   :  { %6282 = vmatpush3.msra.mxu0 %v5023_v2  ;;  %6249 = vmatpush3.msra.mxu1 %v4831_v0 }
 0x79f   :  { %6283 = vmatprep.subr.mxu0 %v5038_v15  ;;  %6250 = vmatprep.subr.mxu1 %v4846_v31 }
 0x7a0   :  { %6284 = vmatpush3.msra.mxu0 %v5022_v30  ;;  %6251 = vmatpush3.msra.mxu1 %v4830_v48 }
 0x7a1   :  { %6285 = vmatprep.subr.mxu0 %v5037_v32  ;;  %6252 = vmatprep.subr.mxu1 %v4845_v62 }
 0x7a2   :  { %6286 = vmatpush3.msra.mxu0 %v5021_v60  ;;  %6253 = vmatpush3.msra.mxu1 %v4829_v38 }
 0x7a3   :  { %6287 = vmatprep.subr.mxu0 %v5036_v37  ;;  %6254 = vmatprep.subr.mxu1 %v4844_v41 }
 0x7a4   :  { %6288 = vmatpush3.msra.mxu0 %v5020_v23  ;;  %6255 = vmatpush3.msra.mxu1 %v4828_v33 }
 0x7a5   :  { %6289 = vmatprep.subr.mxu0 %v5035_v34  ;;  %6256 = vmatprep.subr.mxu1 %v4843_v51 }
 0x7a6   :  { %6290 = vmatpush3.msra.mxu0 %v5019_v61  ;;  %6257 = vmatpush3.msra.mxu1 %v4827_v13 }
 0x7a7   :  { %6291 = vmatprep.subr.mxu0 %v5034_v42  ;;  %6258 = vmatprep.subr.mxu1 %v4842_v6 }
 0x7a8   :  { %6292 = vmatpush3.msra.mxu0 %v5018_v36  ;;  %6259 = vmatpush3.msra.mxu1 %v4826_v50 }
 0x7a9   :  { %6293 = vmatprep.subr.mxu0 %v5033_v12  ;;  %6337 = vmatprep.subr.bf16.mxu1 %v6945_v56 }
 0x7aa   :  { %6294 = vmatpush3.msra.mxu0 %v5017_v58 }
 0x7ab   :  { %6357 = vmatprep.subr.bf16.mxu0 %v6945_v56 }
 0x849   :  { %v4598_v55 = vpop.f32.mrf.mxu1 }
 0x84a   :  { %v4603_v39 = vmul.f32 0.0078125, %v4598_v55 }
 0x84b   :  { %v4600_v57 = vpop.f32.mrf.mxu1  ;;  %v4671_v4 = vpop.f32.mrf.mxu0 }
 0x84c   :  { %v4678_v53 = vmul.f32 %v4603_v39, %v4603_v39  ;;  %v4604_v21 = vmul.f32 0.0078125, %v4600_v57  ;;  %v4676_v9 = vmul.f32 0.0078125, %v4671_v4  ;;  %v4689_v63 = vrot.slane %v4603_v39, %v7474_v20 }
 0x84d   :  { %v4673_v1 = vpop.f32.mrf.mxu0 }
 0x84e   :  { %v4679_v3 = vmul.f32 %v4604_v21, %v4604_v21  ;;  %v4680_v54 = vsub.f32 %v4676_v9, %v4678_v53  ;;  %v4677_v35 = vmul.f32 0.0078125, %v4673_v1  ;;  %v4693_v45 = vrot.slane %v4604_v21, %v7474_v20 }
 0x84f   :  { %v4694_v27 = vsub.f32 %v8241_v40, %v4689_v63  ;;  %v4696_v25 = vsub.f32 %v8245_v8, %v4689_v63  ;;  %v4735_v40 = vrot.slane %v4730_v59, %v7474_v20  ;;  %v4739_v8 = vrot.slane %v4730_v59, %v7480_v28 }
 0x850   :  { %v4682_v5 = vmax.f32 %v4680_v54, 0.0  ;;  %v4681_v11 = vsub.f32 %v4677_v35, %v4679_v3  ;;  %v4695_v44 = vsub.f32 %v8243_v19, %v4693_v45  ;;  %v4697_v18 = vsub.f32 %v8253_v7, %v4693_v45 }
 0x851   :  { %v4709_v49 = vmul.f32 %v4702_v43, %v4694_v27  ;;  %v4711_v52 = vmul.f32 %v4702_v43, %v4696_v25 }
 0x852   :  { %v4713_v46 = vadd.f32 1e-05, %v4682_v5  ;;  %v4683_v10 = vmax.f32 %v4681_v11, 0.0  ;;  %v4710_v29 = vmul.f32 %v4706_v17, %v4695_v44  ;;  %v4712_v15 = vmul.f32 %v4706_v17, %v4697_v18 }
 0x854   :  { %6689 = vrsqrt.f32 %v4713_v46  ;;  %v4714_v16 = vadd.f32 1e-05, %v4683_v10 }
 0x856   :  { %6691 = vrsqrt.f32 %v4714_v16 }
 0x861   :  { %v6690_v47 = vpop.eup %6689 }
 0x862   :  { %v4720_v24 = vrot.slane %v6690_v47, %v7474_v20 }
 0x863   :  { %v6692_v2 = vpop.eup %6691 }
 0x864   :  { %v4725_v0 = vmul.f32 %v4720_v24, %v4709_v49  ;;  %v4727_v30 = vmul.f32 %v4720_v24, %v4711_v52  ;;  %v4724_v19 = vrot.slane %v6692_v2, %v7474_v20 }
 0x866   :  { %v4726_v31 = vmul.f32 %v4724_v19, %v4710_v29  ;;  %v4728_v32 = vmul.f32 %v4724_v19, %v4712_v15  ;;  %v4742_v7 = vadd.f32 %v4735_v40, %v4725_v0  ;;  %v4744_v60 = vadd.f32 %v4735_v40, %v4727_v30 }
 0x868   :  { %v4743_v48 = vadd.f32 %v4739_v8, %v4726_v31  ;;  %v4745_v62 = vadd.f32 %v4739_v8, %v4728_v32  ;;  %v6647_v31 = vld [vmem:[%s8488_s13 + $0x78] sm:$0xff]  }
 0x86a   :  { %v4750_v37 = vcombine.low %v4742_v7, %v4743_v48  ;;  %v4751_v38 = vcombine.high %v4742_v7, %v4743_v48  ;;  %v4768_v23 = vcombine.low %v4744_v60, %v4745_v62  ;;  %v4769_v41 = vcombine.high %v4744_v60, %v4745_v62  ;;  %v6650_v60 = vld [vmem:[%s8488_s13 + $0x30] sm:$0xff]   ;;  %v6651_v62 = vld [vmem:[%s8488_s13 + $0x68] sm:$0xff]  }
 0x86c   :  { %v4758_v34 = vrot.slane %v4750_v37, %v7600_v22  ;;  %v4765_v33 = vrot.slane %v4751_v38, %v7600_v22  ;;  %v4776_v28 = vrot.slane %v4768_v23, %v7600_v22  ;;  %v4783_v61 = vrot.slane %v4769_v41, %v7600_v22  ;;  %v6652_v37 = vld [vmem:[%s8488_s13 + $0x28] sm:$0xff]   ;;  %v6653_v38 = vld [vmem:[%s8488_s13 + $0x60] sm:$0xff]   ;;  %v6655_v41 = vld [vmem:[%s8488_s13 + $0x58] sm:$0xff]  }
 0x86d   :  { %v6654_v23 = vld [vmem:[%s8488_s13 + $0x20] sm:$0xff]  }
 0x86e   :  { %v4766_v51 = vcombine.high %v4758_v34, %v4758_v34  ;;  %v4767_v42 = vcombine.high %v4765_v33, %v4765_v33  ;;  %v4784_v13 = vcombine.high %v4776_v28, %v4776_v28  ;;  %v4785_v36 = vcombine.high %v4783_v61, %v4783_v61 }
 0x86f   :  { %v5963_v6 = vrot.slane %v4758_v34, 9  ;;  %v5965_v12 = vrot.slane %v4765_v33, 9  ;;  %v5967_v50 = vrot.slane %v4776_v28, 9  ;;  %v5969_v57 = vrot.slane %v4783_v61, 9 }
 0x870   :  { %v5964_v58 = vrot.slane %v4766_v51, 9  ;;  %v5966_v55 = vrot.slane %v4767_v42, 9  ;;  %v5968_v39 = vrot.slane %v4784_v13, 9  ;;  %v5970_v21 = vrot.slane %v4785_v36, 9 }
 0x871   :  { %v4818_v4 = vmax.f32 %v4758_v34, %v5963_v6  ;;  %v4820_v53 = vmax.f32 %v4765_v33, %v5965_v12  ;;  %v4822_v3 = vmax.f32 %v4776_v28, %v5967_v50  ;;  %v4824_v5 = vmax.f32 %v4783_v61, %v5969_v57  ;;  %v6656_v34 = vld [vmem:[%s8488_s13 + $0x18] sm:$0xff]   ;;  %v6657_v33 = vld [vmem:[%s8488_s13 + $0x50] sm:$0xff]   ;;  %v6659_v61 = vld [vmem:[%s8488_s13 + $0x48] sm:$0xff]  }
 0x872   :  { %v4819_v9 = vmax.f32 %v4766_v51, %v5964_v58  ;;  %v4821_v1 = vmax.f32 %v4767_v42, %v5966_v55  ;;  %v4823_v54 = vmax.f32 %v4784_v13, %v5968_v39  ;;  %v4825_v16 = vmax.f32 %v4785_v36, %v5970_v21  ;;  %v6658_v28 = vld [vmem:[%s8488_s13 + $0x10] sm:$0xff]   ;;  %v6660_v51 = vld [vmem:[%s8488_s13 + $0x8] sm:$0xff]   ;;  %v6661_v42 = vld [vmem:[%s8488_s13 + $0x40] sm:$0xff]  }
 0x873   :  { %v4873_v22 = vrot.slane %v4818_v4, %v7595_v26  ;;  %v4889_v11 = vrot.slane %v4820_v53, %v7595_v26  ;;  %v4869_v46 = vrot.slane %v4818_v4, %v7474_v20  ;;  %v4885_v45 = vrot.slane %v4820_v53, %v7474_v20  ;;  %v6662_v13 = vld [vmem:[%s8488_s13] sm:$0xff]  }
 0x874   :  { %v4881_v35 = vrot.slane %v4819_v9, %v7595_v26  ;;  %v4877_v10 = vrot.slane %v4819_v9, %v7474_v20  ;;  %v4897_v63 = vrot.slane %v4821_v1, %v7595_v26  ;;  %v4905_v27 = vrot.slane %v4822_v3, %v7595_v26 }
 0x875   :  { %v4893_v43 = vrot.slane %v4821_v1, %v7474_v20  ;;  %v4913_v17 = vrot.slane %v4823_v54, %v7595_v26  ;;  %v4901_v59 = vrot.slane %v4822_v3, %v7474_v20  ;;  %v4921_v49 = vrot.slane %v4824_v5, %v7595_v26 }
 0x876   :  { %v4937_v14 = vsel %vm2048_vm0, %v4881_v35, %v4873_v22  ;;  %v4930_v44 = vsel %vm2048_vm0, %v4877_v10, %v4869_v46  ;;  %v4909_v24 = vrot.slane %v4823_v54, %v7474_v20  ;;  %v4929_v29 = vrot.slane %v4825_v16, %v7595_v26  ;;  %v6648_v26 = vld [vmem:[%s8488_s13 + $0x38] sm:$0xff]  }
 0x877   :  { %v4938_v25 = vsel %vm2050_vm2, %v4889_v11, %v4937_v14  ;;  %v4931_v47 = vsel %vm2050_vm2, %v4885_v45, %v4930_v44  ;;  %v4917_v8 = vrot.slane %v4824_v5, %v7474_v20  ;;  %v4925_v30 = vrot.slane %v4825_v16, %v7474_v20  ;;  %v6649_v20 = vld [vmem:[%s8488_s13 + $0x70] sm:$0xff]   ;;  %v6663_v22 = vld [vmem:[%s8488_s13 + $0xb8] sm:$0xff]   ;;  %v6667_v14 = vld [vmem:[%s8488_s13 + $0xa8] sm:$0xff]  }
 0x878   :  { %v4939_v18 = vsel %vm2052_vm4, %v4897_v63, %v4938_v25  ;;  %v4932_v2 = vsel %vm2052_vm4, %v4893_v43, %v4931_v47  ;;  %v6664_v46 = vld [vmem:[%s8488_s13 + $0xf8] sm:$0xff]   ;;  %v6665_v16 = vld [vmem:[%s8488_s13 + $0xb0] sm:$0xff]   ;;  %v6668_v45 = vld [vmem:[%s8488_s13 + $0xe8] sm:$0xff]  }
 0x879   :  { %v4940_v52 = vsel %vm2054_vm5, %v4905_v27, %v4939_v18  ;;  %v4933_v15 = vsel %vm2054_vm5, %v4901_v59, %v4932_v2  ;;  %v6666_v63 = vld [vmem:[%s8488_s13 + $0xf0] sm:$0xff]   ;;  %v6669_v27 = vld [vmem:[%s8488_s13 + $0xa0] sm:$0xff]   ;;  %v6671_v43 = vld [vmem:[%s8488_s13 + $0x98] sm:$0xff]  }
 0x87a   :  { %v4941_v40 = vsel %vm2056_vm6, %v4913_v17, %v4940_v52  ;;  %v4934_v19 = vsel %vm2056_vm6, %v4909_v24, %v4933_v15  ;;  %v6670_v25 = vld [vmem:[%s8488_s13 + $0xe0] sm:$0xff]   ;;  %v6672_v44 = vld [vmem:[%s8488_s13 + $0xd8] sm:$0xff]   ;;  %v6673_v17 = vld [vmem:[%s8488_s13 + $0x90] sm:$0xff]  }
 0x87b   :  { %v4942_v0 = vsel %vm2058_vm8, %v4921_v49, %v4941_v40  ;;  %v4935_v7 = vsel %vm2058_vm8, %v4917_v8, %v4934_v19  ;;  %v6674_v18 = vld [vmem:[%s8488_s13 + $0xd0] sm:$0xff]   ;;  %v6675_v59 = vld [vmem:[%s8488_s13 + $0x88] sm:$0xff]   ;;  %v6677_v52 = vld [vmem:[%s8488_s13 + $0x80] sm:$0xff]  }
 0x87c   :  { %v4943_v32 = vsel %vm2060_vm9, %v4929_v29, %v4942_v0  ;;  %v4936_v48 = vsel %vm2060_vm9, %v4925_v30, %v4935_v7  ;;  %v6676_v47 = vld [vmem:[%s8488_s13 + $0xc8] sm:$0xff]   ;;  %v6678_v29 = vld [vmem:[%s8488_s13 + $0xc0] sm:$0xff]  }
 0x87d   :  { %5010 = vmatprep.mubr.f32.mxu1 %v4943_v32  ;;  %5113 = vmatprep.mubr.f32.mxu0 %v4943_v32  ;;  %v6679_v19 = vld [vmem:[%s8490_s15 + $0x8] sm:$0xff]  }
 0x87e   :  { %5011 = vmatmul.mubr.f32.vlgmr.msra.gmra.mxu1 %v4936_v48  ;;  %5114 = vmatmul.mubr.f32.vlgmr.msra.gmra.mxu0 %v4936_v48 }
 0x87f   :  { %6338 = vmatpush3.bf16.msra.mxu1 %v6647_v31  ;;  %6358 = vmatpush3.bf16.msra.mxu0 %v6648_v26  ;;  %v6680_v31 = vld [vmem:[%s8490_s15] sm:$0xff]  }
 0x880   :  { %6339 = vmatprep.subr.bf16.mxu1 %v6945_v56  ;;  %6359 = vmatprep.subr.bf16.mxu0 %v6945_v56 }
 0x881   :  { %6353 = vmatprep.mubr.msk.bf16.mxu1 %vm6946_vm3, %v6945_v56  ;;  %6373 = vmatprep.mubr.msk.bf16.mxu0 %vm6946_vm3, %v6945_v56 }
 0x883   :  { %6340 = vmatpush3.bf16.msra.mxu1 %v6649_v20  ;;  %6360 = vmatpush3.bf16.msra.mxu0 %v6650_v60 }
 0x884   :  { %6341 = vmatprep.subr.bf16.mxu1 %v6945_v56  ;;  %6361 = vmatprep.subr.bf16.mxu0 %v6945_v56 }
 0x887   :  { %6342 = vmatpush3.bf16.msra.mxu1 %v6651_v62  ;;  %6362 = vmatpush3.bf16.msra.mxu0 %v6652_v37 }
 0x888   :  { %6343 = vmatprep.subr.bf16.mxu1 %v6945_v56  ;;  %6363 = vmatprep.subr.bf16.mxu0 %v6945_v56 }
 0x88b   :  { %6344 = vmatpush3.bf16.msra.mxu1 %v6653_v38  ;;  %6364 = vmatpush3.bf16.msra.mxu0 %v6654_v23 }
 0x88c   :  { %6345 = vmatprep.subr.bf16.mxu1 %v6945_v56  ;;  %6365 = vmatprep.subr.bf16.mxu0 %v6945_v56 }
 0x88f   :  { %6346 = vmatpush3.bf16.msra.mxu1 %v6655_v41  ;;  %6366 = vmatpush3.bf16.msra.mxu0 %v6656_v34 }
 0x890   :  { %6347 = vmatprep.subr.bf16.mxu1 %v6945_v56  ;;  %6367 = vmatprep.subr.bf16.mxu0 %v6945_v56 }
 0x893   :  { %6348 = vmatpush3.bf16.msra.mxu1 %v6657_v33  ;;  %6368 = vmatpush3.bf16.msra.mxu0 %v6658_v28  ;;  %v6051_v28 = vld [vmem:[#allocation20] ss:$0 sm:$0xff] }
 0x894   :  { %6349 = vmatprep.subr.bf16.mxu1 %v6945_v56  ;;  %6369 = vmatprep.subr.bf16.mxu0 %v6945_v56 }
 0x897   :  { %6350 = vmatpush3.bf16.msra.mxu1 %v6659_v61  ;;  %6370 = vmatpush3.bf16.msra.mxu0 %v6660_v51 }
 0x898   :  { %6351 = vmatprep.subr.bf16.mxu1 %v6945_v56  ;;  %6371 = vmatprep.subr.bf16.mxu0 %v6945_v56 }
 0x89b   :  { %6352 = vmatpush3.bf16.msra.mxu1 %v6661_v42  ;;  %6372 = vmatpush3.bf16.msra.mxu0 %v6662_v13 }
 0x89c   :  { %6377 = vmatprep.subr.bf16.mxu1 %v6945_v56  ;;  %6397 = vmatprep.subr.bf16.mxu0 %v6945_v56 }
 0x93e   :  { %v6260_v36 = vpop.f32.mrf.mxu1  ;;  %v6295_v6 = vpop.f32.mrf.mxu0 }
 0x940   :  { %v6261_v12 = vpop.f32.mrf.mxu1  ;;  %v6296_v50 = vpop.f32.mrf.mxu0 }
 0x941   :  { %v6262_v58 = vadd.f32 %v6261_v12, %v6260_v36  ;;  %v6297_v55 = vadd.f32 %v6296_v50, %v6295_v6 }
 0x943   :  { %v5119_v39 = vmax.f32 %v6262_v58, %v6297_v55 }
 0x945   :  { %v5120_v57 = vmax.f32 %v5119_v39, 0.0 }
 0x947   :  { %v5122_v4 = vcombine.high %v5120_v57, %v5120_v57  ;;  %v5124_v53 = vpack.c.bf16 %v5120_v57, %v5120_v57 }
 0x949   :  { %v5125_v21 = vpack.c.bf16 %v5122_v4, %v5122_v4  ;;  %v8377_v9 = vunpack.c.l.b16 %v5124_v53 }
 0x94b   :  { %v8379_v1 = vunpack.c.l.b16 %v5125_v21  ;;  %v5163_v3 = vrot.slane %v8377_v9, 1  ;;  %v5364_v24 = vrot.slane %v8377_v9, 2  ;;  %v5475_v8 = vrot.slane %v8377_v9, 3 }
 0x94d   :  { %v5164_v54 = vsel %vm2048_vm0, %v8379_v1, %v5163_v3  ;;  %v5255_v35 = vrot.slane %v8379_v1, 7  ;;  %v5365_v49 = vrot.slane %v8379_v1, 1  ;;  %v5476_v2 = vrot.slane %v8379_v1, 2 }
 0x94e   :  { %v5165_v5 = vpack.c.b16 %v5164_v54, %v5164_v54 }
 0x94f   :  { %v5256_v11 = vsel %vm2048_vm0, %v5255_v35, %v8377_v9  ;;  %v5366_v40 = vsel %vm2048_vm0, %v5365_v49, %v5364_v24  ;;  %v5477_v15 = vsel %vm2048_vm0, %v5476_v2, %v5475_v8 }
 0x950   :  { %6354 = vmatmul.mubr.bf16.vlgmr.msra.gmra.mxu1 %v5165_v5  ;;  %v5257_v10 = vpack.c.b16 %v5256_v11, %v5256_v11  ;;  %v5367_v0 = vpack.c.b16 %v5366_v40, %v5366_v40  ;;  %v5478_v30 = vpack.c.b16 %v5477_v15, %v5477_v15 }
 0x951   :  { %6378 = vmatpush3.bf16.msra.mxu1 %v6663_v22  ;;  %6393 = vmatprep.mubr.msk.bf16.mxu1 %vm6946_vm3, %v6945_v56 }
 0x952   :  { %6374 = vmatmul.mubr.bf16.vlgmr.msra.gmra.mxu0 %v5257_v10  ;;  %6379 = vmatprep.subr.bf16.mxu1 %v6945_v56 }
 0x953   :  { %6398 = vmatpush3.bf16.msra.mxu0 %v6664_v46  ;;  %6413 = vmatprep.mubr.msk.bf16.mxu0 %vm6946_vm3, %v6945_v56 }
 0x954   :  { %6399 = vmatprep.subr.bf16.mxu0 %v6945_v56 }
 0x955   :  { %6380 = vmatpush3.bf16.msra.mxu1 %v6665_v16 }
 0x956   :  { %6381 = vmatprep.subr.bf16.mxu1 %v6945_v56 }
 0x957   :  { %6400 = vmatpush3.bf16.msra.mxu0 %v6666_v63 }
 0x958   :  { %6401 = vmatprep.subr.bf16.mxu0 %v6945_v56 }
 0x959   :  { %6382 = vmatpush3.bf16.msra.mxu1 %v6667_v14 }
 0x95a   :  { %6383 = vmatprep.subr.bf16.mxu1 %v6945_v56 }
 0x95b   :  { %6402 = vmatpush3.bf16.msra.mxu0 %v6668_v45  ;;  %v6052_v45 = vld [vmem:[#allocation20 + $0x1] ss:$0 sm:$0xff] }
 0x95c   :  { %6403 = vmatprep.subr.bf16.mxu0 %v6945_v56 }
 0x95d   :  { %6384 = vmatpush3.bf16.msra.mxu1 %v6669_v27 }
 0x95e   :  { %6385 = vmatprep.subr.bf16.mxu1 %v6945_v56 }
 0x95f   :  { %6404 = vmatpush3.bf16.msra.mxu0 %v6670_v25 }
 0x960   :  { %6405 = vmatprep.subr.bf16.mxu0 %v6945_v56 }
 0x961   :  { %6386 = vmatpush3.bf16.msra.mxu1 %v6671_v43  ;;  %v6053_v43 = vld [vmem:[#allocation20 + $0x2] ss:$0 sm:$0xff] }
 0x962   :  { %6387 = vmatprep.subr.bf16.mxu1 %v6945_v56 }
 0x963   :  { %6406 = vmatpush3.bf16.msra.mxu0 %v6672_v44 }
 0x964   :  { %6407 = vmatprep.subr.bf16.mxu0 %v6945_v56 }
 0x965   :  { %6388 = vmatpush3.bf16.msra.mxu1 %v6673_v17 }
 0x966   :  { %6389 = vmatprep.subr.bf16.mxu1 %v6945_v56 }
 0x967   :  { %6408 = vmatpush3.bf16.msra.mxu0 %v6674_v18 }
 0x968   :  { %6409 = vmatprep.subr.bf16.mxu0 %v6945_v56 }
 0x969   :  { %6390 = vmatpush3.bf16.msra.mxu1 %v6675_v59 }
 0x96a   :  { %6391 = vmatprep.subr.bf16.mxu1 %v6945_v56 }
 0x96b   :  { %6410 = vmatpush3.bf16.msra.mxu0 %v6676_v47  ;;  %v6054_v47 = vld [vmem:[%s8491_s16] ss:$0 sm:$0xff] }
 0x96c   :  { %6411 = vmatprep.subr.bf16.mxu0 %v6945_v56 }
 0x96d   :  { %6392 = vmatpush3.bf16.msra.mxu1 %v6677_v52 }
 0x96e   :  { %6417 = vmatprep.subr.bf16.mxu1 %v6945_v56 }
 0x96f   :  { %6412 = vmatpush3.bf16.msra.mxu0 %v6678_v29 }
 0x970   :  { %6394 = vmatmul.mubr.bf16.vlgmr.msra.gmra.mxu1 %v5367_v0 }
 0x971   :  { %6421 = vmatprep.mubr.msk.bf16.mxu1 %vm6946_vm3, %v6945_v56  ;;  %6418 = vmatpush3.bf16.msra.mxu1 %v6679_v19 }
 0x972   :  { %6414 = vmatmul.mubr.bf16.vlgmr.msra.gmra.mxu0 %v5478_v30  ;;  %6419 = vmatprep.subr.bf16.mxu1 %v6945_v56 }
 0x975   :  { %6420 = vmatpush3.bf16.msra.mxu1 %v6680_v31 }
 0xa10   :  { %v5249_v26 = vpop.f32.mrf.mxu1 }
 0xa12   :  { %v6355_v32 = vpop.f32.mrf.mxu1  ;;  %v5341_v7 = vpop.f32.mrf.mxu0 }
 0xa13   :  { %v5342_v38 = vadd.f32 %v5341_v7, %v5249_v26 }
 0xa14   :  { %v5252_v48 = vpop.f32.mrf.mxu1  ;;  %v6375_v20 = vpop.f32.mrf.mxu0 }
 0xa16   :  { %v6356_v60 = vpop.f32.mrf.mxu1  ;;  %v5344_v62 = vpop.f32.mrf.mxu0 }
 0xa18   :  { %v6376_v37 = vpop.f32.mrf.mxu0 }
 0xa30   :  { %v5451_v23 = vpop.f32.mrf.mxu1 }
 0xa31   :  { %v5457_v41 = vadd.f32 %v5451_v23, %v5342_v38 }
 0xa32   :  { %v6395_v34 = vpop.f32.mrf.mxu1  ;;  %v5562_v33 = vpop.f32.mrf.mxu0 }
 0xa33   :  { %v5568_v61 = vadd.f32 %v5562_v33, %v5457_v41 }
 0xa34   :  { %v5454_v51 = vpop.f32.mrf.mxu1  ;;  %v6415_v42 = vpop.f32.mrf.mxu0 }
 0xa35   :  { %v5574_v56 = vadd.f32 %v6051_v28, %v5568_v61 }
 0xa36   :  { %v6396_v13 = vpop.f32.mrf.mxu1  ;;  %v5565_v36 = vpop.f32.mrf.mxu0 }
 0xa37   :  { %v5576_v6 = vsel %vm5575_vm7, %v5574_v56, 0.0  ;;  %v5585_v12 = vmul.f32 %v5574_v56, %v5574_v56 }
 0xa38   :  { %v5577_v50 = vrot.slane %v5576_v6, 4  ;;  %v6416_v58 = vpop.f32.mrf.mxu0 }
 0xa39   :  { %v5586_v55 = vsel %vm5575_vm7, %v5585_v12, 0.0 }
 0xa3a   :  { %v5578_v39 = vadd.f32 %v5577_v50, %v5576_v6  ;;  %v5587_v57 = vrot.slane %v5586_v55, 4 }
 0xa3c   :  { %v5579_v4 = vrot.slane %v5578_v39, 2  ;;  %v5588_v53 = vadd.f32 %v5587_v57, %v5586_v55 }
 0xa3e   :  { %v5580_v21 = vadd.f32 %v5579_v4, %v5578_v39  ;;  %v5589_v9 = vrot.slane %v5588_v53, 2 }
 0xa40   :  { %v5581_v1 = vrot.slane %v5580_v21, 1  ;;  %v5590_v3 = vadd.f32 %v5589_v9, %v5588_v53 }
 0xa42   :  { %v5582_v54 = vadd.f32 %v5581_v1, %v5580_v21  ;;  %v5591_v22 = vrot.slane %v5590_v3, 1 }
 0xa44   :  { %v5584_v35 = vmul.f32 0.5, %v5582_v54  ;;  %v5592_v5 = vadd.f32 %v5591_v22, %v5590_v3 }
 0xa46   :  { %v5593_v11 = vmul.f32 0.5, %v5592_v5  ;;  %v5594_v46 = vmul.f32 %v5584_v35, %v5584_v35  ;;  %v5598_v14 = vsub.f32 %v5574_v56, %v5584_v35 }
 0xa48   :  { %v5595_v10 = vsub.f32 %v5593_v11, %v5594_v46  ;;  %v5603_v27 = vmul.f32 %v6052_v45, %v5598_v14 }
 0xa4a   :  { %v5596_v16 = vmax.f32 %v5595_v10, 0.0 }
 0xa4c   :  { %v5604_v63 = vadd.f32 1e-05, %v5596_v16 }
 0xa4e   :  { %6693 = vrsqrt.f32 %v5604_v63 }
 0xa5b   :  { %v6694_v25 = vpop.eup %6693 }
 0xa5c   :  { %v5606_v44 = vmul.f32 %v6694_v25, %v5603_v27 }
 0xa5e   :  { %v5612_v17 = vadd.f32 %v6053_v43, %v5606_v44 }
 0xa60   :  { %v5613_v18 = vmax.f32 %v5612_v17, 0.0 }
 0xa62   :  { %v5614_v59 = vpack.c.bf16 %v5613_v18, %v5613_v18 }
 0xa64   :  { %6422 = vmatmul.mubr.msk.bf16.vlgmr.msra.gmra.mxu1 %vm5638_vm12, %v5614_v59 }
 0xb24   :  { %v5676_v49 = vpop.f32.mrf.mxu1 }
 0xb25   :  { %v5677_v52 = vadd.f32 %v6054_v47, %v5676_v49 }
 0xb26   :  { %v6423_v24 = vpop.f32.mrf.mxu1 }
 0xb27   :  { %5683 = vst.msk [vmem:[#allocation22] sm:$0x3] %vm5682_vm15, %v5677_v52 }
 0xb28   :  { %v5679_v2 = vpop.f32.mrf.mxu1 }
 0xb29   :  { %6906 = shalt.err (!%p6903_p12)
}
 0xb2a   :  { %5693 = dma.vmem_to_hbm [thread:$0]  %s5691_s6, 32, %s8492_s17, [#allocation7]   ;;  %v6424_v29 = vpop.f32.mrf.mxu1 }
 0xb2b   :  { %6927 = dma.done.wait [#allocation7], 32  }
 0xb2c   :  { %6928 = vsyncadd [#allocation7], 4294967264 }
 0xb2d   :  { %5697 = vsyncpa [#allocation6], 1 }
 0xb2e   :  { %5698 = vsyncpa [#allocation9], 1 }
 0xb2f   :  { %5699 = vsyncpa [#allocation12], 1 }
 0xb30   :  { %5700 = vsyncpa [#allocation15], 1 }
 0xb31   :  { %5701 = vsyncpa [#allocation18], 1 }
 0xb32   :  { %5702 = vsyncpa [#allocation21], 1 }
 0xb33   :  { %5703 = vsyncpa [#allocation7], 1 }

</bundles_post_ra>
